<compile_context>
chip_gen: v7x
topology: tpu7x:2x2x1
jax: 0.10.0
libtpu: 0.0.40
codegen_flags: <defaults>
</compile_context>

<pallas_src>
import functools

import jax
import jax.numpy as jnp
from jax.experimental import pallas as pl
from jax.experimental.pallas import tpu as pltpu


# ---------------------------------------------------------------------------
# Kernel (single invocation, layer loop unrolled in-kernel)
# ---------------------------------------------------------------------------
def fused_mlp_kernel(slope_ref, x_ref, w_ref, scale_ref, hw_ref, hb_ref,
                     out_ref, rep_ref, *, num_layers):
    s = slope_ref[0]                       # leaky-relu slope (SMEM scalar)
    act = x_ref[...]                       # (B, F) f32, lane-padded

    for l in range(num_layers):            # static unroll (L is small)
        # int8 weight -> bf16 (exact), MXU runs native bf16 x bf16 -> f32 acc.
        w_bf16 = w_ref[l].astype(jnp.bfloat16)                       # (F, F)
        y = jnp.dot(act.astype(jnp.bfloat16), w_bf16,
                    preferred_element_type=jnp.float32)              # (B, F)
        # Fold per-output-channel dequant scale into the f32 accumulator
        # BEFORE the nonlinearity.
        y = y * scale_ref[l]                                          # (1, F)
        act = jnp.where(y >= 0.0, y, s * y)                           # f32

    # Pre-head representation (lane-dense full-width store; sliced outside).
    rep_ref[...] = act

    # Head: bf16 x bf16 -> f32 acc, + bias, lane-padded output.
    z = jnp.dot(act.astype(jnp.bfloat16), hw_ref[...],
                preferred_element_type=jnp.float32) + hb_ref[...]
    out_ref[...] = z


# ---------------------------------------------------------------------------
# One-time parameter prep (at init, NOT per forward)
# ---------------------------------------------------------------------------
def prepare_params(hidden_weights, head_w, head_b):
    """Transpose PyTorch (out,in) weights to (in,out), lane-pad 784->896,
    quantize hidden weights to int8 with per-output-channel f32 scales, and
    pad the head to a 128-lane slab (bf16)."""
    L = len(hidden_weights)
    in_dim = hidden_weights[0].shape[1]
    out_dim = head_w.shape[0]
    F = ((in_dim + 127) // 128) * 128          # 784 -> 896
    OP = ((out_dim + 127) // 128) * 128        # 10  -> 128

    # Stacked, transposed, zero-padded hidden weights (f32 staging).
    w_t = jnp.zeros((L, F, F), jnp.float32)
    for l, w in enumerate(hidden_weights):
        w_t = w_t.at[l, :in_dim, :in_dim].set(w.T.astype(jnp.float32))

    # Per-output-channel symmetric int8 quantization.
    absmax = jnp.max(jnp.abs(w_t), axis=1)                      # (L, F)
    scales = jnp.where(absmax > 0, absmax / 127.0, 1.0)         # (L, F)
    w_q = jnp.clip(jnp.round(w_t / scales[:, None, :]), -127, 127).astype(jnp.int8)
    scales = scales[:, None, :]                                 # (L, 1, F)

    # Head: transpose, pad, bf16.
    head_w_t = jnp.zeros((F, OP), jnp.float32).at[:in_dim, :out_dim].set(
        head_w.T.astype(jnp.float32)).astype(jnp.bfloat16)
    head_b_p = jnp.zeros((1, OP), jnp.float32).at[0, :out_dim].set(
        head_b.astype(jnp.float32))
    return w_q, scales, head_w_t, head_b_p, in_dim, out_dim


# ---------------------------------------------------------------------------
# Forward wrapper
# ---------------------------------------------------------------------------
@functools.partial(jax.jit, static_argnames=("in_dim", "out_dim"))
def mlp_forward(x, slope, w_q, scales, head_w_t, head_b_p, *, in_dim, out_dim):
    """Mirrors MLP.forward: returns (head output, pre-head representation)."""
    B = x.shape[0]
    L, _, F = w_q.shape
    OP = head_w_t.shape[1]

    # Lane-pad the input features with zeros (cheap; 896-wide slab).
    x_p = jnp.zeros((B, F), jnp.float32).at[:, :in_dim].set(
        x.astype(jnp.float32))
    slope_arr = jnp.full((1,), slope, dtype=jnp.float32)

    vmem = pltpu.MemorySpace.VMEM
    out_p, rep_p = pl.pallas_call(
        functools.partial(fused_mlp_kernel, num_layers=L),
        out_shape=(
            jax.ShapeDtypeStruct((B, OP), jnp.float32),   # head out (padded)
            jax.ShapeDtypeStruct((B, F), jnp.float32),    # rep (padded)
        ),
        in_specs=[
            pl.BlockSpec(memory_space=pltpu.MemorySpace.SMEM),  # slope scalar
            pl.BlockSpec(memory_space=vmem),                    # x (padded)
            pl.BlockSpec(memory_space=vmem),                    # int8 W stack
            pl.BlockSpec(memory_space=vmem),                    # per-col scales
            pl.BlockSpec(memory_space=vmem),                    # head W (bf16)
            pl.BlockSpec(memory_space=vmem),                    # head b
        ],
        out_specs=(
            pl.BlockSpec(memory_space=vmem),
            pl.BlockSpec(memory_space=vmem),
        ),
    )(slope_arr, x_p, w_q, scales, head_w_t, head_b_p)

    return out_p[:, :out_dim], rep_p[:, :in_dim]


# ---------------------------------------------------------------------------
# Main
# ---------------------------------------------------------------------------
if __name__ == "__main__":
    num_layers = 3
    batch = 8            # NOTE: if evaluating many samples, batch them into one
                         # call (B up to ~512-1024) to amortize the weight DMA.
    in_dim = 784
    out_dim = 10
    slope = 0.01

    key = jax.random.PRNGKey(0)
    keys = jax.random.split(key, num_layers + 3)

    x = jax.random.normal(keys[0], (batch, in_dim), dtype=jnp.float32)

    # Deterministic parameter init (PyTorch-style shapes: (out, in)).
    scale_w = 1.0 / jnp.sqrt(jnp.float32(in_dim))
    hidden_weights = [
        jax.random.uniform(keys[1 + i], (in_dim, in_dim), jnp.float32,
                           minval=-1.0, maxval=1.0) * scale_w
        for i in range(num_layers)
    ]
    head_w = jax.random.uniform(keys[num_layers + 1], (out_dim, in_dim),
                                jnp.float32, minval=-1.0, maxval=1.0) * scale_w
    head_b = jax.random.uniform(keys[num_layers + 2], (out_dim,),
                                jnp.float32, minval=-1.0, maxval=1.0) * scale_w

    # One-time prep: transpose + pad + int8 quantize + head bf16 slab.
    w_q, scales, head_w_t, head_b_p, idim, odim = prepare_params(
        hidden_weights, head_w, head_b)

    out, rep = mlp_forward(x, slope, w_q, scales, head_w_t, head_b_p,
                           in_dim=idim, out_dim=odim)
    jax.block_until_ready(out)
    jax.block_until_ready(rep)
    # TODO(synk): torch's rep.cpu() is just a host copy; `rep` stays a device
    # array here and the caller can jax.device_get it if needed.

    # Pure-JAX reference with IDENTICALLY quantized weights (int8 + per-column
    # scale for hidden layers, bf16 head) and bf16-rounded activations fed to
    # each matmul, mirroring the kernel's MXU inputs.
    xr = x
    for l in range(num_layers):
        w_deq = (w_q[l, :in_dim, :in_dim].astype(jnp.float32)
                 * scales[l, 0, :in_dim][None, :])
        a16 = xr.astype(jnp.bfloat16).astype(jnp.float32)
        y = a16 @ w_deq
        xr = jnp.where(y >= 0.0, y, slope * y)
    rep_ref_arr = xr
    hw_deq = head_w_t[:in_dim, :out_dim].astype(jnp.float32)
    a16 = xr.astype(jnp.bfloat16).astype(jnp.float32)
    out_ref_arr = a16 @ hw_deq + head_b

    assert out.shape == (batch, out_dim) and rep.shape == (batch, in_dim)
    assert jnp.allclose(out, out_ref_arr, atol=1e-2, rtol=1e-2), \
        float(jnp.max(jnp.abs(out - out_ref_arr)))
    assert jnp.allclose(rep, rep_ref_arr, atol=1e-2, rtol=1e-2), \
        float(jnp.max(jnp.abs(rep - rep_ref_arr)))

    print("KERNEL_OK")
</pallas_src>

<mosaic_0001>
module attributes {stable_mosaic.version = 11 : i64} {
  func.func @fused_mlp_kernel(%arg0: memref<1xf32, #tpu.memory_space<smem>>, %arg1: memref<8x896xf32, #tpu.memory_space<vmem>>, %arg2: memref<3x896x896xi8, #tpu.memory_space<vmem>>, %arg3: memref<3x1x896xf32, #tpu.memory_space<vmem>>, %arg4: memref<896x128xbf16, #tpu.memory_space<vmem>>, %arg5: memref<1x128xf32, #tpu.memory_space<vmem>>, %arg6: memref<8x128xf32, #tpu.memory_space<vmem>>, %arg7: memref<8x896xf32, #tpu.memory_space<vmem>>) attributes {dimension_semantics = [], scalar_prefetch = 0 : i64, scratch_operands = 0 : i64, tpu.core_type = #tpu.core_type<tc>} {
    %c0 = arith.constant 0 : index
    %0 = memref.load %arg0[%c0] : memref<1xf32, #tpu.memory_space<smem>>
    %c0_0 = arith.constant 0 : index
    %c0_1 = arith.constant 0 : index
    %1 = vector.load %arg1[%c0_0, %c0_1] : memref<8x896xf32, #tpu.memory_space<vmem>>, vector<8x896xf32>
    %c0_2 = arith.constant 0 : index
    %c0_3 = arith.constant 0 : index
    %c0_4 = arith.constant 0 : index
    %2 = vector.load %arg2[%c0_2, %c0_3, %c0_4] : memref<3x896x896xi8, #tpu.memory_space<vmem>>, vector<1x896x896xi8>
    %3 = vector.shape_cast %2 : vector<1x896x896xi8> to vector<896x896xi8>
    %4 = arith.sitofp %3 : vector<896x896xi8> to vector<896x896xbf16>
    %5 = arith.truncf %1 : vector<8x896xf32> to vector<8x896xbf16>
    %cst = arith.constant dense<0.000000e+00> : vector<8x896xf32>
    %6 = tpu.matmul %5, %4, %cst {dimension_numbers = #tpu.dot_dimension_numbers<[1], [0], [0], [1], [0, 0, 1, 1], [], []>} : vector<8x896xbf16>, vector<896x896xbf16>, vector<8x896xf32> -> vector<8x896xf32>
    %c0_5 = arith.constant 0 : index
    %c0_6 = arith.constant 0 : index
    %c0_7 = arith.constant 0 : index
    %7 = vector.load %arg3[%c0_5, %c0_6, %c0_7] : memref<3x1x896xf32, #tpu.memory_space<vmem>>, vector<1x1x896xf32>
    %8 = vector.shape_cast %7 : vector<1x1x896xf32> to vector<1x896xf32>
    %9 = vector.broadcast %8 : vector<1x896xf32> to vector<8x896xf32>
    %10 = arith.mulf %6, %9 : vector<8x896xf32>
    %cst_8 = arith.constant 0.000000e+00 : f32
    %11 = vector.broadcast %cst_8 : f32 to vector<8x896xf32>
    %12 = arith.cmpf oge, %10, %11 : vector<8x896xf32>
    %13 = vector.broadcast %0 : f32 to vector<8x896xf32>
    %14 = arith.mulf %13, %10 : vector<8x896xf32>
    %15 = arith.select %12, %10, %14 : vector<8x896xi1>, vector<8x896xf32>
    %c1 = arith.constant 1 : index
    %c0_9 = arith.constant 0 : index
    %c0_10 = arith.constant 0 : index
    %16 = vector.load %arg2[%c1, %c0_9, %c0_10] : memref<3x896x896xi8, #tpu.memory_space<vmem>>, vector<1x896x896xi8>
    %17 = vector.shape_cast %16 : vector<1x896x896xi8> to vector<896x896xi8>
    %18 = arith.sitofp %17 : vector<896x896xi8> to vector<896x896xbf16>
    %19 = arith.truncf %15 : vector<8x896xf32> to vector<8x896xbf16>
    %cst_11 = arith.constant dense<0.000000e+00> : vector<8x896xf32>
    %20 = tpu.matmul %19, %18, %cst_11 {dimension_numbers = #tpu.dot_dimension_numbers<[1], [0], [0], [1], [0, 0, 1, 1], [], []>} : vector<8x896xbf16>, vector<896x896xbf16>, vector<8x896xf32> -> vector<8x896xf32>
    %c1_12 = arith.constant 1 : index
    %c0_13 = arith.constant 0 : index
    %c0_14 = arith.constant 0 : index
    %21 = vector.load %arg3[%c1_12, %c0_13, %c0_14] : memref<3x1x896xf32, #tpu.memory_space<vmem>>, vector<1x1x896xf32>
    %22 = vector.shape_cast %21 : vector<1x1x896xf32> to vector<1x896xf32>
    %23 = vector.broadcast %22 : vector<1x896xf32> to vector<8x896xf32>
    %24 = arith.mulf %20, %23 : vector<8x896xf32>
    %cst_15 = arith.constant 0.000000e+00 : f32
    %25 = vector.broadcast %cst_15 : f32 to vector<8x896xf32>
    %26 = arith.cmpf oge, %24, %25 : vector<8x896xf32>
    %27 = vector.broadcast %0 : f32 to vector<8x896xf32>
    %28 = arith.mulf %27, %24 : vector<8x896xf32>
    %29 = arith.select %26, %24, %28 : vector<8x896xi1>, vector<8x896xf32>
    %c2 = arith.constant 2 : index
    %c0_16 = arith.constant 0 : index
    %c0_17 = arith.constant 0 : index
    %30 = vector.load %arg2[%c2, %c0_16, %c0_17] : memref<3x896x896xi8, #tpu.memory_space<vmem>>, vector<1x896x896xi8>
    %31 = vector.shape_cast %30 : vector<1x896x896xi8> to vector<896x896xi8>
    %32 = arith.sitofp %31 : vector<896x896xi8> to vector<896x896xbf16>
    %33 = arith.truncf %29 : vector<8x896xf32> to vector<8x896xbf16>
    %cst_18 = arith.constant dense<0.000000e+00> : vector<8x896xf32>
    %34 = tpu.matmul %33, %32, %cst_18 {dimension_numbers = #tpu.dot_dimension_numbers<[1], [0], [0], [1], [0, 0, 1, 1], [], []>} : vector<8x896xbf16>, vector<896x896xbf16>, vector<8x896xf32> -> vector<8x896xf32>
    %c2_19 = arith.constant 2 : index
    %c0_20 = arith.constant 0 : index
    %c0_21 = arith.constant 0 : index
    %35 = vector.load %arg3[%c2_19, %c0_20, %c0_21] : memref<3x1x896xf32, #tpu.memory_space<vmem>>, vector<1x1x896xf32>
    %36 = vector.shape_cast %35 : vector<1x1x896xf32> to vector<1x896xf32>
    %37 = vector.broadcast %36 : vector<1x896xf32> to vector<8x896xf32>
    %38 = arith.mulf %34, %37 : vector<8x896xf32>
    %cst_22 = arith.constant 0.000000e+00 : f32
    %39 = vector.broadcast %cst_22 : f32 to vector<8x896xf32>
    %40 = arith.cmpf oge, %38, %39 : vector<8x896xf32>
    %41 = vector.broadcast %0 : f32 to vector<8x896xf32>
    %42 = arith.mulf %41, %38 : vector<8x896xf32>
    %43 = arith.select %40, %38, %42 : vector<8x896xi1>, vector<8x896xf32>
    %c0_23 = arith.constant 0 : index
    %c0_24 = arith.constant 0 : index
    %44 = vector.load %arg7[%c0_23, %c0_24] : memref<8x896xf32, #tpu.memory_space<vmem>>, vector<8x896xf32>
    tpu.vector_store %arg7[%c0_23, %c0_24], %43 {strides = array<i32>} : memref<8x896xf32, #tpu.memory_space<vmem>>, vector<8x896xf32>,
    %45 = arith.truncf %43 : vector<8x896xf32> to vector<8x896xbf16>
    %c0_25 = arith.constant 0 : index
    %c0_26 = arith.constant 0 : index
    %46 = vector.load %arg4[%c0_25, %c0_26] : memref<896x128xbf16, #tpu.memory_space<vmem>>, vector<896x128xbf16>
    %cst_27 = arith.constant dense<0.000000e+00> : vector<8x128xf32>
    %47 = tpu.matmul %45, %46, %cst_27 {dimension_numbers = #tpu.dot_dimension_numbers<[1], [0], [0], [1], [0, 0, 1, 1], [], []>} : vector<8x896xbf16>, vector<896x128xbf16>, vector<8x128xf32> -> vector<8x128xf32>
    %c0_28 = arith.constant 0 : index
    %c0_29 = arith.constant 0 : index
    %48 = vector.load %arg5[%c0_28, %c0_29] : memref<1x128xf32, #tpu.memory_space<vmem>>, vector<1x128xf32>
    %49 = vector.broadcast %48 : vector<1x128xf32> to vector<8x128xf32>
    %50 = arith.addf %47, %49 : vector<8x128xf32>
    %c0_30 = arith.constant 0 : index
    %c0_31 = arith.constant 0 : index
    %51 = vector.load %arg6[%c0_30, %c0_31] : memref<8x128xf32, #tpu.memory_space<vmem>>, vector<8x128xf32>
    tpu.vector_store %arg6[%c0_30, %c0_31], %50 {strides = array<i32>} : memref<8x128xf32, #tpu.memory_space<vmem>>, vector<8x128xf32>,
    return
  }
}

</mosaic_0001>

<bundles_post_ra>
// kernel: mlp_forward.1
= control target key start
LH: loop header
LB: loop body
LE: loop exit
PB: predicated region body
PF: predicated region fallthrough
CT: control target
= control target key end

     0   :  { %14 = vsyncpa [#allocation4], 0  ;;  %s5921_s0 = inlined_call_operand.<no memory space> [shape: f32[1], index: 0, kind: input, shape index: {}]   ;;  %s5922_s1 = inlined_call_operand.vmem [shape: f32[8,896], index: 1, kind: input, shape index: {}]   ;;  %s5923_s2 = inlined_call_operand.hbm [shape: s8[3,896,896], index: 2, kind: input, shape index: {}]   ;;  %s5924_s3 = inlined_call_operand.hbm [shape: f32[3,1,896], index: 3, kind: input, shape index: {}]   ;;  %s5925_s4 = inlined_call_operand.hbm [shape: bf16[896,128], index: 4, kind: input, shape index: {}]   ;;  %s5926_s5 = inlined_call_operand.hbm [shape: f32[1,128], index: 5, kind: input, shape index: {}]   ;;  %s5927_s6 = inlined_call_operand.hbm [shape: f32[8,128], index: 6, kind: output, shape index: {0}]   ;;  %s5928_s7 = inlined_call_operand.hbm [shape: f32[8,896], index: 7, kind: output, shape index: {1}]  }
   0x1   :  { %15 = vsyncpa [#allocation7], 0 }
   0x2   :  { %16 = vsyncpa [#allocation10], 0 }
   0x3   :  { %17 = vsyncpa [#allocation5], 0 }
   0x4   :  { %18 = vsyncpa [#allocation13], 0  ;;  %s5452_s24 = smov [#allocation6]   ;;  %s5310_s28 = scalar_lea.hbm %s5924_s3, 336 }
   0x5   :  { %s40_s25 = sshll.u32 %s5452_s24, 4  ;;  %p5311_p0 = scmp.ne.s32.totalorder %s5924_s3, %s5310_s28  ;;  %s41_s25 = int_to_ptr.vmem [resolvable:$true] %s40_s25 }
   0x6   :  { %p5314_p1 = scmp.lt.u32.totalorder %s5310_s28, %s5924_s3 }
   0x8   :  { %p5316_p2 = pnand %p5314_p1, %p5311_p0 }
   0xa   :  { %5319 = shalt.err (!%p5316_p2)
}
   0xb   :  { %s5320_s10 = scalar_lea.vmem %s41_s25, 336  ;;  %s5324_s11 = scalar_lea.vmem %s41_s25, 352 }
   0xc   :  { %p5321_p3 = scmp.ne.s32.totalorder %s41_s25, %s5320_s10  ;;  %p5325_p4 = scmp.lt.s32.totalorder %s41_s25, %s41_s25 }
   0xd   :  { %p5326_p5 = scmp.lt.s32.totalorder %s5324_s11, %s5320_s10 }
   0xf   :  { %p5327_p6 = por %p5326_p5, %p5325_p4 }
  0x11   :  { %p5328_p7 = pnand %p5327_p6, %p5321_p3 }
  0x13   :  { %5331 = shalt.err (!%p5328_p7)
}
  0x14   :  { %s5453_s12 = smov 112   ;;  %s5454_s13 = smov 7  }
  0x15   :  { %46 = dma.hbm_to_vmem [thread:$0]  %s5924_s3, 336, %s41_s25, [#allocation7], %s5453_s12, %s5453_s12, %s5454_s13  }
  0x16   :  { %s5455_s16 = smov [#allocation3]   ;;  %s5332_s20 = scalar_lea.hbm %s5923_s2, 75264 }
  0x17   :  { %s28_s17 = sshll.u32 %s5455_s16, 4  ;;  %p5333_p8 = scmp.ne.s32.totalorder %s5923_s2, %s5332_s20  ;;  %s29_s17 = int_to_ptr.vmem [resolvable:$true] %s28_s17 }
  0x18   :  { %p5336_p9 = scmp.lt.u32.totalorder %s5332_s20, %s5923_s2 }
  0x1a   :  { %p5338_p10 = pnand %p5336_p9, %p5333_p8 }
  0x1c   :  { %5341 = shalt.err (!%p5338_p10)
}
  0x1d   :  { %s5342_s26 = scalar_lea.vmem %s29_s17, 75264  ;;  %p5347_p12 = scmp.lt.s32.totalorder %s29_s17, %s29_s17 }
  0x1e   :  { %p5343_p11 = scmp.ne.s32.totalorder %s29_s17, %s5342_s26  ;;  %p5348_p13 = scmp.lt.s32.totalorder %s5342_s26, %s5342_s26 }
  0x20   :  { %p5349_p0 = por %p5348_p13, %p5347_p12 }
  0x22   :  { %p5350_p1 = pnand %p5349_p0, %p5343_p11 }
  0x24   :  { %5353 = shalt.err (!%p5350_p1)
}
  0x25   :  { %s5456_s3 = smov 896   ;;  %s5457_s25 = smov 56  }
  0x26   :  { %34 = dma.hbm_to_vmem [thread:$0]  %s5923_s2, 75264, %s29_s17, [#allocation4], %s5456_s3, %s5456_s3, %s5457_s25  }
  0x27   :  { %s5458_s29 = smov [#allocation8]   ;;  %s5354_s10 = scalar_lea.hbm %s5925_s4, 7168 }
  0x28   :  { %s52_s30 = sshll.u32 %s5458_s29, 4  ;;  %p5355_p2 = scmp.ne.s32.totalorder %s5925_s4, %s5354_s10  ;;  %s53_s30 = int_to_ptr.vmem [resolvable:$true] %s52_s30 }
  0x29   :  { %p5358_p3 = scmp.lt.u32.totalorder %s5354_s10, %s5925_s4 }
  0x2b   :  { %p5360_p4 = pnand %p5358_p3, %p5355_p2 }
  0x2d   :  { %5363 = shalt.err (!%p5360_p4)
}
  0x2e   :  { %s5364_s15 = scalar_lea.vmem %s53_s30, 7168  ;;  %p5369_p6 = scmp.lt.s32.totalorder %s53_s30, %s53_s30 }
  0x2f   :  { %p5365_p5 = scmp.ne.s32.totalorder %s53_s30, %s5364_s15  ;;  %p5370_p7 = scmp.lt.s32.totalorder %s5364_s15, %s5364_s15 }
  0x31   :  { %p5371_p8 = por %p5370_p7, %p5369_p6 }
  0x33   :  { %p5372_p9 = pnand %p5371_p8, %p5365_p5 }
  0x35   :  { %5375 = shalt.err (!%p5372_p9)
}
  0x36   :  { %s5459_s2 = smov 64   ;;  %s5460_s16 = smov 4  }
  0x37   :  { %58 = dma.hbm_to_vmem [thread:$0]  %s5925_s4, 7168, %s53_s30, [#allocation7], %s5459_s2, %s5459_s2, %s5460_s16  }
  0x38   :  { %s5461_s19 = smov [#allocation9]   ;;  %s5376_s23 = scalar_lea.hbm %s5926_s5, 16 }
  0x39   :  { %s65_s20 = sshll.u32 %s5461_s19, 4  ;;  %p5377_p10 = scmp.ne.s32.totalorder %s5926_s5, %s5376_s23  ;;  %s66_s20 = int_to_ptr.vmem [resolvable:$true] %s65_s20 }
  0x3a   :  { %p5380_p11 = scmp.lt.u32.totalorder %s5376_s23, %s5926_s5 }
  0x3c   :  { %p5382_p12 = pnand %p5380_p11, %p5377_p10 }
  0x3e   :  { %5385 = shalt.err (!%p5382_p12)
}
  0x3f   :  { %s5386_s27 = scalar_lea.vmem %s66_s20, 16  ;;  %s5390_s4 = scalar_lea.vmem %s66_s20, 32 }
  0x40   :  { %p5387_p13 = scmp.ne.s32.totalorder %s66_s20, %s5386_s27  ;;  %p5391_p0 = scmp.lt.s32.totalorder %s66_s20, %s66_s20 }
  0x41   :  { %p5392_p1 = scmp.lt.s32.totalorder %s5390_s4, %s5386_s27 }
  0x43   :  { %p5393_p2 = por %p5392_p1, %p5391_p0 }
  0x45   :  { %p5394_p3 = pnand %p5393_p2, %p5387_p13 }
  0x47   :  { %5397 = shalt.err (!%p5394_p3)
}
  0x48   :  { %68 = dma.hbm_to_vmem [thread:$0]  %s5926_s5, 16, %s66_s20, [#allocation10]  }
  0x49   :  { %5442 = dma.done.wait [#allocation4], 75264  }
  0x4a   :  { %5443 = vsyncadd [#allocation4], 4294892032 }
  0x4b   :  { %5444 = dma.done.wait [#allocation7], 7504  }
  0x4c   :  { %5445 = vsyncadd [#allocation7], 4294959792 }
  0x4d   :  { %5446 = dma.done.wait [#allocation10], 16  }
  0x4e   :  { %5447 = vsyncadd [#allocation10], 4294967280  ;;  %v91_v0 = vld [vmem:[#allocation3 + $0x8] sm:$0xff]  ;;  %v93_v1 = vld [vmem:[#allocation3 + $0x18] sm:$0xff]  ;;  %vm5464_vm0 = vmmov 0  }
  0x4f   :  { %v90_v2 = vld [vmem:[#allocation3] sm:$0xff]  ;;  %v287_v3 = vunpack.c.l.s8.bf16 %v91_v0  ;;  %v294_v4 = vunpack.c.h.s8.bf16 %v91_v0  ;;  %v289_v5 = vunpack.c.l.s8.bf16 %v93_v1  ;;  %v296_v6 = vunpack.c.h.s8.bf16 %v93_v1  ;;  %v92_v7 = vld [vmem:[#allocation3 + $0x10] sm:$0xff]  ;;  %v97_v16 = vld [vmem:[#allocation3 + $0x38] sm:$0xff] }
  0x50   :  { %v286_v8 = vunpack.c.l.s8.bf16 %v90_v2  ;;  %v288_v9 = vunpack.c.l.s8.bf16 %v92_v7  ;;  %v98_v10 = vld [vmem:[#allocation3 + $0x40] sm:$0xff]  ;;  %v100_v11 = vld [vmem:[#allocation3 + $0x50] sm:$0xff]  ;;  %v293_v12 = vunpack.c.h.s8.bf16 %v90_v2  ;;  %v295_v13 = vunpack.c.h.s8.bf16 %v92_v7  ;;  %v99_v17 = vld [vmem:[#allocation3 + $0x48] sm:$0xff] }
  0x51   :  { %685 = vmatprep.subr.bf16.mxu0 %v287_v3  ;;  %849 = vmatprep.subr.bf16.mxu1 %v289_v5  ;;  %v301_v14 = vunpack.c.l.s8.bf16 %v98_v10  ;;  %v303_v15 = vunpack.c.l.s8.bf16 %v100_v11  ;;  %v300_v18 = vunpack.c.l.s8.bf16 %v97_v16  ;;  %v302_v19 = vunpack.c.l.s8.bf16 %v99_v17  ;;  %v105_v22 = vld [vmem:[#allocation3 + $0x78] sm:$0xff]  ;;  %v107_v23 = vld [vmem:[#allocation3 + $0x88] sm:$0xff]  ;;  %v104_v28 = vld [vmem:[#allocation3 + $0x70] sm:$0xff] }
  0x52   :  { %686 = vmatpush1.bf16.msra.mxu0 %v286_v8  ;;  %850 = vmatpush1.bf16.msra.mxu1 %v288_v9  ;;  %v308_v20 = vunpack.c.h.s8.bf16 %v98_v10  ;;  %v310_v21 = vunpack.c.h.s8.bf16 %v100_v11  ;;  %v307_v24 = vunpack.c.h.s8.bf16 %v97_v16  ;;  %v309_v25 = vunpack.c.h.s8.bf16 %v99_v17  ;;  %v106_v29 = vld [vmem:[#allocation3 + $0x80] sm:$0xff]  ;;  %v84_v30 = vld [vmem:[%s5922_s1 + $0x8] sm:$0xff]  ;;  %v112_v36 = vld [vmem:[#allocation3 + $0xb0] sm:$0xff] }
  0x53   :  { %687 = vmatprep.subr.bf16.mxu0 %v294_v4  ;;  %851 = vmatprep.subr.bf16.mxu1 %v296_v6  ;;  %v315_v26 = vunpack.c.l.s8.bf16 %v105_v22  ;;  %v317_v27 = vunpack.c.l.s8.bf16 %v107_v23  ;;  %v314_v31 = vunpack.c.l.s8.bf16 %v104_v28  ;;  %v316_v32 = vunpack.c.l.s8.bf16 %v106_v29  ;;  %v114_v37 = vld [vmem:[#allocation3 + $0xc0] sm:$0xff]  ;;  %v111_v42 = vld [vmem:[#allocation3 + $0xa8] sm:$0xff]  ;;  %v113_v43 = vld [vmem:[#allocation3 + $0xb8] sm:$0xff] }
  0x54   :  { %v322_v33 = vunpack.c.h.s8.bf16 %v105_v22  ;;  %v324_v34 = vunpack.c.h.s8.bf16 %v107_v23  ;;  %v5558_v35 = vpack.c.bf16 %v84_v30, %v84_v30  ;;  %v321_v38 = vunpack.c.h.s8.bf16 %v104_v28  ;;  %v119_v48 = vld [vmem:[#allocation3 + $0xe8] sm:$0xff]  ;;  %v121_v49 = vld [vmem:[#allocation3 + $0xf8] sm:$0xff]  ;;  %v118_v50 = vld [vmem:[#allocation3 + $0xe0] sm:$0xff] }
  0x55   :  { %v323_v39 = vunpack.c.h.s8.bf16 %v106_v29  ;;  %v329_v40 = vunpack.c.l.s8.bf16 %v112_v36  ;;  %v331_v41 = vunpack.c.l.s8.bf16 %v114_v37  ;;  %v328_v44 = vunpack.c.l.s8.bf16 %v111_v42  ;;  %v120_v51 = vld [vmem:[#allocation3 + $0xf0] sm:$0xff]  ;;  %v126_v60 = vld [vmem:[#allocation3 + $0x120] sm:$0xff]  ;;  %v125_v62 = vld [vmem:[#allocation3 + $0x118] sm:$0xff] }
  0x56   :  { %688 = vmatpush1.bf16.msra.mxu0 %v293_v12  ;;  %852 = vmatpush1.bf16.msra.mxu1 %v295_v13  ;;  %v330_v45 = vunpack.c.l.s8.bf16 %v113_v43  ;;  %v336_v46 = vunpack.c.h.s8.bf16 %v112_v36  ;;  %v338_v47 = vunpack.c.h.s8.bf16 %v114_v37  ;;  %v335_v52 = vunpack.c.h.s8.bf16 %v111_v42  ;;  %v128_v61 = vld [vmem:[#allocation3 + $0x130] sm:$0xff]  ;;  %v127_v63 = vld [vmem:[#allocation3 + $0x128] sm:$0xff]  ;;  %v133_v8 = vld [vmem:[#allocation3 + $0x158] sm:$0xff] }
  0x57   :  { %689 = vmatprep.subr.bf16.mxu0 %v301_v14  ;;  %853 = vmatprep.subr.bf16.mxu1 %v303_v15  ;;  %v337_v53 = vunpack.c.h.s8.bf16 %v113_v43  ;;  %v343_v54 = vunpack.c.l.s8.bf16 %v119_v48  ;;  %v345_v55 = vunpack.c.l.s8.bf16 %v121_v49  ;;  %v342_v56 = vunpack.c.l.s8.bf16 %v118_v50  ;;  %v135_v9 = vld [vmem:[#allocation3 + $0x168] sm:$0xff]  ;;  %v132_v10 = vld [vmem:[#allocation3 + $0x150] sm:$0xff]  ;;  %v134_v11 = vld [vmem:[#allocation3 + $0x160] sm:$0xff] }
  0x58   :  { %717 = vmatprep.mubr.bf16.mxu0 %v5558_v35  ;;  %881 = vmatprep.mubr.bf16.mxu1 %v5558_v35  ;;  %v344_v57 = vunpack.c.l.s8.bf16 %v120_v51  ;;  %v350_v58 = vunpack.c.h.s8.bf16 %v119_v48  ;;  %v352_v59 = vunpack.c.h.s8.bf16 %v121_v49  ;;  %v349_v0 = vunpack.c.h.s8.bf16 %v118_v50  ;;  %v139_v22 = vld [vmem:[#allocation3 + $0x188] sm:$0xff]  ;;  %v141_v23 = vld [vmem:[#allocation3 + $0x198] sm:$0xff]  ;;  %v146_v36 = vld [vmem:[#allocation3 + $0x1c0] sm:$0xff] }
  0x59   :  { %v351_v1 = vunpack.c.h.s8.bf16 %v120_v51  ;;  %v357_v2 = vunpack.c.l.s8.bf16 %v126_v60  ;;  %v359_v3 = vunpack.c.l.s8.bf16 %v128_v61  ;;  %v356_v4 = vunpack.c.l.s8.bf16 %v125_v62  ;;  %v148_v37 = vld [vmem:[#allocation3 + $0x1d0] sm:$0xff]  ;;  %v86_v42 = vld [vmem:[%s5922_s1 + $0x18] sm:$0xff]  ;;  %v154_v48 = vld [vmem:[#allocation3 + $0x200] sm:$0xff] }
  0x5a   :  { %690 = vmatpush1.bf16.msra.mxu0 %v300_v18  ;;  %854 = vmatpush1.bf16.msra.mxu1 %v302_v19  ;;  %v358_v5 = vunpack.c.l.s8.bf16 %v127_v63  ;;  %v364_v6 = vunpack.c.h.s8.bf16 %v126_v60  ;;  %v366_v7 = vunpack.c.h.s8.bf16 %v128_v61  ;;  %v363_v12 = vunpack.c.h.s8.bf16 %v125_v62  ;;  %v156_v49 = vld [vmem:[#allocation3 + $0x210] sm:$0xff]  ;;  %v153_v51 = vld [vmem:[#allocation3 + $0x1f8] sm:$0xff]  ;;  %v163_v62 = vld [vmem:[#allocation3 + $0x248] sm:$0xff] }
  0x5b   :  { %691 = vmatprep.subr.bf16.mxu0 %v308_v20  ;;  %855 = vmatprep.subr.bf16.mxu1 %v310_v21  ;;  %v365_v13 = vunpack.c.h.s8.bf16 %v127_v63  ;;  %v371_v14 = vunpack.c.l.s8.bf16 %v133_v8  ;;  %v373_v15 = vunpack.c.l.s8.bf16 %v135_v9  ;;  %v370_v16 = vunpack.c.l.s8.bf16 %v132_v10  ;;  %v140_v20 = vld [vmem:[#allocation3 + $0x190] sm:$0xff]  ;;  %v142_v21 = vld [vmem:[#allocation3 + $0x1a0] sm:$0xff]  ;;  %v161_v61 = vld [vmem:[#allocation3 + $0x238] sm:$0xff] }
  0x5c   :  { %v372_v17 = vunpack.c.l.s8.bf16 %v134_v11  ;;  %v378_v18 = vunpack.c.h.s8.bf16 %v133_v8  ;;  %v380_v19 = vunpack.c.h.s8.bf16 %v135_v9  ;;  %v384_v28 = vunpack.c.l.s8.bf16 %v139_v22  ;;  %v168_v9 = vld [vmem:[#allocation3 + $0x270] sm:$0xff] }
  0x5d   :  { %v386_v29 = vunpack.c.l.s8.bf16 %v141_v23  ;;  %v392_v30 = vunpack.c.h.s8.bf16 %v140_v20  ;;  %v5570_v50 = vpack.c.bf16 %v86_v42, %v86_v42  ;;  %v422_v60 = vunpack.c.h.s8.bf16 %v156_v49 }
  0x5e   :  { %692 = vmatpush1.bf16.msra.mxu0 %v307_v24  ;;  %856 = vmatpush1.bf16.msra.mxu1 %v309_v25  ;;  %v377_v24 = vunpack.c.h.s8.bf16 %v132_v10  ;;  %v379_v25 = vunpack.c.h.s8.bf16 %v134_v11  ;;  %v419_v63 = vunpack.c.h.s8.bf16 %v153_v51  ;;  %v436_v8 = vunpack.c.h.s8.bf16 %v163_v62  ;;  %v170_v10 = vld [vmem:[#allocation3 + $0x280] sm:$0xff] }
  0x5f   :  { %693 = vmatprep.subr.bf16.mxu0 %v315_v26  ;;  %857 = vmatprep.subr.bf16.mxu1 %v317_v27  ;;  %v385_v26 = vunpack.c.l.s8.bf16 %v140_v20  ;;  %v387_v27 = vunpack.c.l.s8.bf16 %v142_v21  ;;  %v450_v20 = vunpack.c.h.s8.bf16 %v170_v10 }
  0x62   :  { %694 = vmatpush1.bf16.msra.mxu0 %v314_v31  ;;  %858 = vmatpush1.bf16.msra.mxu1 %v316_v32  ;;  %v394_v31 = vunpack.c.h.s8.bf16 %v142_v21  ;;  %v147_v32 = vld [vmem:[#allocation3 + $0x1c8] sm:$0xff] }
  0x63   :  { %695 = vmatprep.subr.bf16.mxu0 %v322_v33  ;;  %859 = vmatprep.subr.bf16.mxu1 %v324_v34  ;;  %v149_v33 = vld [vmem:[#allocation3 + $0x1d8] sm:$0xff]  ;;  %v83_v34 = vld [vmem:[%s5922_s1] sm:$0xff]  ;;  %v175_v21 = vld [vmem:[#allocation3 + $0x2a8] sm:$0xff] }
  0x64   :  { %v5568_v43 = vpack.c.bf16 %v83_v34, %v83_v34  ;;  %v184_v34 = vld [vmem:[#allocation3 + $0x2f0] sm:$0xff] }
  0x66   :  { %696 = vmatpush1.bf16.msra.mxu0 %v321_v38  ;;  %860 = vmatpush1.bf16.msra.mxu1 %v323_v39  ;;  %v391_v38 = vunpack.c.h.s8.bf16 %v139_v22  ;;  %v393_v39 = vunpack.c.h.s8.bf16 %v141_v23  ;;  %v177_v22 = vld [vmem:[#allocation3 + $0x2b8] sm:$0xff] }
  0x67   :  { %697 = vmatprep.subr.bf16.mxu0 %v329_v40  ;;  %861 = vmatprep.subr.bf16.mxu1 %v331_v41  ;;  %v399_v40 = vunpack.c.l.s8.bf16 %v147_v32  ;;  %v401_v41 = vunpack.c.l.s8.bf16 %v149_v33 }
  0x6a   :  { %698 = vmatpush1.bf16.msra.mxu0 %v328_v44  ;;  %862 = vmatpush1.bf16.msra.mxu1 %v330_v45  ;;  %v398_v44 = vunpack.c.l.s8.bf16 %v146_v36  ;;  %v400_v45 = vunpack.c.l.s8.bf16 %v148_v37 }
  0x6b   :  { %699 = vmatprep.subr.bf16.mxu0 %v336_v46  ;;  %863 = vmatprep.subr.bf16.mxu1 %v338_v47  ;;  %v406_v46 = vunpack.c.h.s8.bf16 %v147_v32  ;;  %v408_v47 = vunpack.c.h.s8.bf16 %v149_v33  ;;  %v464_v32 = vunpack.c.h.s8.bf16 %v177_v22  ;;  %v182_v33 = vld [vmem:[#allocation3 + $0x2e0] sm:$0xff] }
  0x6e   :  { %700 = vmatpush1.bf16.msra.mxu0 %v335_v52  ;;  %864 = vmatpush1.bf16.msra.mxu1 %v337_v53  ;;  %v155_v52 = vld [vmem:[#allocation3 + $0x208] sm:$0xff]  ;;  %v405_v53 = vunpack.c.h.s8.bf16 %v146_v36 }
  0x6f   :  { %701 = vmatprep.subr.bf16.mxu0 %v343_v54  ;;  %865 = vmatprep.subr.bf16.mxu1 %v345_v55  ;;  %v407_v54 = vunpack.c.h.s8.bf16 %v148_v37  ;;  %v413_v55 = vunpack.c.l.s8.bf16 %v154_v48 }
  0x72   :  { %702 = vmatpush1.bf16.msra.mxu0 %v342_v56  ;;  %866 = vmatpush1.bf16.msra.mxu1 %v344_v57  ;;  %v415_v56 = vunpack.c.l.s8.bf16 %v156_v49  ;;  %v412_v57 = vunpack.c.l.s8.bf16 %v153_v51 }
  0x73   :  { %703 = vmatprep.subr.bf16.mxu0 %v350_v58  ;;  %867 = vmatprep.subr.bf16.mxu1 %v352_v59  ;;  %v414_v58 = vunpack.c.l.s8.bf16 %v155_v52  ;;  %v420_v59 = vunpack.c.h.s8.bf16 %v154_v48  ;;  %v191_v48 = vld [vmem:[#allocation3 + $0x328] sm:$0xff] }
  0x76   :  { %704 = vmatpush1.bf16.msra.mxu0 %v349_v0  ;;  %868 = vmatpush1.bf16.msra.mxu1 %v351_v1  ;;  %v421_v0 = vunpack.c.h.s8.bf16 %v155_v52  ;;  %v427_v1 = vunpack.c.l.s8.bf16 %v161_v61 }
  0x77   :  { %705 = vmatprep.subr.bf16.mxu0 %v357_v2  ;;  %869 = vmatprep.subr.bf16.mxu1 %v359_v3  ;;  %v429_v2 = vunpack.c.l.s8.bf16 %v163_v62  ;;  %v160_v3 = vld [vmem:[#allocation3 + $0x230] sm:$0xff] }
  0x78   :  { %v433_v11 = vunpack.c.h.s8.bf16 %v160_v3 }
  0x7a   :  { %706 = vmatpush1.bf16.msra.mxu0 %v356_v4  ;;  %870 = vmatpush1.bf16.msra.mxu1 %v358_v5  ;;  %v162_v4 = vld [vmem:[#allocation3 + $0x240] sm:$0xff]  ;;  %v426_v5 = vunpack.c.l.s8.bf16 %v160_v3  ;;  %v197_v3 = vld [vmem:[#allocation3 + $0x358] sm:$0xff] }
  0x7b   :  { %707 = vmatprep.subr.bf16.mxu0 %v364_v6  ;;  %871 = vmatprep.subr.bf16.mxu1 %v366_v7  ;;  %v428_v6 = vunpack.c.l.s8.bf16 %v162_v4  ;;  %v434_v7 = vunpack.c.h.s8.bf16 %v161_v61  ;;  %v198_v61 = vld [vmem:[#allocation3 + $0x360] sm:$0xff] }
  0x7e   :  { %708 = vmatpush1.bf16.msra.mxu0 %v363_v12  ;;  %872 = vmatpush1.bf16.msra.mxu1 %v365_v13  ;;  %v435_v12 = vunpack.c.h.s8.bf16 %v162_v4  ;;  %v441_v13 = vunpack.c.l.s8.bf16 %v168_v9 }
  0x7f   :  { %709 = vmatprep.subr.bf16.mxu0 %v371_v14  ;;  %873 = vmatprep.subr.bf16.mxu1 %v373_v15  ;;  %v443_v14 = vunpack.c.l.s8.bf16 %v170_v10  ;;  %v167_v15 = vld [vmem:[#allocation3 + $0x268] sm:$0xff] }
  0x80   :  { %v447_v23 = vunpack.c.h.s8.bf16 %v167_v15 }
  0x82   :  { %710 = vmatpush1.bf16.msra.mxu0 %v370_v16  ;;  %874 = vmatpush1.bf16.msra.mxu1 %v372_v17  ;;  %v169_v16 = vld [vmem:[#allocation3 + $0x278] sm:$0xff]  ;;  %v440_v17 = vunpack.c.l.s8.bf16 %v167_v15  ;;  %v202_v15 = vld [vmem:[#allocation3 + $0x380] sm:$0xff] }
  0x83   :  { %711 = vmatprep.subr.bf16.mxu0 %v378_v18  ;;  %875 = vmatprep.subr.bf16.mxu1 %v380_v19  ;;  %v442_v18 = vunpack.c.l.s8.bf16 %v169_v16  ;;  %v448_v19 = vunpack.c.h.s8.bf16 %v168_v9  ;;  %v205_v9 = vld [vmem:[#allocation3 + $0x398] sm:$0xff] }
  0x86   :  { %712 = vmatpush1.bf16.msra.mxu0 %v377_v24  ;;  %876 = vmatpush1.bf16.msra.mxu1 %v379_v25  ;;  %v449_v24 = vunpack.c.h.s8.bf16 %v169_v16  ;;  %v455_v25 = vunpack.c.l.s8.bf16 %v175_v21  ;;  %v204_v16 = vld [vmem:[#allocation3 + $0x390] sm:$0xff] }
  0x87   :  { %713 = vmatprep.subr.bf16.mxu0 %v385_v26  ;;  %877 = vmatprep.subr.bf16.mxu1 %v387_v27  ;;  %v457_v26 = vunpack.c.l.s8.bf16 %v177_v22  ;;  %v174_v27 = vld [vmem:[#allocation3 + $0x2a0] sm:$0xff]  ;;  %v520_v22 = vunpack.c.h.s8.bf16 %v205_v9 }
  0x88   :  { %v461_v36 = vunpack.c.h.s8.bf16 %v174_v27 }
  0x8a   :  { %714 = vmatpush1.bf16.msra.mxu0 %v384_v28  ;;  %878 = vmatpush1.bf16.msra.mxu1 %v386_v29  ;;  %v176_v28 = vld [vmem:[#allocation3 + $0x2b0] sm:$0xff]  ;;  %v454_v29 = vunpack.c.l.s8.bf16 %v174_v27  ;;  %v519_v27 = vunpack.c.h.s8.bf16 %v204_v16 }
  0x8b   :  { %715 = vmatprep.subr.bf16.mxu0 %v392_v30  ;;  %879 = vmatprep.subr.bf16.mxu1 %v394_v31  ;;  %v456_v30 = vunpack.c.l.s8.bf16 %v176_v28  ;;  %v462_v31 = vunpack.c.h.s8.bf16 %v175_v21  ;;  %v463_v37 = vunpack.c.h.s8.bf16 %v176_v28 }
  0x8e   :  { %716 = vmatpush1.bf16.msra.mxu0 %v391_v38  ;;  %880 = vmatpush1.bf16.msra.mxu1 %v393_v39  ;;  %v469_v38 = vunpack.c.l.s8.bf16 %v182_v33  ;;  %v471_v39 = vunpack.c.l.s8.bf16 %v184_v34 }
  0x8f   :  { %726 = vmatprep.subr.bf16.mxu0 %v399_v40  ;;  %890 = vmatprep.subr.bf16.mxu1 %v401_v41  ;;  %v181_v40 = vld [vmem:[#allocation3 + $0x2d8] sm:$0xff]  ;;  %v183_v41 = vld [vmem:[#allocation3 + $0x2e8] sm:$0xff] }
  0x90   :  { %v468_v42 = vunpack.c.l.s8.bf16 %v181_v40  ;;  %v475_v49 = vunpack.c.h.s8.bf16 %v181_v40  ;;  %v477_v51 = vunpack.c.h.s8.bf16 %v183_v41 }
  0x91   :  { %718 = vmatmul.mubr.bf16.vlgmr.msra.gmra.mrb[0].mxu0 %v5568_v43  ;;  %882 = vmatmul.mubr.bf16.vlgmr.msra.gmra.mrb[0].mxu1 %v5568_v43 }
  0x92   :  { %727 = vmatpush1.bf16.msra.mxu0 %v398_v44  ;;  %891 = vmatpush1.bf16.msra.mxu1 %v400_v45  ;;  %v470_v44 = vunpack.c.l.s8.bf16 %v183_v41  ;;  %v476_v45 = vunpack.c.h.s8.bf16 %v182_v33 }
  0x93   :  { %728 = vmatprep.subr.bf16.mxu0 %v406_v46  ;;  %892 = vmatprep.subr.bf16.mxu1 %v408_v47  ;;  %v478_v46 = vunpack.c.h.s8.bf16 %v184_v34  ;;  %v189_v47 = vld [vmem:[#allocation3 + $0x318] sm:$0xff] }
  0x94   :  { %758 = vmatprep.mubr.bf16.mxu0 %v5570_v50  ;;  %922 = vmatprep.mubr.bf16.mxu1 %v5570_v50  ;;  %v483_v52 = vunpack.c.l.s8.bf16 %v189_v47 }
  0x96   :  { %729 = vmatpush1.bf16.msra.mxu0 %v405_v53  ;;  %893 = vmatpush1.bf16.msra.mxu1 %v407_v54  ;;  %v485_v53 = vunpack.c.l.s8.bf16 %v191_v48  ;;  %v188_v54 = vld [vmem:[#allocation3 + $0x310] sm:$0xff] }
  0x97   :  { %730 = vmatprep.subr.bf16.mxu0 %v413_v55  ;;  %894 = vmatprep.subr.bf16.mxu1 %v415_v56  ;;  %v190_v55 = vld [vmem:[#allocation3 + $0x320] sm:$0xff]  ;;  %v482_v56 = vunpack.c.l.s8.bf16 %v188_v54  ;;  %v489_v62 = vunpack.c.h.s8.bf16 %v188_v54 }
  0x9a   :  { %731 = vmatpush1.bf16.msra.mxu0 %v412_v57  ;;  %895 = vmatpush1.bf16.msra.mxu1 %v414_v58  ;;  %v484_v57 = vunpack.c.l.s8.bf16 %v190_v55  ;;  %v490_v58 = vunpack.c.h.s8.bf16 %v189_v47 }
  0x9b   :  { %732 = vmatprep.subr.bf16.mxu0 %v420_v59  ;;  %896 = vmatprep.subr.bf16.mxu1 %v422_v60  ;;  %v492_v59 = vunpack.c.h.s8.bf16 %v191_v48  ;;  %v196_v60 = vld [vmem:[#allocation3 + $0x350] sm:$0xff] }
  0x9e   :  { %733 = vmatpush1.bf16.msra.mxu0 %v419_v63  ;;  %897 = vmatpush1.bf16.msra.mxu1 %v421_v0  ;;  %v491_v63 = vunpack.c.h.s8.bf16 %v190_v55  ;;  %v497_v0 = vunpack.c.l.s8.bf16 %v196_v60 }
  0x9f   :  { %734 = vmatprep.subr.bf16.mxu0 %v427_v1  ;;  %898 = vmatprep.subr.bf16.mxu1 %v429_v2  ;;  %v499_v1 = vunpack.c.l.s8.bf16 %v198_v61  ;;  %v195_v2 = vld [vmem:[#allocation3 + $0x348] sm:$0xff] }
  0xa0   :  { %v496_v4 = vunpack.c.l.s8.bf16 %v195_v2  ;;  %v503_v10 = vunpack.c.h.s8.bf16 %v195_v2 }
  0xa2   :  { %735 = vmatpush1.bf16.msra.mxu0 %v426_v5  ;;  %899 = vmatpush1.bf16.msra.mxu1 %v428_v6  ;;  %v498_v5 = vunpack.c.l.s8.bf16 %v197_v3  ;;  %v504_v6 = vunpack.c.h.s8.bf16 %v196_v60 }
  0xa3   :  { %736 = vmatprep.subr.bf16.mxu0 %v434_v7  ;;  %900 = vmatprep.subr.bf16.mxu1 %v436_v8  ;;  %v506_v7 = vunpack.c.h.s8.bf16 %v198_v61  ;;  %v203_v8 = vld [vmem:[#allocation3 + $0x388] sm:$0xff] }
  0xa4   :  { %v518_v21 = vunpack.c.h.s8.bf16 %v203_v8 }
  0xa6   :  { %737 = vmatpush1.bf16.msra.mxu0 %v433_v11  ;;  %901 = vmatpush1.bf16.msra.mxu1 %v435_v12  ;;  %v505_v11 = vunpack.c.h.s8.bf16 %v197_v3  ;;  %v85_v12 = vld [vmem:[%s5922_s1 + $0x10] sm:$0xff] }
  0xa7   :  { %738 = vmatprep.subr.bf16.mxu0 %v441_v13  ;;  %902 = vmatprep.subr.bf16.mxu1 %v443_v14  ;;  %v511_v13 = vunpack.c.l.s8.bf16 %v203_v8  ;;  %v513_v14 = vunpack.c.l.s8.bf16 %v205_v9 }
  0xaa   :  { %739 = vmatpush1.bf16.msra.mxu0 %v440_v17  ;;  %903 = vmatpush1.bf16.msra.mxu1 %v442_v18  ;;  %v5579_v17 = vpack.c.bf16 %v85_v12, %v85_v12  ;;  %v88_v18 = vld [vmem:[%s5922_s1 + $0x28] sm:$0xff]  ;;  %v240_v12 = vld [vmem:[#allocation3 + $0x4b0] sm:$0xff] }
  0xab   :  { %740 = vmatprep.subr.bf16.mxu0 %v448_v19  ;;  %904 = vmatprep.subr.bf16.mxu1 %v450_v20  ;;  %v510_v19 = vunpack.c.l.s8.bf16 %v202_v15  ;;  %v512_v20 = vunpack.c.l.s8.bf16 %v204_v16  ;;  %v583_v16 = vunpack.c.l.s8.bf16 %v240_v12 }
  0xae   :  { %741 = vmatpush1.bf16.msra.mxu0 %v447_v23  ;;  %905 = vmatpush1.bf16.msra.mxu1 %v449_v24  ;;  %v210_v23 = vld [vmem:[#allocation3 + $0x3c0] sm:$0xff]  ;;  %v212_v24 = vld [vmem:[#allocation3 + $0x3d0] sm:$0xff] }
  0xaf   :  { %742 = vmatprep.subr.bf16.mxu0 %v455_v25  ;;  %906 = vmatprep.subr.bf16.mxu1 %v457_v26  ;;  %v5584_v25 = vpack.c.bf16 %v88_v18, %v88_v18  ;;  %v517_v26 = vunpack.c.h.s8.bf16 %v202_v15  ;;  %v525_v28 = vunpack.c.l.s8.bf16 %v210_v23  ;;  %v532_v34 = vunpack.c.h.s8.bf16 %v210_v23  ;;  %v237_v18 = vld [vmem:[#allocation3 + $0x498] sm:$0xff] }
  0xb0   :  { %v590_v23 = vunpack.c.h.s8.bf16 %v240_v12 }
  0xb2   :  { %743 = vmatpush1.bf16.msra.mxu0 %v454_v29  ;;  %907 = vmatpush1.bf16.msra.mxu1 %v456_v30  ;;  %v527_v29 = vunpack.c.l.s8.bf16 %v212_v24  ;;  %v209_v30 = vld [vmem:[#allocation3 + $0x3b8] sm:$0xff] }
  0xb3   :  { %744 = vmatprep.subr.bf16.mxu0 %v462_v31  ;;  %908 = vmatprep.subr.bf16.mxu1 %v464_v32  ;;  %v211_v31 = vld [vmem:[#allocation3 + $0x3c8] sm:$0xff]  ;;  %v524_v32 = vunpack.c.l.s8.bf16 %v209_v30 }
  0xb4   :  { %v526_v33 = vunpack.c.l.s8.bf16 %v211_v31  ;;  %v533_v40 = vunpack.c.h.s8.bf16 %v211_v31  ;;  %v244_v31 = vld [vmem:[#allocation3 + $0x4d0] sm:$0xff] }
  0xb6   :  { %745 = vmatpush1.bf16.msra.mxu0 %v461_v36  ;;  %909 = vmatpush1.bf16.msra.mxu1 %v463_v37  ;;  %v534_v36 = vunpack.c.h.s8.bf16 %v212_v24  ;;  %v217_v37 = vld [vmem:[#allocation3 + $0x3f8] sm:$0xff] }
  0xb7   :  { %746 = vmatprep.subr.bf16.mxu0 %v469_v38  ;;  %910 = vmatprep.subr.bf16.mxu1 %v471_v39  ;;  %v219_v38 = vld [vmem:[#allocation3 + $0x408] sm:$0xff]  ;;  %v531_v39 = vunpack.c.h.s8.bf16 %v209_v30  ;;  %v539_v41 = vunpack.c.l.s8.bf16 %v217_v37  ;;  %v546_v48 = vunpack.c.h.s8.bf16 %v217_v37  ;;  %v245_v24 = vld [vmem:[#allocation3 + $0x4d8] sm:$0xff] }
  0xba   :  { %747 = vmatpush1.bf16.msra.mxu0 %v468_v42  ;;  %911 = vmatpush1.bf16.msra.mxu1 %v470_v44  ;;  %v541_v42 = vunpack.c.l.s8.bf16 %v219_v38  ;;  %v216_v44 = vld [vmem:[#allocation3 + $0x3f0] sm:$0xff] }
  0xbb   :  { %748 = vmatprep.subr.bf16.mxu0 %v476_v45  ;;  %912 = vmatprep.subr.bf16.mxu1 %v478_v46  ;;  %v218_v45 = vld [vmem:[#allocation3 + $0x400] sm:$0xff]  ;;  %v538_v46 = vunpack.c.l.s8.bf16 %v216_v44 }
  0xbc   :  { %v540_v47 = vunpack.c.l.s8.bf16 %v218_v45  ;;  %v547_v54 = vunpack.c.h.s8.bf16 %v218_v45  ;;  %v251_v45 = vld [vmem:[#allocation3 + $0x508] sm:$0xff] }
  0xbe   :  { %749 = vmatpush1.bf16.msra.mxu0 %v475_v49  ;;  %913 = vmatpush1.bf16.msra.mxu1 %v477_v51  ;;  %v548_v49 = vunpack.c.h.s8.bf16 %v219_v38  ;;  %v224_v51 = vld [vmem:[#allocation3 + $0x430] sm:$0xff] }
  0xbf   :  { %750 = vmatprep.subr.bf16.mxu0 %v483_v52  ;;  %914 = vmatprep.subr.bf16.mxu1 %v485_v53  ;;  %v226_v52 = vld [vmem:[#allocation3 + $0x440] sm:$0xff]  ;;  %v545_v53 = vunpack.c.h.s8.bf16 %v216_v44  ;;  %v553_v55 = vunpack.c.l.s8.bf16 %v224_v51  ;;  %v560_v61 = vunpack.c.h.s8.bf16 %v224_v51  ;;  %v252_v38 = vld [vmem:[#allocation3 + $0x510] sm:$0xff] }
  0xc2   :  { %751 = vmatpush1.bf16.msra.mxu0 %v482_v56  ;;  %915 = vmatpush1.bf16.msra.mxu1 %v484_v57  ;;  %v555_v56 = vunpack.c.l.s8.bf16 %v226_v52  ;;  %v223_v57 = vld [vmem:[#allocation3 + $0x428] sm:$0xff] }
  0xc3   :  { %752 = vmatprep.subr.bf16.mxu0 %v490_v58  ;;  %916 = vmatprep.subr.bf16.mxu1 %v492_v59  ;;  %v225_v58 = vld [vmem:[#allocation3 + $0x438] sm:$0xff]  ;;  %v552_v59 = vunpack.c.l.s8.bf16 %v223_v57 }
  0xc4   :  { %v554_v60 = vunpack.c.l.s8.bf16 %v225_v58  ;;  %v561_v2 = vunpack.c.h.s8.bf16 %v225_v58 }
  0xc6   :  { %753 = vmatpush1.bf16.msra.mxu0 %v489_v62  ;;  %917 = vmatpush1.bf16.msra.mxu1 %v491_v63  ;;  %v562_v62 = vunpack.c.h.s8.bf16 %v226_v52  ;;  %v231_v63 = vld [vmem:[#allocation3 + $0x468] sm:$0xff] }
  0xc7   :  { %754 = vmatprep.subr.bf16.mxu0 %v497_v0  ;;  %918 = vmatprep.subr.bf16.mxu1 %v499_v1  ;;  %v233_v0 = vld [vmem:[#allocation3 + $0x478] sm:$0xff]  ;;  %v559_v1 = vunpack.c.h.s8.bf16 %v223_v57  ;;  %v567_v3 = vunpack.c.l.s8.bf16 %v231_v63  ;;  %v574_v9 = vunpack.c.h.s8.bf16 %v231_v63  ;;  %v259_v52 = vld [vmem:[#allocation3 + $0x548] sm:$0xff] }
  0xc8   :  { %v623_v57 = vunpack.c.l.s8.bf16 %v259_v52 }
  0xca   :  { %755 = vmatpush1.bf16.msra.mxu0 %v496_v4  ;;  %919 = vmatpush1.bf16.msra.mxu1 %v498_v5  ;;  %v569_v4 = vunpack.c.l.s8.bf16 %v233_v0  ;;  %v230_v5 = vld [vmem:[#allocation3 + $0x460] sm:$0xff] }
  0xcb   :  { %756 = vmatprep.subr.bf16.mxu0 %v504_v6  ;;  %920 = vmatprep.subr.bf16.mxu1 %v506_v7  ;;  %v232_v6 = vld [vmem:[#allocation3 + $0x470] sm:$0xff]  ;;  %v566_v7 = vunpack.c.l.s8.bf16 %v230_v5 }
  0xcc   :  { %v568_v8 = vunpack.c.l.s8.bf16 %v232_v6 }
  0xce   :  { %757 = vmatpush1.bf16.msra.mxu0 %v503_v10  ;;  %921 = vmatpush1.bf16.msra.mxu1 %v505_v11  ;;  %v576_v10 = vunpack.c.h.s8.bf16 %v233_v0  ;;  %v238_v11 = vld [vmem:[#allocation3 + $0x4a0] sm:$0xff]  ;;  %v630_v0 = vunpack.c.h.s8.bf16 %v259_v52  ;;  %v96_v52 = vld [vmem:[#allocation3 + $0x30] sm:$0xff] }
  0xcf   :  { %767 = vmatprep.subr.bf16.mxu0 %v511_v13  ;;  %931 = vmatprep.subr.bf16.mxu1 %v513_v14  ;;  %v573_v13 = vunpack.c.h.s8.bf16 %v230_v5  ;;  %v575_v14 = vunpack.c.h.s8.bf16 %v232_v6  ;;  %v581_v15 = vunpack.c.l.s8.bf16 %v238_v11 }
  0xd1   :  { %759 = vmatmul.mubr.bf16.vlgmr.msra.gmra.mrb[0].mxu0 %v5579_v17  ;;  %923 = vmatmul.mubr.bf16.vlgmr.msra.gmra.mrb[0].mxu1 %v5579_v17 }
  0xd2   :  { %768 = vmatpush1.bf16.msra.mxu0 %v510_v19  ;;  %932 = vmatpush1.bf16.msra.mxu1 %v512_v20  ;;  %v239_v19 = vld [vmem:[#allocation3 + $0x4a8] sm:$0xff]  ;;  %v580_v20 = vunpack.c.l.s8.bf16 %v237_v18 }
  0xd3   :  { %769 = vmatprep.subr.bf16.mxu0 %v518_v21  ;;  %933 = vmatprep.subr.bf16.mxu1 %v520_v22  ;;  %v582_v21 = vunpack.c.l.s8.bf16 %v239_v19  ;;  %v588_v22 = vunpack.c.h.s8.bf16 %v238_v11 }
  0xd4   :  { %799 = vmatprep.mubr.bf16.mxu0 %v5584_v25  ;;  %963 = vmatprep.mubr.bf16.mxu1 %v5584_v25 }
  0xd6   :  { %770 = vmatpush1.bf16.msra.mxu0 %v517_v26  ;;  %934 = vmatpush1.bf16.msra.mxu1 %v519_v27  ;;  %v247_v26 = vld [vmem:[#allocation3 + $0x4e8] sm:$0xff]  ;;  %v587_v27 = vunpack.c.h.s8.bf16 %v237_v18 }
  0xd7   :  { %771 = vmatprep.subr.bf16.mxu0 %v525_v28  ;;  %935 = vmatprep.subr.bf16.mxu1 %v527_v29  ;;  %v589_v28 = vunpack.c.h.s8.bf16 %v239_v19  ;;  %v595_v29 = vunpack.c.l.s8.bf16 %v245_v24  ;;  %v597_v30 = vunpack.c.l.s8.bf16 %v247_v26  ;;  %v604_v37 = vunpack.c.h.s8.bf16 %v247_v26 }
  0xda   :  { %772 = vmatpush1.bf16.msra.mxu0 %v524_v32  ;;  %936 = vmatpush1.bf16.msra.mxu1 %v526_v33  ;;  %v246_v32 = vld [vmem:[#allocation3 + $0x4e0] sm:$0xff]  ;;  %v594_v33 = vunpack.c.l.s8.bf16 %v244_v31 }
  0xdb   :  { %773 = vmatprep.subr.bf16.mxu0 %v532_v34  ;;  %937 = vmatprep.subr.bf16.mxu1 %v534_v36  ;;  %v596_v34 = vunpack.c.l.s8.bf16 %v246_v32  ;;  %v602_v36 = vunpack.c.h.s8.bf16 %v245_v24 }
  0xde   :  { %774 = vmatpush1.bf16.msra.mxu0 %v531_v39  ;;  %938 = vmatpush1.bf16.msra.mxu1 %v533_v40  ;;  %v254_v39 = vld [vmem:[#allocation3 + $0x520] sm:$0xff]  ;;  %v601_v40 = vunpack.c.h.s8.bf16 %v244_v31 }
  0xdf   :  { %775 = vmatprep.subr.bf16.mxu0 %v539_v41  ;;  %939 = vmatprep.subr.bf16.mxu1 %v541_v42  ;;  %v603_v41 = vunpack.c.h.s8.bf16 %v246_v32  ;;  %v609_v42 = vunpack.c.l.s8.bf16 %v252_v38  ;;  %v611_v44 = vunpack.c.l.s8.bf16 %v254_v39  ;;  %v618_v51 = vunpack.c.h.s8.bf16 %v254_v39 }
  0xe2   :  { %776 = vmatpush1.bf16.msra.mxu0 %v538_v46  ;;  %940 = vmatpush1.bf16.msra.mxu1 %v540_v47  ;;  %v253_v46 = vld [vmem:[#allocation3 + $0x518] sm:$0xff]  ;;  %v608_v47 = vunpack.c.l.s8.bf16 %v251_v45 }
  0xe3   :  { %777 = vmatprep.subr.bf16.mxu0 %v546_v48  ;;  %941 = vmatprep.subr.bf16.mxu1 %v548_v49  ;;  %v610_v48 = vunpack.c.l.s8.bf16 %v253_v46  ;;  %v616_v49 = vunpack.c.h.s8.bf16 %v252_v38 }
  0xe6   :  { %778 = vmatpush1.bf16.msra.mxu0 %v545_v53  ;;  %942 = vmatpush1.bf16.msra.mxu1 %v547_v54  ;;  %v261_v53 = vld [vmem:[#allocation3 + $0x558] sm:$0xff]  ;;  %v615_v54 = vunpack.c.h.s8.bf16 %v251_v45 }
  0xe7   :  { %779 = vmatprep.subr.bf16.mxu0 %v553_v55  ;;  %943 = vmatprep.subr.bf16.mxu1 %v555_v56  ;;  %v617_v55 = vunpack.c.h.s8.bf16 %v253_v46  ;;  %v87_v56 = vld [vmem:[%s5922_s1 + $0x20] sm:$0xff]  ;;  %v625_v58 = vunpack.c.l.s8.bf16 %v261_v53 }
  0xea   :  { %780 = vmatpush1.bf16.msra.mxu0 %v552_v59  ;;  %944 = vmatpush1.bf16.msra.mxu1 %v554_v60  ;;  %v258_v59 = vld [vmem:[#allocation3 + $0x540] sm:$0xff]  ;;  %v260_v60 = vld [vmem:[#allocation3 + $0x550] sm:$0xff] }
  0xeb   :  { %781 = vmatprep.subr.bf16.mxu0 %v560_v61  ;;  %945 = vmatprep.subr.bf16.mxu1 %v562_v62  ;;  %v5593_v61 = vpack.c.bf16 %v87_v56, %v87_v56  ;;  %v622_v62 = vunpack.c.l.s8.bf16 %v258_v59  ;;  %v624_v63 = vunpack.c.l.s8.bf16 %v260_v60  ;;  %v631_v5 = vunpack.c.h.s8.bf16 %v260_v60 }
  0xee   :  { %782 = vmatpush1.bf16.msra.mxu0 %v559_v1  ;;  %946 = vmatpush1.bf16.msra.mxu1 %v561_v2  ;;  %v632_v1 = vunpack.c.h.s8.bf16 %v261_v53  ;;  %v266_v2 = vld [vmem:[#allocation3 + $0x580] sm:$0xff] }
  0xef   :  { %783 = vmatprep.subr.bf16.mxu0 %v567_v3  ;;  %947 = vmatprep.subr.bf16.mxu1 %v569_v4  ;;  %v268_v3 = vld [vmem:[#allocation3 + $0x590] sm:$0xff]  ;;  %v629_v4 = vunpack.c.h.s8.bf16 %v258_v59  ;;  %v637_v6 = vunpack.c.l.s8.bf16 %v266_v2  ;;  %v131_v59 = vld [vmem:[#allocation3 + $0x148] sm:$0xff] }
  0xf2   :  { %784 = vmatpush1.bf16.msra.mxu0 %v566_v7  ;;  %948 = vmatpush1.bf16.msra.mxu1 %v568_v8  ;;  %v639_v7 = vunpack.c.l.s8.bf16 %v268_v3  ;;  %v265_v8 = vld [vmem:[#allocation3 + $0x578] sm:$0xff] }
  0xf3   :  { %785 = vmatprep.subr.bf16.mxu0 %v574_v9  ;;  %949 = vmatprep.subr.bf16.mxu1 %v576_v10  ;;  %v267_v9 = vld [vmem:[#allocation3 + $0x588] sm:$0xff]  ;;  %v5462_v10 = vmov 0   ;;  %v636_v11 = vunpack.c.l.s8.bf16 %v265_v8  ;;  %v643_v18 = vunpack.c.h.s8.bf16 %v265_v8  ;;  %v138_v8 = vld [vmem:[#allocation3 + $0x180] sm:$0xff] }
  0xf4   :  { %v638_v12 = vunpack.c.l.s8.bf16 %v267_v9  ;;  %v645_v19 = vunpack.c.h.s8.bf16 %v267_v9 }
  0xf6   :  { %786 = vmatpush1.bf16.msra.mxu0 %v573_v13  ;;  %950 = vmatpush1.bf16.msra.mxu1 %v575_v14  ;;  %v644_v13 = vunpack.c.h.s8.bf16 %v266_v2  ;;  %v646_v14 = vunpack.c.h.s8.bf16 %v268_v3  ;;  %v103_v2 = vld [vmem:[#allocation3 + $0x68] sm:$0xff] }
  0xf7   :  { %787 = vmatprep.subr.bf16.mxu0 %v581_v15  ;;  %951 = vmatprep.subr.bf16.mxu1 %v583_v16  ;;  %v273_v15 = vld [vmem:[#allocation3 + $0x5b8] sm:$0xff]  ;;  %v275_v16 = vld [vmem:[#allocation3 + $0x5c8] sm:$0xff] }
  0xfa   :  { %788 = vmatpush1.bf16.msra.mxu0 %v580_v20  ;;  %952 = vmatpush1.bf16.msra.mxu1 %v582_v21  ;;  %v651_v20 = vunpack.c.l.s8.bf16 %v273_v15  ;;  %v653_v21 = vunpack.c.l.s8.bf16 %v275_v16 }
  0xfb   :  { %789 = vmatprep.subr.bf16.mxu0 %v588_v22  ;;  %953 = vmatprep.subr.bf16.mxu1 %v590_v23  ;;  %v272_v22 = vld [vmem:[#allocation3 + $0x5b0] sm:$0xff]  ;;  %v274_v23 = vld [vmem:[#allocation3 + $0x5c0] sm:$0xff] }
  0xfc   :  { %v650_v24 = vunpack.c.l.s8.bf16 %v272_v22  ;;  %v652_v26 = vunpack.c.l.s8.bf16 %v274_v23  ;;  %v657_v31 = vunpack.c.h.s8.bf16 %v272_v22  ;;  %v659_v32 = vunpack.c.h.s8.bf16 %v274_v23 }
  0xfe   :  { %790 = vmatpush1.bf16.msra.mxu0 %v587_v27  ;;  %954 = vmatpush1.bf16.msra.mxu1 %v589_v28  ;;  %v658_v27 = vunpack.c.h.s8.bf16 %v273_v15  ;;  %v660_v28 = vunpack.c.h.s8.bf16 %v275_v16 }
  0xff   :  { %791 = vmatprep.subr.bf16.mxu0 %v595_v29  ;;  %955 = vmatprep.subr.bf16.mxu1 %v597_v30  ;;  %v280_v29 = vld [vmem:[#allocation3 + $0x5f0] sm:$0xff]  ;;  %v282_v30 = vld [vmem:[#allocation3 + $0x600] sm:$0xff] }
 0x102   :  { %792 = vmatpush1.bf16.msra.mxu0 %v594_v33  ;;  %956 = vmatpush1.bf16.msra.mxu1 %v596_v34  ;;  %v665_v33 = vunpack.c.l.s8.bf16 %v280_v29  ;;  %v667_v34 = vunpack.c.l.s8.bf16 %v282_v30 }
 0x103   :  { %793 = vmatprep.subr.bf16.mxu0 %v602_v36  ;;  %957 = vmatprep.subr.bf16.mxu1 %v604_v37  ;;  %v279_v36 = vld [vmem:[#allocation3 + $0x5e8] sm:$0xff]  ;;  %v281_v37 = vld [vmem:[#allocation3 + $0x5f8] sm:$0xff] }
 0x104   :  { %v664_v38 = vunpack.c.l.s8.bf16 %v279_v36  ;;  %v666_v39 = vunpack.c.l.s8.bf16 %v281_v37  ;;  %v671_v45 = vunpack.c.h.s8.bf16 %v279_v36  ;;  %v673_v46 = vunpack.c.h.s8.bf16 %v281_v37 }
 0x106   :  { %794 = vmatpush1.bf16.msra.mxu0 %v601_v40  ;;  %958 = vmatpush1.bf16.msra.mxu1 %v603_v41  ;;  %v672_v40 = vunpack.c.h.s8.bf16 %v280_v29  ;;  %v674_v41 = vunpack.c.h.s8.bf16 %v282_v30 }
 0x107   :  { %795 = vmatprep.subr.bf16.mxu0 %v609_v42  ;;  %959 = vmatprep.subr.bf16.mxu1 %v611_v44  ;;  %v95_v42 = vld [vmem:[#allocation3 + $0x28] sm:$0xff]  ;;  %v124_v44 = vld [vmem:[#allocation3 + $0x110] sm:$0xff] }
 0x108   :  { %v298_v56 = vunpack.c.h.s8.bf16 %v95_v42 }
 0x10a   :  { %796 = vmatpush1.bf16.msra.mxu0 %v608_v47  ;;  %960 = vmatpush1.bf16.msra.mxu1 %v610_v48  ;;  %v89_v47 = vld [vmem:[%s5922_s1 + $0x30] sm:$0xff]  ;;  %v291_v48 = vunpack.c.l.s8.bf16 %v95_v42 }
 0x10b   :  { %797 = vmatprep.subr.bf16.mxu0 %v616_v49  ;;  %961 = vmatprep.subr.bf16.mxu1 %v618_v51  ;;  %v94_v49 = vld [vmem:[#allocation3 + $0x20] sm:$0xff]  ;;  %v348_v51 = vunpack.c.l.s8.bf16 %v124_v44  ;;  %v5602_v53 = vpack.c.bf16 %v89_v47, %v89_v47 }
 0x10c   :  { %v297_v60 = vunpack.c.h.s8.bf16 %v94_v49  ;;  %v130_v47 = vld [vmem:[#allocation3 + $0x140] sm:$0xff] }
 0x10e   :  { %798 = vmatpush1.bf16.msra.mxu0 %v615_v54  ;;  %962 = vmatpush1.bf16.msra.mxu1 %v617_v55  ;;  %v290_v54 = vunpack.c.l.s8.bf16 %v94_v49  ;;  %v292_v55 = vunpack.c.l.s8.bf16 %v96_v52 }
 0x10f   :  { %808 = vmatprep.subr.bf16.mxu0 %v623_v57  ;;  %972 = vmatprep.subr.bf16.mxu1 %v625_v58  ;;  %v355_v57 = vunpack.c.h.s8.bf16 %v124_v44  ;;  %v102_v58 = vld [vmem:[#allocation3 + $0x60] sm:$0xff] }
 0x111   :  { %800 = vmatmul.mubr.bf16.vlgmr.msra.gmra.mrb[0].mxu0 %v5593_v61  ;;  %964 = vmatmul.mubr.bf16.vlgmr.msra.gmra.mrb[0].mxu1 %v5593_v61 }
 0x112   :  { %809 = vmatpush1.bf16.msra.mxu0 %v622_v62  ;;  %973 = vmatpush1.bf16.msra.mxu1 %v624_v63  ;;  %v299_v62 = vunpack.c.h.s8.bf16 %v96_v52  ;;  %v305_v63 = vunpack.c.l.s8.bf16 %v102_v58  ;;  %v361_v52 = vunpack.c.l.s8.bf16 %v130_v47 }
 0x113   :  { %810 = vmatprep.subr.bf16.mxu0 %v630_v0  ;;  %974 = vmatprep.subr.bf16.mxu1 %v632_v1  ;;  %v101_v0 = vld [vmem:[#allocation3 + $0x58] sm:$0xff]  ;;  %v362_v1 = vunpack.c.l.s8.bf16 %v131_v59 }
 0x114   :  { %840 = vmatprep.mubr.bf16.mxu0 %v5462_v10  ;;  %1004 = vmatprep.mubr.bf16.mxu1 %v5462_v10  ;;  %v304_v3 = vunpack.c.l.s8.bf16 %v101_v0  ;;  %v311_v9 = vunpack.c.h.s8.bf16 %v101_v0 }
 0x116   :  { %811 = vmatpush1.bf16.msra.mxu0 %v629_v4  ;;  %975 = vmatpush1.bf16.msra.mxu1 %v631_v5  ;;  %v306_v4 = vunpack.c.l.s8.bf16 %v103_v2  ;;  %v312_v5 = vunpack.c.h.s8.bf16 %v102_v58 }
 0x117   :  { %812 = vmatprep.subr.bf16.mxu0 %v637_v6  ;;  %976 = vmatprep.subr.bf16.mxu1 %v639_v7  ;;  %v369_v6 = vunpack.c.h.s8.bf16 %v131_v59  ;;  %v109_v7 = vld [vmem:[#allocation3 + $0x98] sm:$0xff]  ;;  %v368_v59 = vunpack.c.h.s8.bf16 %v130_v47 }
 0x11a   :  { %813 = vmatpush1.bf16.msra.mxu0 %v636_v11  ;;  %977 = vmatpush1.bf16.msra.mxu1 %v638_v12  ;;  %v313_v11 = vunpack.c.h.s8.bf16 %v103_v2  ;;  %v319_v12 = vunpack.c.l.s8.bf16 %v109_v7 }
 0x11b   :  { %814 = vmatprep.subr.bf16.mxu0 %v644_v13  ;;  %978 = vmatprep.subr.bf16.mxu1 %v646_v14  ;;  %v108_v13 = vld [vmem:[#allocation3 + $0x90] sm:$0xff]  ;;  %v376_v14 = vunpack.c.l.s8.bf16 %v138_v8 }
 0x11c   :  { %v318_v15 = vunpack.c.l.s8.bf16 %v108_v13  ;;  %v325_v22 = vunpack.c.h.s8.bf16 %v108_v13 }
 0x11e   :  { %815 = vmatpush1.bf16.msra.mxu0 %v643_v18  ;;  %979 = vmatpush1.bf16.msra.mxu1 %v645_v19  ;;  %v326_v18 = vunpack.c.h.s8.bf16 %v109_v7  ;;  %v383_v19 = vunpack.c.h.s8.bf16 %v138_v8 }
 0x11f   :  { %816 = vmatprep.subr.bf16.mxu0 %v651_v20  ;;  %980 = vmatprep.subr.bf16.mxu1 %v653_v21  ;;  %v116_v20 = vld [vmem:[#allocation3 + $0xd0] sm:$0xff]  ;;  %v145_v21 = vld [vmem:[#allocation3 + $0x1b8] sm:$0xff] }
 0x122   :  { %817 = vmatpush1.bf16.msra.mxu0 %v650_v24  ;;  %981 = vmatpush1.bf16.msra.mxu1 %v652_v26  ;;  %v333_v24 = vunpack.c.l.s8.bf16 %v116_v20  ;;  %v115_v26 = vld [vmem:[#allocation3 + $0xc8] sm:$0xff] }
 0x123   :  { %818 = vmatprep.subr.bf16.mxu0 %v658_v27  ;;  %982 = vmatprep.subr.bf16.mxu1 %v660_v28  ;;  %v390_v27 = vunpack.c.l.s8.bf16 %v145_v21  ;;  %v117_v28 = vld [vmem:[#allocation3 + $0xd8] sm:$0xff]  ;;  %v332_v29 = vunpack.c.l.s8.bf16 %v115_v26  ;;  %v339_v36 = vunpack.c.h.s8.bf16 %v115_v26 }
 0x124   :  { %v334_v30 = vunpack.c.l.s8.bf16 %v117_v28  ;;  %v341_v37 = vunpack.c.h.s8.bf16 %v117_v28 }
 0x126   :  { %819 = vmatpush1.bf16.msra.mxu0 %v657_v31  ;;  %983 = vmatpush1.bf16.msra.mxu1 %v659_v32  ;;  %v340_v31 = vunpack.c.h.s8.bf16 %v116_v20  ;;  %v397_v32 = vunpack.c.h.s8.bf16 %v145_v21 }
 0x127   :  { %820 = vmatprep.subr.bf16.mxu0 %v665_v33  ;;  %984 = vmatprep.subr.bf16.mxu1 %v667_v34  ;;  %v123_v33 = vld [vmem:[#allocation3 + $0x108] sm:$0xff]  ;;  %v180_v34 = vld [vmem:[#allocation3 + $0x2d0] sm:$0xff] }
 0x12a   :  { %821 = vmatpush1.bf16.msra.mxu0 %v664_v38  ;;  %985 = vmatpush1.bf16.msra.mxu1 %v666_v39  ;;  %v347_v38 = vunpack.c.l.s8.bf16 %v123_v33  ;;  %v122_v39 = vld [vmem:[#allocation3 + $0x100] sm:$0xff] }
 0x12b   :  { %822 = vmatprep.subr.bf16.mxu0 %v672_v40  ;;  %986 = vmatprep.subr.bf16.mxu1 %v674_v41  ;;  %v460_v40 = vunpack.c.l.s8.bf16 %v180_v34  ;;  %v152_v41 = vld [vmem:[#allocation3 + $0x1f0] sm:$0xff]  ;;  %v346_v42 = vunpack.c.l.s8.bf16 %v122_v39  ;;  %v353_v49 = vunpack.c.h.s8.bf16 %v122_v39 }
 0x12c   :  { %v404_v44 = vunpack.c.l.s8.bf16 %v152_v41 }
 0x12e   :  { %823 = vmatpush1.bf16.msra.mxu0 %v671_v45  ;;  %987 = vmatpush1.bf16.msra.mxu1 %v673_v46  ;;  %v354_v45 = vunpack.c.h.s8.bf16 %v123_v33  ;;  %v467_v46 = vunpack.c.h.s8.bf16 %v180_v34 }
 0x12f   :  { %1013 = vmatprep.subr.bf16.mxu0 %v291_v48  ;;  %4749 = vmatprep.subr.bf16.mxu1 %v348_v51  ;;  %v187_v48 = vld [vmem:[#allocation3 + $0x308] sm:$0xff]  ;;  %v411_v51 = vunpack.c.h.s8.bf16 %v152_v41 }
 0x131   :  { %841 = vmatmul.mubr.bf16.vlgmr.msra.gmra.mrb[0].mxu0 %v5602_v53  ;;  %1005 = vmatmul.mubr.bf16.vlgmr.msra.gmra.mrb[0].mxu1 %v5602_v53 }
 0x132   :  { %1014 = vmatpush1.bf16.msra.mxu0 %v290_v54  ;;  %4750 = vmatpush3.bf16.msra.mxu1 %v292_v55  ;;  %v129_v54 = vld [vmem:[#allocation3 + $0x138] sm:$0xff]  ;;  %v474_v55 = vunpack.c.l.s8.bf16 %v187_v48 }
 0x133   :  { %1015 = vmatprep.subr.bf16.mxu0 %v298_v56  ;;  %4751 = vmatprep.subr.bf16.mxu1 %v355_v57  ;;  %v159_v56 = vld [vmem:[#allocation3 + $0x228] sm:$0xff]  ;;  %v360_v57 = vunpack.c.l.s8.bf16 %v129_v54  ;;  %v367_v0 = vunpack.c.h.s8.bf16 %v129_v54 }
 0x134   :  { %1209 = vmatprep.mubr.bf16.mxu1 %v5558_v35  ;;  %1045 = vmatprep.mubr.bf16.mxu0 %v5558_v35  ;;  %v110_v35 = vld [vmem:[#allocation3 + $0xa0] sm:$0xff]  ;;  %v418_v58 = vunpack.c.l.s8.bf16 %v159_v56 }
 0x135   :  { %v320_v16 = vunpack.c.l.s8.bf16 %v110_v35  ;;  %v327_v23 = vunpack.c.h.s8.bf16 %v110_v35 }
 0x136   :  { %1016 = vmatpush1.bf16.msra.mxu0 %v297_v60  ;;  %4752 = vmatpush3.bf16.msra.mxu1 %v299_v62  ;;  %v481_v60 = vunpack.c.h.s8.bf16 %v187_v48  ;;  %v137_v62 = vld [vmem:[#allocation3 + $0x178] sm:$0xff] }
 0x137   :  { %1017 = vmatprep.subr.bf16.mxu0 %v305_v63  ;;  %4753 = vmatprep.subr.bf16.mxu1 %v362_v1  ;;  %v194_v63 = vld [vmem:[#allocation3 + $0x340] sm:$0xff]  ;;  %v425_v1 = vunpack.c.h.s8.bf16 %v159_v56  ;;  %v375_v2 = vunpack.c.l.s8.bf16 %v137_v62  ;;  %v382_v8 = vunpack.c.h.s8.bf16 %v137_v62  ;;  %v164_v56 = vld [vmem:[#allocation3 + $0x250] sm:$0xff] }
 0x13a   :  { %1018 = vmatpush1.bf16.msra.mxu0 %v304_v3  ;;  %4754 = vmatpush3.bf16.msra.mxu1 %v306_v4  ;;  %v136_v3 = vld [vmem:[#allocation3 + $0x170] sm:$0xff]  ;;  %v488_v4 = vunpack.c.l.s8.bf16 %v194_v63 }
 0x13b   :  { %1019 = vmatprep.subr.bf16.mxu0 %v312_v5  ;;  %4755 = vmatprep.subr.bf16.mxu1 %v369_v6  ;;  %v166_v5 = vld [vmem:[#allocation3 + $0x260] sm:$0xff]  ;;  %v374_v6 = vunpack.c.l.s8.bf16 %v136_v3  ;;  %v381_v13 = vunpack.c.h.s8.bf16 %v136_v3 }
 0x13c   :  { %v432_v7 = vunpack.c.l.s8.bf16 %v166_v5 }
 0x13e   :  { %1020 = vmatpush1.bf16.msra.mxu0 %v311_v9  ;;  %4756 = vmatpush3.bf16.msra.mxu1 %v313_v11  ;;  %v495_v9 = vunpack.c.h.s8.bf16 %v194_v63  ;;  %v144_v11 = vld [vmem:[#allocation3 + $0x1b0] sm:$0xff] }
 0x13f   :  { %1021 = vmatprep.subr.bf16.mxu0 %v319_v12  ;;  %4757 = vmatprep.subr.bf16.mxu1 %v376_v14  ;;  %v201_v12 = vld [vmem:[#allocation3 + $0x378] sm:$0xff]  ;;  %v439_v14 = vunpack.c.h.s8.bf16 %v166_v5  ;;  %v389_v35 = vunpack.c.l.s8.bf16 %v144_v11  ;;  %v396_v21 = vunpack.c.h.s8.bf16 %v144_v11  ;;  %v172_v63 = vld [vmem:[#allocation3 + $0x290] sm:$0xff] }
 0x140   :  { %v445_v3 = vunpack.c.l.s8.bf16 %v172_v63 }
 0x142   :  { %1022 = vmatpush1.bf16.msra.mxu0 %v318_v15  ;;  %4758 = vmatpush3.bf16.msra.mxu1 %v320_v16  ;;  %v143_v15 = vld [vmem:[#allocation3 + $0x1a8] sm:$0xff]  ;;  %v502_v16 = vunpack.c.l.s8.bf16 %v201_v12 }
 0x143   :  { %1023 = vmatprep.subr.bf16.mxu0 %v326_v18  ;;  %4759 = vmatprep.subr.bf16.mxu1 %v383_v19  ;;  %v173_v18 = vld [vmem:[#allocation3 + $0x298] sm:$0xff]  ;;  %v388_v19 = vunpack.c.l.s8.bf16 %v143_v15  ;;  %v395_v26 = vunpack.c.h.s8.bf16 %v143_v15  ;;  %v178_v15 = vld [vmem:[#allocation3 + $0x2c0] sm:$0xff] }
 0x144   :  { %v446_v20 = vunpack.c.l.s8.bf16 %v173_v18 }
 0x146   :  { %1024 = vmatpush1.bf16.msra.mxu0 %v325_v22  ;;  %4760 = vmatpush3.bf16.msra.mxu1 %v327_v23  ;;  %v509_v22 = vunpack.c.h.s8.bf16 %v201_v12  ;;  %v151_v23 = vld [vmem:[#allocation3 + $0x1e8] sm:$0xff] }
 0x147   :  { %1025 = vmatprep.subr.bf16.mxu0 %v333_v24  ;;  %4761 = vmatprep.subr.bf16.mxu1 %v390_v27  ;;  %v236_v24 = vld [vmem:[#allocation3 + $0x490] sm:$0xff]  ;;  %v453_v27 = vunpack.c.h.s8.bf16 %v173_v18  ;;  %v403_v28 = vunpack.c.l.s8.bf16 %v151_v23  ;;  %v410_v34 = vunpack.c.h.s8.bf16 %v151_v23  ;;  %v179_v12 = vld [vmem:[#allocation3 + $0x2c8] sm:$0xff]  ;;  %v458_v18 = vunpack.c.l.s8.bf16 %v178_v15 }
 0x148   :  { %v465_v23 = vunpack.c.h.s8.bf16 %v178_v15 }
 0x14a   :  { %1026 = vmatpush1.bf16.msra.mxu0 %v332_v29  ;;  %4762 = vmatpush3.bf16.msra.mxu1 %v334_v30  ;;  %v150_v29 = vld [vmem:[#allocation3 + $0x1e0] sm:$0xff]  ;;  %v572_v30 = vunpack.c.l.s8.bf16 %v236_v24 }
 0x14b   :  { %1027 = vmatprep.subr.bf16.mxu0 %v340_v31  ;;  %4763 = vmatprep.subr.bf16.mxu1 %v397_v32  ;;  %v208_v31 = vld [vmem:[#allocation3 + $0x3b0] sm:$0xff]  ;;  %v402_v32 = vunpack.c.l.s8.bf16 %v150_v29  ;;  %v409_v39 = vunpack.c.h.s8.bf16 %v150_v29 }
 0x14c   :  { %v516_v33 = vunpack.c.l.s8.bf16 %v208_v31 }
 0x14e   :  { %1028 = vmatpush1.bf16.msra.mxu0 %v339_v36  ;;  %4764 = vmatpush3.bf16.msra.mxu1 %v341_v37  ;;  %v579_v36 = vunpack.c.h.s8.bf16 %v236_v24  ;;  %v158_v37 = vld [vmem:[#allocation3 + $0x220] sm:$0xff] }
 0x14f   :  { %1029 = vmatprep.subr.bf16.mxu0 %v347_v38  ;;  %4771 = vmatprep.subr.bf16.mxu1 %v460_v40  ;;  %v243_v38 = vld [vmem:[#allocation3 + $0x4c8] sm:$0xff]  ;;  %v523_v40 = vunpack.c.h.s8.bf16 %v208_v31  ;;  %v417_v41 = vunpack.c.l.s8.bf16 %v158_v37  ;;  %v424_v47 = vunpack.c.h.s8.bf16 %v158_v37  ;;  %v192_v37 = vld [vmem:[#allocation3 + $0x330] sm:$0xff] }
 0x150   :  { %v593_v48 = vunpack.c.h.s8.bf16 %v243_v38 }
 0x151   :  { %1210 = vmatmul.mubr.bf16.vlgmr.msra.gmra.mrb[4].mxu1 %v5568_v43 }
 0x152   :  { %1030 = vmatpush1.bf16.msra.mxu0 %v346_v42  ;;  %4772 = vmatpush3.bf16.msra.mxu1 %v404_v44  ;;  %v157_v42 = vld [vmem:[#allocation3 + $0x218] sm:$0xff]  ;;  %v586_v44 = vunpack.c.l.s8.bf16 %v243_v38  ;;  %v278_v38 = vld [vmem:[#allocation3 + $0x5e0] sm:$0xff] }
 0x153   :  { %1031 = vmatprep.subr.bf16.mxu0 %v354_v45  ;;  %4773 = vmatprep.subr.bf16.mxu1 %v467_v46  ;;  %v215_v45 = vld [vmem:[#allocation3 + $0x3e8] sm:$0xff]  ;;  %v416_v46 = vunpack.c.l.s8.bf16 %v157_v42 }
 0x154   :  { %1249 = vmatprep.mubr.bf16.mxu1 %v5570_v50  ;;  %v537_v54 = vunpack.c.h.s8.bf16 %v215_v45 }
 0x156   :  { %1032 = vmatpush1.bf16.msra.mxu0 %v353_v49  ;;  %4774 = vmatpush3.bf16.msra.mxu1 %v411_v51  ;;  %v165_v49 = vld [vmem:[#allocation3 + $0x258] sm:$0xff]  ;;  %v250_v51 = vld [vmem:[#allocation3 + $0x500] sm:$0xff] }
 0x157   :  { %1033 = vmatprep.subr.bf16.mxu0 %v361_v52  ;;  %4775 = vmatprep.subr.bf16.mxu1 %v474_v55  ;;  %v423_v52 = vunpack.c.h.s8.bf16 %v157_v42  ;;  %v431_v55 = vunpack.c.l.s8.bf16 %v165_v49  ;;  %v607_v62 = vunpack.c.h.s8.bf16 %v250_v51  ;;  %v200_v42 = vld [vmem:[#allocation3 + $0x370] sm:$0xff] }
 0x15a   :  { %1034 = vmatpush1.bf16.msra.mxu0 %v360_v57  ;;  %4776 = vmatpush3.bf16.msra.mxu1 %v418_v58  ;;  %v600_v57 = vunpack.c.l.s8.bf16 %v250_v51  ;;  %v430_v58 = vunpack.c.l.s8.bf16 %v164_v56  ;;  %v508_v51 = vunpack.c.h.s8.bf16 %v200_v42 }
 0x15b   :  { %1035 = vmatprep.subr.bf16.mxu0 %v368_v59  ;;  %4777 = vmatprep.subr.bf16.mxu1 %v481_v60  ;;  %v438_v60 = vunpack.c.h.s8.bf16 %v165_v49 }
 0x15e   :  { %1036 = vmatpush1.bf16.msra.mxu0 %v367_v0  ;;  %4778 = vmatpush3.bf16.msra.mxu1 %v425_v1  ;;  %v257_v0 = vld [vmem:[#allocation3 + $0x538] sm:$0xff]  ;;  %v437_v1 = vunpack.c.h.s8.bf16 %v164_v56 }
 0x15f   :  { %1037 = vmatprep.subr.bf16.mxu0 %v375_v2  ;;  %4779 = vmatprep.subr.bf16.mxu1 %v488_v4  ;;  %v171_v4 = vld [vmem:[#allocation3 + $0x288] sm:$0xff]  ;;  %v614_v5 = vunpack.c.l.s8.bf16 %v257_v0  ;;  %v621_v11 = vunpack.c.h.s8.bf16 %v257_v0 }
 0x162   :  { %1038 = vmatpush1.bf16.msra.mxu0 %v374_v6  ;;  %4780 = vmatpush3.bf16.msra.mxu1 %v432_v7  ;;  %v229_v6 = vld [vmem:[#allocation3 + $0x458] sm:$0xff]  ;;  %v444_v7 = vunpack.c.l.s8.bf16 %v171_v4 }
 0x163   :  { %1039 = vmatprep.subr.bf16.mxu0 %v382_v8  ;;  %4781 = vmatprep.subr.bf16.mxu1 %v495_v9  ;;  %v558_v8 = vunpack.c.l.s8.bf16 %v229_v6  ;;  %v452_v9 = vunpack.c.h.s8.bf16 %v172_v63 }
 0x166   :  { %1040 = vmatpush1.bf16.msra.mxu0 %v381_v13  ;;  %4782 = vmatpush3.bf16.msra.mxu1 %v439_v14  ;;  %v451_v13 = vunpack.c.h.s8.bf16 %v171_v4  ;;  %v565_v14 = vunpack.c.h.s8.bf16 %v229_v6  ;;  %v213_v6 = vld [vmem:[#allocation3 + $0x3d8] sm:$0xff] }
 0x167   :  { %1041 = vmatprep.subr.bf16.mxu0 %v389_v35  ;;  %4783 = vmatprep.subr.bf16.mxu1 %v502_v16  ;;  %v459_v35 = vunpack.c.l.s8.bf16 %v179_v12  ;;  %v264_v16 = vld [vmem:[#allocation3 + $0x570] sm:$0xff] }
 0x168   :  { %v635_v24 = vunpack.c.h.s8.bf16 %v264_v16 }
 0x16a   :  { %1042 = vmatpush1.bf16.msra.mxu0 %v388_v19  ;;  %4784 = vmatpush3.bf16.msra.mxu1 %v446_v20  ;;  %v628_v19 = vunpack.c.l.s8.bf16 %v264_v16  ;;  %v466_v20 = vunpack.c.h.s8.bf16 %v179_v12 }
 0x16b   :  { %1043 = vmatprep.subr.bf16.mxu0 %v396_v21  ;;  %4785 = vmatprep.subr.bf16.mxu1 %v509_v22  ;;  %v5463_v21 = vmov 0.0   ;;  %v186_v22 = vld [vmem:[#allocation3 + $0x300] sm:$0xff] }
 0x16c   :  { %v480_v31 = vunpack.c.h.s8.bf16 %v186_v22 }
 0x16e   :  { %1044 = vmatpush1.bf16.msra.mxu0 %v395_v26  ;;  %4786 = vmatpush3.bf16.msra.mxu1 %v453_v27  ;;  %v473_v26 = vunpack.c.l.s8.bf16 %v186_v22  ;;  %v185_v27 = vld [vmem:[#allocation3 + $0x2f8] sm:$0xff] }
 0x16f   :  { %1054 = vmatprep.subr.bf16.mxu0 %v403_v28  ;;  %4793 = vmatprep.subr.bf16.mxu1 %v572_v30  ;;  %v271_v28 = vld [vmem:[#allocation3 + $0x5a8] sm:$0xff]  ;;  %v472_v29 = vunpack.c.l.s8.bf16 %v185_v27 }
 0x170   :  { %v642_v30 = vunpack.c.l.s8.bf16 %v271_v28 }
 0x171   :  { %1046 = vmatmul.mubr.bf16.vlgmr.msra.gmra.mrb[4].mxu0 %v5568_v43  ;;  %1250 = vmatmul.mubr.bf16.vlgmr.msra.gmra.mrb[8].mxu1 %v5579_v17  ;;  %v530_v43 = vunpack.c.l.s8.bf16 %v215_v45  ;;  %v663_v45 = vunpack.c.h.s8.bf16 %v278_v38 }
 0x172   :  { %1055 = vmatpush1.bf16.msra.mxu0 %v402_v32  ;;  %4794 = vmatpush3.bf16.msra.mxu1 %v516_v33  ;;  %v193_v32 = vld [vmem:[#allocation3 + $0x338] sm:$0xff]  ;;  %v479_v33 = vunpack.c.h.s8.bf16 %v185_v27  ;;  %v1426_v27 = vld [vmem:[#allocation3 + $0x6d0] sm:$0xff] }
 0x173   :  { %1056 = vmatprep.subr.bf16.mxu0 %v410_v34  ;;  %4795 = vmatprep.subr.bf16.mxu1 %v579_v36  ;;  %v649_v34 = vunpack.c.h.s8.bf16 %v271_v28  ;;  %v487_v36 = vunpack.c.l.s8.bf16 %v193_v32 }
 0x174   :  { %1289 = vmatprep.mubr.bf16.mxu1 %v5584_v25  ;;  %1086 = vmatprep.mubr.bf16.mxu0 %v5570_v50  ;;  %v222_v50 = vld [vmem:[#allocation3 + $0x420] sm:$0xff] }
 0x175   :  { %v544_v59 = vunpack.c.l.s8.bf16 %v222_v50  ;;  %v551_v2 = vunpack.c.h.s8.bf16 %v222_v50  ;;  %v206_v50 = vld [vmem:[#allocation3 + $0x3a0] sm:$0xff] }
 0x176   :  { %1057 = vmatpush1.bf16.msra.mxu0 %v409_v39  ;;  %4796 = vmatpush3.bf16.msra.mxu1 %v523_v40  ;;  %v486_v39 = vunpack.c.l.s8.bf16 %v192_v37  ;;  %v656_v40 = vunpack.c.l.s8.bf16 %v278_v38  ;;  %v1650_v38 = vunpack.c.h.s8.bf16 %v1426_v27 }
 0x177   :  { %1058 = vmatprep.subr.bf16.mxu0 %v417_v41  ;;  %4797 = vmatprep.subr.bf16.mxu1 %v586_v44  ;;  %v494_v41 = vunpack.c.h.s8.bf16 %v193_v32  ;;  %v493_v44 = vunpack.c.h.s8.bf16 %v192_v37  ;;  %v1643_v32 = vunpack.c.l.s8.bf16 %v1426_v27  ;;  %v5628_v27 = vld [vmem:[#allocation3 + $0x7e8] sm:$0xff] }
 0x17a   :  { %1059 = vmatpush1.bf16.msra.mxu0 %v416_v46  ;;  %4798 = vmatpush3.bf16.msra.mxu1 %v530_v43  ;;  %v501_v46 = vunpack.c.l.s8.bf16 %v200_v42  ;;  %v199_v43 = vld [vmem:[#allocation3 + $0x368] sm:$0xff] }
 0x17b   :  { %1060 = vmatprep.subr.bf16.mxu0 %v424_v47  ;;  %4799 = vmatprep.subr.bf16.mxu1 %v593_v48  ;;  %v285_v47 = vld [vmem:[#allocation3 + $0x618] sm:$0xff]  ;;  %v500_v48 = vunpack.c.l.s8.bf16 %v199_v43 }
 0x17c   :  { %v670_v49 = vunpack.c.l.s8.bf16 %v285_v47  ;;  %v677_v56 = vunpack.c.h.s8.bf16 %v285_v47 }
 0x17e   :  { %1061 = vmatpush1.bf16.msra.mxu0 %v423_v52  ;;  %4800 = vmatpush3.bf16.msra.mxu1 %v537_v54  ;;  %v207_v52 = vld [vmem:[#allocation3 + $0x3a8] sm:$0xff] }
 0x17f   :  { %1062 = vmatprep.subr.bf16.mxu0 %v431_v55  ;;  %4801 = vmatprep.subr.bf16.mxu1 %v600_v57  ;;  %v1405_v54 = vld [vmem:[#allocation3 + $0x628] sm:$0xff]  ;;  %v507_v55 = vunpack.c.h.s8.bf16 %v199_v43  ;;  %v515_v57 = vunpack.c.l.s8.bf16 %v207_v52  ;;  %v522_v63 = vunpack.c.h.s8.bf16 %v207_v52  ;;  %v1432_v43 = vld [vmem:[#allocation3 + $0x700] sm:$0xff] }
 0x180   :  { %v1608_v0 = vunpack.c.h.s8.bf16 %v1405_v54  ;;  %v242_v52 = vld [vmem:[#allocation3 + $0x4c0] sm:$0xff] }
 0x182   :  { %1063 = vmatpush1.bf16.msra.mxu0 %v430_v58  ;;  %4802 = vmatpush3.bf16.msra.mxu1 %v544_v59  ;;  %v1601_v58 = vunpack.c.l.s8.bf16 %v1405_v54  ;;  %v1404_v59 = vld [vmem:[#allocation3 + $0x620] sm:$0xff] }
 0x183   :  { %1064 = vmatprep.subr.bf16.mxu0 %v438_v60  ;;  %4803 = vmatprep.subr.bf16.mxu1 %v607_v62  ;;  %v514_v60 = vunpack.c.l.s8.bf16 %v206_v50  ;;  %v1600_v62 = vunpack.c.l.s8.bf16 %v1404_v59  ;;  %v1607_v4 = vunpack.c.h.s8.bf16 %v1404_v59  ;;  %v1440_v54 = vld [vmem:[#allocation3 + $0x740] sm:$0xff]  ;;  %v1439_v59 = vld [vmem:[#allocation3 + $0x738] sm:$0xff] }
 0x186   :  { %1065 = vmatpush1.bf16.msra.mxu0 %v437_v1  ;;  %4804 = vmatpush3.bf16.msra.mxu1 %v551_v2  ;;  %v214_v1 = vld [vmem:[#allocation3 + $0x3e0] sm:$0xff] }
 0x187   :  { %1066 = vmatprep.subr.bf16.mxu0 %v445_v3  ;;  %4805 = vmatprep.subr.bf16.mxu1 %v614_v5  ;;  %v1412_v2 = vld [vmem:[#allocation3 + $0x660] sm:$0xff]  ;;  %v521_v3 = vunpack.c.h.s8.bf16 %v206_v50  ;;  %v529_v5 = vunpack.c.l.s8.bf16 %v214_v1  ;;  %v241_v50 = vld [vmem:[#allocation3 + $0x4b8] sm:$0xff] }
 0x188   :  { %v1622_v12 = vunpack.c.h.s8.bf16 %v1412_v2 }
 0x18a   :  { %1067 = vmatpush1.bf16.msra.mxu0 %v444_v7  ;;  %4806 = vmatpush3.bf16.msra.mxu1 %v558_v8  ;;  %v1615_v7 = vunpack.c.l.s8.bf16 %v1412_v2  ;;  %v1411_v8 = vld [vmem:[#allocation3 + $0x658] sm:$0xff] }
 0x18b   :  { %1068 = vmatprep.subr.bf16.mxu0 %v452_v9  ;;  %4807 = vmatprep.subr.bf16.mxu1 %v621_v11  ;;  %v528_v9 = vunpack.c.l.s8.bf16 %v213_v6  ;;  %v1614_v11 = vunpack.c.l.s8.bf16 %v1411_v8  ;;  %v1621_v15 = vunpack.c.h.s8.bf16 %v1411_v8  ;;  %v1447_v2 = vld [vmem:[#allocation3 + $0x778] sm:$0xff]  ;;  %v1446_v8 = vld [vmem:[#allocation3 + $0x770] sm:$0xff] }
 0x18e   :  { %1069 = vmatpush1.bf16.msra.mxu0 %v451_v13  ;;  %4808 = vmatpush3.bf16.msra.mxu1 %v565_v14  ;;  %v221_v13 = vld [vmem:[#allocation3 + $0x418] sm:$0xff] }
 0x18f   :  { %1070 = vmatprep.subr.bf16.mxu0 %v459_v35  ;;  %5049 = vmatprep.subr.bf16.mxu1 %v5463_v21  ;;  %v1419_v14 = vld [vmem:[#allocation3 + $0x698] sm:$0xff]  ;;  %v535_v35 = vunpack.c.h.s8.bf16 %v213_v6  ;;  %v543_v16 = vunpack.c.l.s8.bf16 %v221_v13  ;;  %v248_v6 = vld [vmem:[#allocation3 + $0x4f0] sm:$0xff] }
 0x191   :  { %1290 = vmatmul.mubr.bf16.vlgmr.msra.gmra.mrb[12].mxu1 %v5593_v61 }
 0x192   :  { %1071 = vmatpush1.bf16.msra.mxu0 %v458_v18  ;;  %5050 = vmatpush3.bf16.msra.mxu1 %v628_v19  ;;  %v220_v18 = vld [vmem:[#allocation3 + $0x410] sm:$0xff]  ;;  %v1629_v19 = vunpack.c.l.s8.bf16 %v1419_v14 }
 0x193   :  { %1072 = vmatprep.subr.bf16.mxu0 %v466_v20  ;;  %5051 = vmatprep.subr.bf16.mxu1 %v5463_v21  ;;  %v542_v20 = vunpack.c.l.s8.bf16 %v220_v18  ;;  %v549_v28 = vunpack.c.h.s8.bf16 %v220_v18  ;;  %v255_v18 = vld [vmem:[#allocation3 + $0x528] sm:$0xff] }
 0x194   :  { %5065 = vmatprep.mubr.msk.bf16.mxu1 %vm5464_vm0, %v5463_v21 }
 0x196   :  { %1073 = vmatpush1.bf16.msra.mxu0 %v465_v23  ;;  %5052 = vmatpush3.bf16.msra.mxu1 %v635_v24  ;;  %v550_v23 = vunpack.c.h.s8.bf16 %v221_v13  ;;  %v1636_v24 = vunpack.c.h.s8.bf16 %v1419_v14  ;;  %v256_v13 = vld [vmem:[#allocation3 + $0x530] sm:$0xff] }
 0x197   :  { %1074 = vmatprep.subr.bf16.mxu0 %v473_v26  ;;  %5053 = vmatprep.subr.bf16.mxu1 %v5463_v21  ;;  %v228_v26 = vld [vmem:[#allocation3 + $0x450] sm:$0xff] }
 0x198   :  { %v564_v37 = vunpack.c.h.s8.bf16 %v228_v26  ;;  %v1454_v14 = vld [vmem:[#allocation3 + $0x7b0] sm:$0xff] }
 0x19a   :  { %1075 = vmatpush1.bf16.msra.mxu0 %v472_v29  ;;  %5054 = vmatpush3.bf16.msra.mxu1 %v642_v30  ;;  %v557_v30 = vunpack.c.l.s8.bf16 %v228_v26  ;;  %v263_v26 = vld [vmem:[#allocation3 + $0x568] sm:$0xff] }
 0x19b   :  { %1076 = vmatprep.subr.bf16.mxu0 %v480_v31  ;;  %5055 = vmatprep.subr.bf16.mxu1 %v5463_v21  ;;  %v227_v31 = vld [vmem:[#allocation3 + $0x448] sm:$0xff] }
 0x19e   :  { %1077 = vmatpush1.bf16.msra.mxu0 %v479_v33  ;;  %5056 = vmatpush3.bf16.msra.mxu1 %v649_v34  ;;  %v1425_v33 = vld [vmem:[#allocation3 + $0x6c8] sm:$0xff]  ;;  %v556_v34 = vunpack.c.l.s8.bf16 %v227_v31 }
 0x19f   :  { %1078 = vmatprep.subr.bf16.mxu0 %v487_v36  ;;  %5057 = vmatprep.subr.bf16.mxu1 %v5463_v21  ;;  %v1642_v36 = vunpack.c.l.s8.bf16 %v1425_v33  ;;  %v1649_v42 = vunpack.c.h.s8.bf16 %v1425_v33 }
 0x1a2   :  { %1079 = vmatpush1.bf16.msra.mxu0 %v486_v39  ;;  %5058 = vmatpush3.bf16.msra.mxu1 %v656_v40  ;;  %v235_v39 = vld [vmem:[#allocation3 + $0x488] sm:$0xff] }
 0x1a3   :  { %1080 = vmatprep.subr.bf16.mxu0 %v494_v41  ;;  %5059 = vmatprep.subr.bf16.mxu1 %v5463_v21  ;;  %v1433_v40 = vld [vmem:[#allocation3 + $0x708] sm:$0xff]  ;;  %v563_v41 = vunpack.c.h.s8.bf16 %v227_v31  ;;  %v262_v31 = vld [vmem:[#allocation3 + $0x560] sm:$0xff] }
 0x1a4   :  { %v626_v33 = vunpack.c.l.s8.bf16 %v262_v31 }
 0x1a6   :  { %1081 = vmatpush1.bf16.msra.mxu0 %v493_v44  ;;  %5060 = vmatpush3.bf16.msra.mxu1 %v663_v45  ;;  %v571_v44 = vunpack.c.l.s8.bf16 %v235_v39  ;;  %v234_v45 = vld [vmem:[#allocation3 + $0x480] sm:$0xff] }
 0x1a7   :  { %1082 = vmatprep.subr.bf16.mxu0 %v501_v46  ;;  %5061 = vmatprep.subr.bf16.mxu1 %v5463_v21  ;;  %v1657_v46 = vunpack.c.l.s8.bf16 %v1433_v40  ;;  %v570_v47 = vunpack.c.l.s8.bf16 %v234_v45 }
 0x1aa   :  { %1083 = vmatpush1.bf16.msra.mxu0 %v500_v48  ;;  %5062 = vmatpush3.bf16.msra.mxu1 %v670_v49  ;;  %v1656_v48 = vunpack.c.l.s8.bf16 %v1432_v43  ;;  %v578_v49 = vunpack.c.h.s8.bf16 %v235_v39  ;;  %v269_v39 = vld [vmem:[#allocation3 + $0x598] sm:$0xff] }
 0x1ab   :  { %1084 = vmatprep.subr.bf16.mxu0 %v508_v51  ;;  %5063 = vmatprep.subr.bf16.mxu1 %v5463_v21  ;;  %v1664_v51 = vunpack.c.h.s8.bf16 %v1433_v40  ;;  %v1339_v40 = vlaneseq }
 0x1ae   :  { %1085 = vmatpush1.bf16.msra.mxu0 %v507_v55  ;;  %5064 = vmatpush3.bf16.msra.mxu1 %v677_v56  ;;  %v577_v55 = vunpack.c.h.s8.bf16 %v234_v45  ;;  %v1663_v56 = vunpack.c.h.s8.bf16 %v1432_v43  ;;  %v5633_v45 = vshrl.u32 %v1339_v40, 7  ;;  %v1413_v40 = vld [vmem:[#allocation3 + $0x668] sm:$0xff] }
 0x1af   :  { %1095 = vmatprep.subr.bf16.mxu0 %v515_v57  ;;  %1999 = vmatprep.subr.bf16.mxu1 %v1601_v58  ;;  %v585_v57 = vunpack.c.l.s8.bf16 %v242_v52  ;;  %v1671_v58 = vunpack.c.l.s8.bf16 %v1440_v54 }
 0x1b1   :  { %1087 = vmatmul.mubr.bf16.vlgmr.msra.gmra.mrb[4].mxu0 %v5579_v17  ;;  %5066 = vmatmul.mubr.bf16.vlgmr.msra.gmra.mrb[16].mxu1 %v5602_v53  ;;  %v536_v17 = vunpack.c.h.s8.bf16 %v214_v1  ;;  %v249_v1 = vld [vmem:[#allocation3 + $0x4f8] sm:$0xff] }
 0x1b2   :  { %1096 = vmatpush1.bf16.msra.mxu0 %v514_v60  ;;  %2000 = vmatpush1.bf16.msra.mxu1 %v1600_v62  ;;  %v584_v60 = vunpack.c.l.s8.bf16 %v241_v50  ;;  %v1670_v62 = vunpack.c.l.s8.bf16 %v1439_v59 }
 0x1b3   :  { %1097 = vmatprep.subr.bf16.mxu0 %v522_v63  ;;  %2001 = vmatprep.subr.bf16.mxu1 %v1608_v0  ;;  %v592_v63 = vunpack.c.h.s8.bf16 %v242_v52  ;;  %v1678_v0 = vunpack.c.h.s8.bf16 %v1440_v54  ;;  %v5644_v52 = vsub.s32 3, %v5633_v45 }
 0x1b4   :  { %1127 = vmatprep.mubr.bf16.mxu0 %v5584_v25  ;;  %v1418_v25 = vld [vmem:[#allocation3 + $0x690] sm:$0xff] }
 0x1b5   :  { %v1628_v22 = vunpack.c.l.s8.bf16 %v1418_v25  ;;  %v1635_v29 = vunpack.c.h.s8.bf16 %v1418_v25  ;;  %v1453_v25 = vld [vmem:[#allocation3 + $0x7a8] sm:$0xff] }
 0x1b6   :  { %1098 = vmatpush1.bf16.msra.mxu0 %v521_v3  ;;  %2002 = vmatpush1.bf16.msra.mxu1 %v1607_v4  ;;  %v591_v3 = vunpack.c.h.s8.bf16 %v241_v50  ;;  %v1677_v4 = vunpack.c.h.s8.bf16 %v1439_v59 }
 0x1b7   :  { %1099 = vmatprep.subr.bf16.mxu0 %v529_v5  ;;  %2003 = vmatprep.subr.bf16.mxu1 %v1615_v7  ;;  %v599_v5 = vunpack.c.l.s8.bf16 %v249_v1  ;;  %v1685_v7 = vunpack.c.l.s8.bf16 %v1447_v2 }
 0x1ba   :  { %1100 = vmatpush1.bf16.msra.mxu0 %v528_v9  ;;  %2004 = vmatpush1.bf16.msra.mxu1 %v1614_v11  ;;  %v598_v9 = vunpack.c.l.s8.bf16 %v248_v6  ;;  %v1684_v11 = vunpack.c.l.s8.bf16 %v1446_v8 }
 0x1bb   :  { %1101 = vmatprep.subr.bf16.mxu0 %v536_v17  ;;  %2005 = vmatprep.subr.bf16.mxu1 %v1622_v12  ;;  %v606_v17 = vunpack.c.h.s8.bf16 %v249_v1  ;;  %v1692_v12 = vunpack.c.h.s8.bf16 %v1447_v2 }
 0x1be   :  { %1102 = vmatpush1.bf16.msra.mxu0 %v535_v35  ;;  %2006 = vmatpush1.bf16.msra.mxu1 %v1621_v15  ;;  %v605_v35 = vunpack.c.h.s8.bf16 %v248_v6  ;;  %v1691_v15 = vunpack.c.h.s8.bf16 %v1446_v8 }
 0x1bf   :  { %1103 = vmatprep.subr.bf16.mxu0 %v543_v16  ;;  %2007 = vmatprep.subr.bf16.mxu1 %v1629_v19  ;;  %v613_v16 = vunpack.c.l.s8.bf16 %v256_v13  ;;  %v1699_v19 = vunpack.c.l.s8.bf16 %v1454_v14 }
 0x1c2   :  { %1104 = vmatpush1.bf16.msra.mxu0 %v542_v20  ;;  %2008 = vmatpush1.bf16.msra.mxu1 %v1628_v22  ;;  %v612_v20 = vunpack.c.l.s8.bf16 %v255_v18  ;;  %v1698_v22 = vunpack.c.l.s8.bf16 %v1453_v25 }
 0x1c3   :  { %1105 = vmatprep.subr.bf16.mxu0 %v550_v23  ;;  %2009 = vmatprep.subr.bf16.mxu1 %v1636_v24  ;;  %v620_v23 = vunpack.c.h.s8.bf16 %v256_v13  ;;  %v1706_v24 = vunpack.c.h.s8.bf16 %v1454_v14 }
 0x1c6   :  { %1106 = vmatpush1.bf16.msra.mxu0 %v549_v28  ;;  %2010 = vmatpush1.bf16.msra.mxu1 %v1635_v29  ;;  %v619_v28 = vunpack.c.h.s8.bf16 %v255_v18  ;;  %v1705_v29 = vunpack.c.h.s8.bf16 %v1453_v25 }
 0x1c7   :  { %1107 = vmatprep.subr.bf16.mxu0 %v557_v30  ;;  %2011 = vmatprep.subr.bf16.mxu1 %v1643_v32  ;;  %v627_v30 = vunpack.c.l.s8.bf16 %v263_v26  ;;  %v1713_v32 = vunpack.c.l.s8.bf16 %v5628_v27 }
 0x1ca   :  { %1108 = vmatpush1.bf16.msra.mxu0 %v556_v34  ;;  %2012 = vmatpush1.bf16.msra.mxu1 %v1642_v36  ;;  %v634_v34 = vunpack.c.h.s8.bf16 %v263_v26  ;;  %v270_v36 = vld [vmem:[#allocation3 + $0x5a0] sm:$0xff]  ;;  %v1720_v26 = vunpack.c.h.s8.bf16 %v5628_v27  ;;  %v1414_v27 = vld [vmem:[#allocation3 + $0x670] sm:$0xff] }
 0x1cb   :  { %1109 = vmatprep.subr.bf16.mxu0 %v564_v37  ;;  %2013 = vmatprep.subr.bf16.mxu1 %v1650_v38  ;;  %v633_v37 = vunpack.c.h.s8.bf16 %v262_v31  ;;  %v641_v38 = vunpack.c.l.s8.bf16 %v270_v36 }
 0x1ce   :  { %1110 = vmatpush1.bf16.msra.mxu0 %v563_v41  ;;  %2014 = vmatpush1.bf16.msra.mxu1 %v1649_v42  ;;  %v640_v41 = vunpack.c.l.s8.bf16 %v269_v39  ;;  %v648_v42 = vunpack.c.h.s8.bf16 %v270_v36  ;;  %v1467_v36 = vld [vmem:[#allocation3 + $0x818] sm:$0xff] }
 0x1cf   :  { %1111 = vmatprep.subr.bf16.mxu0 %v571_v44  ;;  %2015 = vmatprep.subr.bf16.mxu1 %v1657_v46  ;;  %v277_v44 = vld [vmem:[#allocation3 + $0x5d8] sm:$0xff]  ;;  %v647_v46 = vunpack.c.h.s8.bf16 %v269_v39  ;;  %v1617_v39 = vunpack.c.l.s8.bf16 %v1414_v27 }
 0x1d0   :  { %v655_v43 = vunpack.c.l.s8.bf16 %v277_v44  ;;  %v662_v54 = vunpack.c.h.s8.bf16 %v277_v44  ;;  %v1616_v44 = vunpack.c.l.s8.bf16 %v1413_v40 }
 0x1d2   :  { %1112 = vmatpush1.bf16.msra.mxu0 %v570_v47  ;;  %2016 = vmatpush1.bf16.msra.mxu1 %v1656_v48  ;;  %v5636_v47 = vsub.s32 0, %v5633_v45 }
 0x1d3   :  { %1113 = vmatprep.subr.bf16.mxu0 %v578_v49  ;;  %2017 = vmatprep.subr.bf16.mxu1 %v1664_v51  ;;  %v5638_v49 = vld [vmem:[#allocation6] sm:$0xff]  ;;  %v5641_v51 = vsub.s32 1, %v5633_v45 }
 0x1d4   :  { %v1354_v50 = vrot.slane %v5638_v49, %v5644_v52 }
 0x1d6   :  { %1114 = vmatpush1.bf16.msra.mxu0 %v577_v55  ;;  %2018 = vmatpush1.bf16.msra.mxu1 %v1663_v56  ;;  %v284_v55 = vld [vmem:[#allocation3 + $0x610] sm:$0xff]  ;;  %v1342_v56 = vrot.slane %v5638_v49, %v5636_v47 }
 0x1d7   :  { %1115 = vmatprep.subr.bf16.mxu0 %v585_v57  ;;  %2019 = vmatprep.subr.bf16.mxu1 %v1671_v58  ;;  %v1346_v57 = vrot.slane %v5638_v49, %v5641_v51  ;;  %v669_v59 = vunpack.c.l.s8.bf16 %v284_v55 }
 0x1da   :  { %1116 = vmatpush1.bf16.msra.mxu0 %v584_v60  ;;  %2020 = vmatpush1.bf16.msra.mxu1 %v1670_v62  ;;  %v283_v60 = vld [vmem:[#allocation3 + $0x608] sm:$0xff] }
 0x1db   :  { %1117 = vmatprep.subr.bf16.mxu0 %v592_v63  ;;  %2021 = vmatprep.subr.bf16.mxu1 %v1678_v0  ;;  %v5655_v63 = vstv %s5921_s0  ;;  %v668_v8 = vunpack.c.l.s8.bf16 %v283_v60  ;;  %v675_v25 = vunpack.c.h.s8.bf16 %v283_v60  ;;  %s5465_s0 = smov [#allocation12]  }
 0x1dc   :  { %s4677_s20 = sshll.u32 %s5465_s0, 4  ;;  %s4678_s20 = int_to_ptr.vmem [resolvable:$true] %s4677_s20 }
 0x1dd   :  { %s5398_s21 = scalar_lea.vmem %s4678_s20, 896  ;;  %p5403_p5 = scmp.lt.s32.totalorder %s4678_s20, %s4678_s20 }
 0x1de   :  { %1118 = vmatpush1.bf16.msra.mxu0 %v591_v3  ;;  %2022 = vmatpush1.bf16.msra.mxu1 %v1677_v4  ;;  %p5399_p4 = scmp.ne.s32.totalorder %s4678_s20, %s5398_s21  ;;  %p5404_p6 = scmp.lt.s32.totalorder %s5398_s21, %s5398_s21 }
 0x1df   :  { %1119 = vmatprep.subr.bf16.mxu0 %v599_v5  ;;  %2023 = vmatprep.subr.bf16.mxu1 %v1685_v7 }
 0x1e0   :  { %p5405_p7 = por %p5404_p6, %p5403_p5 }
 0x1e2   :  { %1120 = vmatpush1.bf16.msra.mxu0 %v598_v9  ;;  %2024 = vmatpush1.bf16.msra.mxu1 %v1684_v11  ;;  %p5406_p8 = pnand %p5405_p7, %p5399_p4 }
 0x1e3   :  { %1121 = vmatprep.subr.bf16.mxu0 %v606_v17  ;;  %2025 = vmatprep.subr.bf16.mxu1 %v1692_v12  ;;  %v676_v12 = vunpack.c.h.s8.bf16 %v284_v55 }
 0x1e6   :  { %1122 = vmatpush1.bf16.msra.mxu0 %v605_v35  ;;  %2026 = vmatpush1.bf16.msra.mxu1 %v1691_v15  ;;  %v1460_v35 = vld [vmem:[#allocation3 + $0x7e0] sm:$0xff] }
 0x1e7   :  { %1123 = vmatprep.subr.bf16.mxu0 %v613_v16  ;;  %2027 = vmatprep.subr.bf16.mxu1 %v1699_v19  ;;  %v1407_v16 = vld [vmem:[#allocation3 + $0x638] sm:$0xff] }
 0x1ea   :  { %1124 = vmatpush1.bf16.msra.mxu0 %v612_v20  ;;  %2028 = vmatpush1.bf16.msra.mxu1 %v1698_v22  ;;  %v1712_v22 = vunpack.c.l.s8.bf16 %v1460_v35 }
 0x1eb   :  { %1125 = vmatprep.subr.bf16.mxu0 %v620_v23  ;;  %2029 = vmatprep.subr.bf16.mxu1 %v1706_v24  ;;  %v1406_v23 = vld [vmem:[#allocation3 + $0x630] sm:$0xff] }
 0x1ec   :  { %v1602_v31 = vunpack.c.l.s8.bf16 %v1406_v23 }
 0x1ee   :  { %1126 = vmatpush1.bf16.msra.mxu0 %v619_v28  ;;  %2030 = vmatpush1.bf16.msra.mxu1 %v1705_v29  ;;  %v1603_v28 = vunpack.c.l.s8.bf16 %v1407_v16 }
 0x1ef   :  { %1136 = vmatprep.subr.bf16.mxu0 %v627_v30  ;;  %2040 = vmatprep.subr.bf16.mxu1 %v1713_v32  ;;  %v1468_v30 = vld [vmem:[#allocation3 + $0x820] sm:$0xff]  ;;  %v1719_v32 = vunpack.c.h.s8.bf16 %v1460_v35 }
 0x1f1   :  { %1128 = vmatmul.mubr.bf16.vlgmr.msra.gmra.mrb[4].mxu0 %v5593_v61  ;;  %v276_v61 = vld [vmem:[#allocation3 + $0x5d0] sm:$0xff] }
 0x1f2   :  { %1137 = vmatpush1.bf16.msra.mxu0 %v626_v33  ;;  %1168 = vmatprep.mubr.bf16.mxu0 %v5462_v10  ;;  %v654_v48 = vunpack.c.l.s8.bf16 %v276_v61  ;;  %v661_v58 = vunpack.c.h.s8.bf16 %v276_v61  ;;  %v1610_v33 = vunpack.c.h.s8.bf16 %v1407_v16  ;;  %v1474_v61 = vld [vmem:[#allocation3 + $0x850] sm:$0xff] }
 0x1f3   :  { %1138 = vmatprep.subr.bf16.mxu0 %v634_v34  ;;  %v1727_v34 = vunpack.c.l.s8.bf16 %v1468_v30  ;;  %v1740_v55 = vunpack.c.l.s8.bf16 %v1474_v61  ;;  %v1747_v60 = vunpack.c.h.s8.bf16 %v1474_v61 }
 0x1f6   :  { %1139 = vmatpush1.bf16.msra.mxu0 %v633_v37  ;;  %v1609_v37 = vunpack.c.h.s8.bf16 %v1406_v23 }
 0x1f7   :  { %1140 = vmatprep.subr.bf16.mxu0 %v641_v38  ;;  %v1726_v38 = vunpack.c.l.s8.bf16 %v1467_v36 }
 0x1fa   :  { %1141 = vmatpush1.bf16.msra.mxu0 %v640_v41  ;;  %v1734_v41 = vunpack.c.h.s8.bf16 %v1468_v30 }
 0x1fb   :  { %1142 = vmatprep.subr.bf16.mxu0 %v648_v42  ;;  %v1475_v42 = vld [vmem:[#allocation3 + $0x858] sm:$0xff] }
 0x1fe   :  { %1143 = vmatpush1.bf16.msra.mxu0 %v647_v46  ;;  %v1733_v46 = vunpack.c.h.s8.bf16 %v1467_v36 }
 0x1ff   :  { %1144 = vmatprep.subr.bf16.mxu0 %v655_v43  ;;  %v1624_v43 = vunpack.c.h.s8.bf16 %v1414_v27  ;;  %v1495_v27 = vld [vmem:[#allocation3 + $0x8f8] sm:$0xff] }
 0x202   :  { %1145 = vmatpush1.bf16.msra.mxu0 %v654_v48  ;;  %v1421_v48 = vld [vmem:[#allocation3 + $0x6a8] sm:$0xff] }
 0x203   :  { %1146 = vmatprep.subr.bf16.mxu0 %v662_v54  ;;  %v1623_v54 = vunpack.c.h.s8.bf16 %v1413_v40 }
 0x204   :  { %v842_v62 = vpop.f32.mrb[0].mxu0  ;;  %v5657_v0 = vpop.f32.mrb[0].mxu1 }
 0x205   :  { %v1374_v1 = vmul.f32 %v1342_v56, %v842_v62  ;;  %v844_v2 = vpop.f32.mrb[1].mxu0  ;;  %v1008_v3 = vpop.f32.mrb[1].mxu1  ;;  %v1631_v56 = vunpack.c.l.s8.bf16 %v1421_v48  ;;  %v1638_v62 = vunpack.c.h.s8.bf16 %v1421_v48  ;;  %v1502_v48 = vld [vmem:[#allocation3 + $0x930] sm:$0xff] }
 0x206   :  { %v1375_v4 = vmul.f32 %v1346_v57, %v844_v2  ;;  %v1377_v5 = vmul.f32 %v1354_v50, %v1008_v3  ;;  %v846_v6 = vpop.f32.mrb[2].mxu0  ;;  %v1010_v7 = vpop.f32.mrb[2].mxu1  ;;  %1147 = vmatpush1.bf16.msra.mxu0 %v661_v58  ;;  %v1420_v57 = vld [vmem:[#allocation3 + $0x6a0] sm:$0xff]  ;;  %v1748_v50 = vunpack.c.h.s8.bf16 %v1475_v42  ;;  %v1482_v58 = vld [vmem:[#allocation3 + $0x890] sm:$0xff]  ;;  %v1481_v2 = vld [vmem:[#allocation3 + $0x888] sm:$0xff] }
 0x207   :  { %vm1381_vm1 = vcmp.ge.f32.partialorder %v1374_v1, 0.0  ;;  %v1389_v9 = vmul.f32 %v5655_v63, %v1374_v1  ;;  %v847_v11 = vpop.f32.mrb[3].mxu0  ;;  %v1011_v17 = vpop.f32.mrb[3].mxu1  ;;  %1148 = vmatprep.subr.bf16.mxu0 %v669_v59  ;;  %v1630_v59 = vunpack.c.l.s8.bf16 %v1420_v57  ;;  %v1428_v3 = vld [vmem:[#allocation3 + $0x6e0] sm:$0xff]  ;;  %v1427_v7 = vld [vmem:[#allocation3 + $0x6d8] sm:$0xff]  ;;  %v1761_v35 = vunpack.c.h.s8.bf16 %v1481_v2 }
 0x208   :  { %vm1382_vm2 = vcmp.ge.f32.partialorder %v1375_v4, 0.0  ;;  %v1390_v13 = vmul.f32 %v5655_v63, %v1375_v4  ;;  %vm1384_vm3 = vcmp.ge.f32.partialorder %v1377_v5, 0.0  ;;  %v1392_v14 = vmul.f32 %v5655_v63, %v1377_v5  ;;  %v1489_v11 = vld [vmem:[#allocation3 + $0x8c8] sm:$0xff] }
 0x209   :  { %v1396_v15 = vsel %vm1381_vm1, %v1374_v1, %v1389_v9  ;;  %v1755_v1 = vunpack.c.l.s8.bf16 %v1482_v58  ;;  %v1645_v6 = vunpack.c.l.s8.bf16 %v1428_v3  ;;  %v1776_v30 = vunpack.c.h.s8.bf16 %v1489_v11 }
 0x20a   :  { %v1397_v18 = vsel %vm1382_vm2, %v1375_v4, %v1390_v13  ;;  %v1399_v19 = vsel %vm1384_vm3, %v1377_v5, %v1392_v14  ;;  %1149 = vmatpush1.bf16.msra.mxu0 %v668_v8  ;;  %v5664_v24 = vpack.c.bf16 %v1396_v15, %v1396_v15  ;;  %v1637_v4 = vunpack.c.h.s8.bf16 %v1420_v57 }
 0x20b   :  { %v5662_v20 = vpack.c.bf16 %v1397_v18, %v1397_v18  ;;  %1150 = vmatprep.subr.bf16.mxu0 %v676_v12  ;;  %v5667_v29 = vpack.c.bf16 %v1399_v19, %v1399_v19  ;;  %v1754_v5 = vunpack.c.l.s8.bf16 %v1481_v2  ;;  %v1762_v8 = vunpack.c.h.s8.bf16 %v1482_v58  ;;  %v1488_v19 = vld [vmem:[#allocation3 + $0x8c0] sm:$0xff] }
 0x20c   :  { %v1644_v12 = vunpack.c.l.s8.bf16 %v1427_v7  ;;  %v1652_v15 = vunpack.c.h.s8.bf16 %v1428_v3  ;;  %v1769_v18 = vunpack.c.l.s8.bf16 %v1489_v11  ;;  %v1768_v23 = vunpack.c.l.s8.bf16 %v1488_v19  ;;  %v1448_v58 = vld [vmem:[#allocation3 + $0x780] sm:$0xff] }
 0x20d   :  { %2031 = vmatprep.mubr.bf16.mxu1 %v5662_v20  ;;  %v1796_v57 = vunpack.c.l.s8.bf16 %v1502_v48  ;;  %v1803_v2 = vunpack.c.h.s8.bf16 %v1502_v48 }
 0x20e   :  { %1151 = vmatpush1.bf16.msra.mxu0 %v675_v25  ;;  %2032 = vmatmul.mubr.bf16.vlgmr.msra.gmra.mrb[20].mxu1 %v5664_v24  ;;  %v1435_v25 = vld [vmem:[#allocation3 + $0x718] sm:$0xff] }
 0x20f   :  { %2041 = vmatpush1.bf16.msra.mxu1 %v1712_v22  ;;  %2072 = vmatprep.mubr.bf16.mxu1 %v5667_v29  ;;  %v1651_v22 = vunpack.c.h.s8.bf16 %v1427_v7 }
 0x210   :  { %2042 = vmatprep.subr.bf16.mxu1 %v1720_v26  ;;  %2163 = vmatprep.subr.bf16.mxu0 %v1603_v28  ;;  %v1659_v26 = vunpack.c.l.s8.bf16 %v1435_v25  ;;  %v1434_v28 = vld [vmem:[#allocation3 + $0x710] sm:$0xff] }
 0x211   :  { %1169 = vmatmul.mubr.bf16.vlgmr.msra.gmra.mrb[4].mxu0 %v5602_v53  ;;  %v1741_v53 = vunpack.c.l.s8.bf16 %v1475_v42 }
 0x212   :  { %2164 = vmatpush1.bf16.msra.mxu0 %v1602_v31  ;;  %2195 = vmatprep.mubr.bf16.mxu0 %v5662_v20  ;;  %v1496_v31 = vld [vmem:[#allocation3 + $0x900] sm:$0xff] }
 0x213   :  { %2043 = vmatpush1.bf16.msra.mxu1 %v1719_v32  ;;  %2165 = vmatprep.subr.bf16.mxu0 %v1610_v33  ;;  %v1658_v32 = vunpack.c.l.s8.bf16 %v1434_v28  ;;  %v1775_v33 = vunpack.c.h.s8.bf16 %v1488_v19  ;;  %v1783_v36 = vunpack.c.l.s8.bf16 %v1496_v31  ;;  %v1790_v42 = vunpack.c.h.s8.bf16 %v1496_v31  ;;  %v1516_v31 = vld [vmem:[#allocation3 + $0x9a0] sm:$0xff] }
 0x214   :  { %2044 = vmatprep.subr.bf16.mxu1 %v1727_v34  ;;  %v1666_v34 = vunpack.c.h.s8.bf16 %v1435_v25 }
 0x216   :  { %2166 = vmatpush1.bf16.msra.mxu0 %v1609_v37  ;;  %v1442_v37 = vld [vmem:[#allocation3 + $0x750] sm:$0xff] }
 0x217   :  { %2045 = vmatpush1.bf16.msra.mxu1 %v1726_v38  ;;  %2167 = vmatprep.subr.bf16.mxu0 %v1617_v39  ;;  %v1665_v38 = vunpack.c.h.s8.bf16 %v1434_v28  ;;  %v1782_v39 = vunpack.c.l.s8.bf16 %v1495_v27  ;;  %v1673_v40 = vunpack.c.l.s8.bf16 %v1442_v37 }
 0x218   :  { %2046 = vmatprep.subr.bf16.mxu1 %v1734_v41  ;;  %v1441_v41 = vld [vmem:[#allocation3 + $0x748] sm:$0xff] }
 0x21a   :  { %2168 = vmatpush1.bf16.msra.mxu0 %v1616_v44  ;;  %v1503_v44 = vld [vmem:[#allocation3 + $0x938] sm:$0xff] }
 0x21b   :  { %2047 = vmatpush1.bf16.msra.mxu1 %v1733_v46  ;;  %2169 = vmatprep.subr.bf16.mxu0 %v1624_v43  ;;  %v1672_v46 = vunpack.c.l.s8.bf16 %v1441_v41  ;;  %v1789_v43 = vunpack.c.h.s8.bf16 %v1495_v27  ;;  %v1797_v61 = vunpack.c.l.s8.bf16 %v1503_v44  ;;  %v1824_v27 = vunpack.c.l.s8.bf16 %v1516_v31 }
 0x21c   :  { %2048 = vmatprep.subr.bf16.mxu1 %v1741_v53  ;;  %v1680_v53 = vunpack.c.h.s8.bf16 %v1442_v37 }
 0x21e   :  { %2170 = vmatpush1.bf16.msra.mxu0 %v1623_v54  ;;  %v1449_v54 = vld [vmem:[#allocation3 + $0x788] sm:$0xff] }
 0x21f   :  { %2049 = vmatpush1.bf16.msra.mxu1 %v1740_v55  ;;  %2171 = vmatprep.subr.bf16.mxu0 %v1631_v56  ;;  %v5677_v55 = vsub.s32 2, %v5633_v45  ;;  %v1679_v56 = vunpack.c.h.s8.bf16 %v1441_v41  ;;  %v1694_v3 = vunpack.c.h.s8.bf16 %v1449_v54  ;;  %v1831_v41 = vunpack.c.h.s8.bf16 %v1516_v31 }
 0x220   :  { %2050 = vmatprep.subr.bf16.mxu1 %v1748_v50  ;;  %v1687_v50 = vunpack.c.l.s8.bf16 %v1449_v54 }
 0x222   :  { %2172 = vmatpush1.bf16.msra.mxu0 %v1630_v59  ;;  %v1804_v59 = vunpack.c.h.s8.bf16 %v1503_v44 }
 0x223   :  { %2051 = vmatpush1.bf16.msra.mxu1 %v1747_v60  ;;  %2173 = vmatprep.subr.bf16.mxu0 %v1638_v62  ;;  %v1350_v60 = vrot.slane %v5638_v49, %v5677_v55  ;;  %v1510_v62 = vld [vmem:[#allocation3 + $0x970] sm:$0xff] }
 0x224   :  { %2052 = vmatprep.subr.bf16.mxu1 %v1755_v1  ;;  %v4765_v9 = vpop.f32.mrb[4].mxu1  ;;  %v1686_v1 = vunpack.c.l.s8.bf16 %v1448_v58 }
 0x225   :  { %v4766_v17 = vpop.f32.mrb[5].mxu1  ;;  %v1376_v7 = vmul.f32 %v1350_v60, %v5657_v0 }
 0x226   :  { %2174 = vmatpush1.bf16.msra.mxu0 %v1637_v4  ;;  %v5674_v13 = vadd.f32 %v4766_v17, %v4765_v9  ;;  %v4768_v14 = vpop.f32.mrb[6].mxu1  ;;  %v1811_v4 = vunpack.c.l.s8.bf16 %v1510_v62  ;;  %v1455_v17 = vld [vmem:[#allocation3 + $0x7b8] sm:$0xff] }
 0x227   :  { %2053 = vmatpush1.bf16.msra.mxu1 %v1754_v5  ;;  %2175 = vmatprep.subr.bf16.mxu0 %v1645_v6  ;;  %v4769_v16 = vpop.f32.mrb[7].mxu1  ;;  %v1509_v5 = vld [vmem:[#allocation3 + $0x968] sm:$0xff]  ;;  %v1456_v6 = vld [vmem:[#allocation3 + $0x7c0] sm:$0xff]  ;;  %vm1383_vm4 = vcmp.ge.f32.partialorder %v1376_v7, 0.0 }
 0x228   :  { %2054 = vmatprep.subr.bf16.mxu1 %v1762_v8  ;;  %v1693_v8 = vunpack.c.h.s8.bf16 %v1448_v58  ;;  %v1810_v9 = vunpack.c.l.s8.bf16 %v1509_v5  ;;  %v1701_v11 = vunpack.c.l.s8.bf16 %v1456_v6  ;;  %v1517_v16 = vld [vmem:[#allocation3 + $0x9a8] sm:$0xff]  ;;  %v1817_v0 = vunpack.c.h.s8.bf16 %v1509_v5 }
 0x22a   :  { %2176 = vmatpush1.bf16.msra.mxu0 %v1644_v12  ;;  %v1818_v12 = vunpack.c.h.s8.bf16 %v1510_v62  ;;  %v1530_v62 = vld [vmem:[#allocation3 + $0xa10] sm:$0xff] }
 0x22b   :  { %2055 = vmatpush1.bf16.msra.mxu1 %v1761_v35  ;;  %2177 = vmatprep.subr.bf16.mxu0 %v1652_v15  ;;  %v1391_v35 = vmul.f32 %v5655_v63, %v1376_v7 }
 0x22c   :  { %2056 = vmatprep.subr.bf16.mxu1 %v1769_v18  ;;  %v1700_v18 = vunpack.c.l.s8.bf16 %v1455_v17 }
 0x22e   :  { %2178 = vmatpush1.bf16.msra.mxu0 %v1651_v22  ;;  %v1708_v22 = vunpack.c.h.s8.bf16 %v1456_v6  ;;  %v1538_v6 = vld [vmem:[#allocation3 + $0xa50] sm:$0xff] }
 0x22f   :  { %2057 = vmatpush1.bf16.msra.mxu1 %v1768_v23  ;;  %2179 = vmatprep.subr.bf16.mxu0 %v1659_v26  ;;  %v1463_v26 = vld [vmem:[#allocation3 + $0x7f8] sm:$0xff] }
 0x230   :  { %2058 = vmatprep.subr.bf16.mxu1 %v1776_v30  ;;  %v1825_v30 = vunpack.c.l.s8.bf16 %v1517_v16 }
 0x232   :  { %2180 = vmatpush1.bf16.msra.mxu0 %v1658_v32  ;;  %v1398_v32 = vsel %vm1383_vm4, %v1376_v7, %v1391_v35 }
 0x233   :  { %2059 = vmatpush1.bf16.msra.mxu1 %v1775_v33  ;;  %2181 = vmatprep.subr.bf16.mxu0 %v1666_v34  ;;  %v1707_v33 = vunpack.c.h.s8.bf16 %v1455_v17  ;;  %v1715_v34 = vunpack.c.l.s8.bf16 %v1463_v26  ;;  %v5686_v37 = vpack.c.bf16 %v1398_v32, %v1398_v32  ;;  %v1867_v17 = vunpack.c.l.s8.bf16 %v1538_v6 }
 0x234   :  { %2060 = vmatprep.subr.bf16.mxu1 %v1783_v36  ;;  %v1462_v36 = vld [vmem:[#allocation3 + $0x7f0] sm:$0xff] }
 0x236   :  { %2182 = vmatpush1.bf16.msra.mxu0 %v1665_v38  ;;  %v1832_v38 = vunpack.c.h.s8.bf16 %v1517_v16 }
 0x237   :  { %2061 = vmatpush1.bf16.msra.mxu1 %v1782_v39  ;;  %2183 = vmatprep.subr.bf16.mxu0 %v1673_v40  ;;  %v1524_v39 = vld [vmem:[#allocation3 + $0x9e0] sm:$0xff]  ;;  %v1722_v40 = vunpack.c.h.s8.bf16 %v1463_v26 }
 0x238   :  { %2062 = vmatprep.subr.bf16.mxu1 %v1790_v42  ;;  %v1470_v42 = vld [vmem:[#allocation3 + $0x830] sm:$0xff]  ;;  %v1839_v44 = vunpack.c.l.s8.bf16 %v1524_v39  ;;  %v1846_v54 = vunpack.c.h.s8.bf16 %v1524_v39 }
 0x23a   :  { %2184 = vmatpush1.bf16.msra.mxu0 %v1672_v46  ;;  %v1523_v46 = vld [vmem:[#allocation3 + $0x9d8] sm:$0xff] }
 0x23b   :  { %2063 = vmatpush1.bf16.msra.mxu1 %v1789_v43  ;;  %2185 = vmatprep.subr.bf16.mxu0 %v1680_v53  ;;  %v1721_v43 = vunpack.c.h.s8.bf16 %v1462_v36  ;;  %v1729_v53 = vunpack.c.l.s8.bf16 %v1470_v42  ;;  %v1838_v48 = vunpack.c.l.s8.bf16 %v1523_v46  ;;  %v1845_v58 = vunpack.c.h.s8.bf16 %v1523_v46 }
 0x23c   :  { %2064 = vmatprep.subr.bf16.mxu1 %v1797_v61  ;;  %v1469_v61 = vld [vmem:[#allocation3 + $0x828] sm:$0xff] }
 0x23e   :  { %2186 = vmatpush1.bf16.msra.mxu0 %v1679_v56  ;;  %v1531_v56 = vld [vmem:[#allocation3 + $0xa18] sm:$0xff] }
 0x23f   :  { %2065 = vmatpush1.bf16.msra.mxu1 %v1796_v57  ;;  %2187 = vmatprep.subr.bf16.mxu0 %v1687_v50  ;;  %v1728_v57 = vunpack.c.l.s8.bf16 %v1469_v61  ;;  %v1736_v50 = vunpack.c.h.s8.bf16 %v1470_v42  ;;  %v1853_v60 = vunpack.c.l.s8.bf16 %v1531_v56  ;;  %v1860_v5 = vunpack.c.h.s8.bf16 %v1531_v56  ;;  %v1552_v42 = vld [vmem:[#allocation3 + $0xac0] sm:$0xff]  ;;  %v1497_v56 = vld [vmem:[#allocation3 + $0x908] sm:$0xff] }
 0x240   :  { %2066 = vmatprep.subr.bf16.mxu1 %v1804_v59  ;;  %v1477_v59 = vld [vmem:[#allocation3 + $0x868] sm:$0xff] }
 0x242   :  { %2188 = vmatpush1.bf16.msra.mxu0 %v1686_v1  ;;  %v1735_v1 = vunpack.c.h.s8.bf16 %v1469_v61  ;;  %v1551_v61 = vld [vmem:[#allocation3 + $0xab8] sm:$0xff] }
 0x243   :  { %2067 = vmatpush1.bf16.msra.mxu1 %v1803_v2  ;;  %2189 = vmatprep.subr.bf16.mxu0 %v1694_v3  ;;  %v1743_v2 = vunpack.c.l.s8.bf16 %v1477_v59  ;;  %v1476_v3 = vld [vmem:[#allocation3 + $0x860] sm:$0xff] }
 0x244   :  { %2068 = vmatprep.subr.bf16.mxu1 %v1811_v4  ;;  %v4787_v14 = vpop.f32.mrb[8].mxu1  ;;  %v1852_v4 = vunpack.c.l.s8.bf16 %v1530_v62  ;;  %v1742_v7 = vunpack.c.l.s8.bf16 %v1476_v3 }
 0x245   :  { %v4788_v15 = vpop.f32.mrb[9].mxu1 }
 0x246   :  { %2190 = vmatpush1.bf16.msra.mxu0 %v1693_v8  ;;  %v4789_v19 = vadd.f32 %v4788_v15, %v4787_v14  ;;  %v4790_v25 = vpop.f32.mrb[10].mxu1  ;;  %v1750_v8 = vunpack.c.h.s8.bf16 %v1477_v59  ;;  %v1749_v14 = vunpack.c.h.s8.bf16 %v1476_v3  ;;  %v1483_v15 = vld [vmem:[#allocation3 + $0x898] sm:$0xff]  ;;  %v1784_v59 = vunpack.c.l.s8.bf16 %v1497_v56  ;;  %v1558_v3 = vld [vmem:[#allocation3 + $0xaf0] sm:$0xff] }
 0x247   :  { %2069 = vmatpush1.bf16.msra.mxu1 %v1810_v9  ;;  %2191 = vmatprep.subr.bf16.mxu0 %v1701_v11  ;;  %v4791_v23 = vpop.f32.mrb[11].mxu1  ;;  %v1859_v9 = vunpack.c.h.s8.bf16 %v1530_v62  ;;  %v1484_v11 = vld [vmem:[#allocation3 + $0x8a0] sm:$0xff]  ;;  %v1901_v62 = vunpack.c.h.s8.bf16 %v1551_v61 }
 0x248   :  { %2070 = vmatprep.subr.bf16.mxu1 %v1818_v12  ;;  %v5684_v28 = vadd.f32 %v4789_v19, %v5674_v13  ;;  %v1714_v13 = vunpack.c.l.s8.bf16 %v1462_v36  ;;  %v1537_v12 = vld [vmem:[#allocation3 + $0xa48] sm:$0xff]  ;;  %v1757_v35 = vunpack.c.l.s8.bf16 %v1484_v11  ;;  %v1874_v19 = vunpack.c.h.s8.bf16 %v1538_v6  ;;  %v1504_v6 = vld [vmem:[#allocation3 + $0x940] sm:$0xff] }
 0x249   :  { %v1866_v16 = vunpack.c.l.s8.bf16 %v1537_v12  ;;  %v1873_v32 = vunpack.c.h.s8.bf16 %v1537_v12  ;;  %v1915_v12 = vunpack.c.h.s8.bf16 %v1558_v3 }
 0x24a   :  { %2192 = vmatpush1.bf16.msra.mxu0 %v1700_v18 }
 0x24b   :  { %2071 = vmatpush1.bf16.msra.mxu1 %v1817_v0  ;;  %2193 = vmatprep.subr.bf16.mxu0 %v1708_v22  ;;  %v1545_v0 = vld [vmem:[#allocation3 + $0xa88] sm:$0xff]  ;;  %v1756_v22 = vunpack.c.l.s8.bf16 %v1483_v15 }
 0x24c   :  { %2081 = vmatprep.subr.bf16.mxu1 %v1825_v30  ;;  %v1764_v30 = vunpack.c.h.s8.bf16 %v1484_v11  ;;  %v1881_v36 = vunpack.c.l.s8.bf16 %v1545_v0  ;;  %v1798_v11 = vunpack.c.l.s8.bf16 %v1504_v6 }
 0x24e   :  { %2073 = vmatmul.mubr.bf16.vlgmr.msra.gmra.mrb[20].mxu1 %v5686_v37  ;;  %2194 = vmatpush1.bf16.msra.mxu0 %v1707_v33  ;;  %v1491_v33 = vld [vmem:[#allocation3 + $0x8d8] sm:$0xff] }
 0x24f   :  { %2204 = vmatprep.subr.bf16.mxu0 %v1715_v34  ;;  %2082 = vmatpush1.bf16.msra.mxu1 %v1824_v27  ;;  %v1544_v27 = vld [vmem:[#allocation3 + $0xa80] sm:$0xff]  ;;  %v1771_v39 = vunpack.c.l.s8.bf16 %v1491_v33  ;;  %v1778_v46 = vunpack.c.h.s8.bf16 %v1491_v33 }
 0x250   :  { %2083 = vmatprep.subr.bf16.mxu1 %v1832_v38  ;;  %v1763_v38 = vunpack.c.h.s8.bf16 %v1483_v15  ;;  %v1565_v15 = vld [vmem:[#allocation3 + $0xb28] sm:$0xff] }
 0x251   :  { %2196 = vmatmul.mubr.bf16.vlgmr.msra.gmra.mrb[8].mxu0 %v5664_v24 }
 0x252   :  { %2205 = vmatpush1.bf16.msra.mxu0 %v1714_v13  ;;  %2236 = vmatprep.mubr.bf16.mxu0 %v5667_v29  ;;  %v1490_v13 = vld [vmem:[#allocation3 + $0x8d0] sm:$0xff] }
 0x253   :  { %2206 = vmatprep.subr.bf16.mxu0 %v1722_v40  ;;  %2084 = vmatpush1.bf16.msra.mxu1 %v1831_v41  ;;  %v1880_v40 = vunpack.c.l.s8.bf16 %v1544_v27  ;;  %v1888_v41 = vunpack.c.h.s8.bf16 %v1545_v0 }
 0x254   :  { %2085 = vmatprep.subr.bf16.mxu1 %v1839_v44  ;;  %v1770_v44 = vunpack.c.l.s8.bf16 %v1490_v13 }
 0x256   :  { %2207 = vmatpush1.bf16.msra.mxu0 %v1721_v43  ;;  %v1498_v43 = vld [vmem:[#allocation3 + $0x910] sm:$0xff] }
 0x257   :  { %2208 = vmatprep.subr.bf16.mxu0 %v1729_v53  ;;  %2086 = vmatpush1.bf16.msra.mxu1 %v1838_v48  ;;  %v1895_v53 = vunpack.c.l.s8.bf16 %v1552_v42  ;;  %v1777_v48 = vunpack.c.h.s8.bf16 %v1490_v13 }
 0x258   :  { %2087 = vmatprep.subr.bf16.mxu1 %v1846_v54  ;;  %v1785_v54 = vunpack.c.l.s8.bf16 %v1498_v43 }
 0x25a   :  { %2209 = vmatpush1.bf16.msra.mxu0 %v1728_v57  ;;  %v1894_v57 = vunpack.c.l.s8.bf16 %v1551_v61 }
 0x25b   :  { %2210 = vmatprep.subr.bf16.mxu0 %v1736_v50  ;;  %2088 = vmatpush1.bf16.msra.mxu1 %v1845_v58  ;;  %v1902_v50 = vunpack.c.h.s8.bf16 %v1552_v42  ;;  %v1559_v58 = vld [vmem:[#allocation3 + $0xaf8] sm:$0xff] }
 0x25c   :  { %2089 = vmatprep.subr.bf16.mxu1 %v1853_v60  ;;  %v1792_v60 = vunpack.c.h.s8.bf16 %v1498_v43  ;;  %v1525_v43 = vld [vmem:[#allocation3 + $0x9e8] sm:$0xff] }
 0x25e   :  { %2211 = vmatpush1.bf16.msra.mxu0 %v1735_v1  ;;  %v1505_v1 = vld [vmem:[#allocation3 + $0x948] sm:$0xff] }
 0x25f   :  { %2212 = vmatprep.subr.bf16.mxu0 %v1743_v2  ;;  %2090 = vmatpush1.bf16.msra.mxu1 %v1852_v4  ;;  %v1909_v2 = vunpack.c.l.s8.bf16 %v1559_v58  ;;  %v1791_v4 = vunpack.c.h.s8.bf16 %v1497_v56 }
 0x260   :  { %2091 = vmatprep.subr.bf16.mxu1 %v1860_v5  ;;  %v1799_v5 = vunpack.c.l.s8.bf16 %v1505_v1 }
 0x262   :  { %2213 = vmatpush1.bf16.msra.mxu0 %v1742_v7  ;;  %v1908_v7 = vunpack.c.l.s8.bf16 %v1558_v3 }
 0x263   :  { %2214 = vmatprep.subr.bf16.mxu0 %v1750_v8  ;;  %2092 = vmatpush1.bf16.msra.mxu1 %v1859_v9  ;;  %v1916_v8 = vunpack.c.h.s8.bf16 %v1559_v58  ;;  %v1566_v9 = vld [vmem:[#allocation3 + $0xb30] sm:$0xff] }
 0x264   :  { %v4809_v18 = vpop.f32.mrb[12].mxu1  ;;  %2093 = vmatprep.subr.bf16.mxu1 %v1867_v17  ;;  %v1806_v17 = vunpack.c.h.s8.bf16 %v1505_v1  ;;  %v1539_v1 = vld [vmem:[#allocation3 + $0xa58] sm:$0xff] }
 0x265   :  { %v4810_v25 = vpop.f32.mrb[13].mxu1 }
 0x266   :  { %2215 = vmatpush1.bf16.msra.mxu0 %v1749_v14  ;;  %v4811_v23 = vadd.f32 %v4810_v25, %v4809_v18  ;;  %v4812_v26 = vpop.f32.mrb[14].mxu1  ;;  %v1512_v14 = vld [vmem:[#allocation3 + $0x980] sm:$0xff]  ;;  %v1922_v25 = vunpack.c.l.s8.bf16 %v1565_v15 }
 0x267   :  { %2216 = vmatprep.subr.bf16.mxu0 %v1757_v35  ;;  %v4813_v31 = vpop.f32.mrb[15].mxu1  ;;  %2094 = vmatpush1.bf16.msra.mxu1 %v1866_v16  ;;  %v1923_v35 = vunpack.c.l.s8.bf16 %v1566_v9  ;;  %v1805_v16 = vunpack.c.h.s8.bf16 %v1504_v6  ;;  %v1813_v18 = vunpack.c.l.s8.bf16 %v1512_v14  ;;  %v5697_v26 = vld [vmem:[#allocation3 + $0xb68] sm:$0xff]  ;;  %v1820_v33 = vunpack.c.h.s8.bf16 %v1512_v14 }
 0x268   :  { %v5692_v34 = vadd.f32 %v4811_v23, %v5684_v28  ;;  %2095 = vmatprep.subr.bf16.mxu1 %v1874_v19  ;;  %v1887_v28 = vunpack.c.h.s8.bf16 %v1544_v27  ;;  %v1511_v19 = vld [vmem:[#allocation3 + $0x978] sm:$0xff]  ;;  %v1553_v14 = vld [vmem:[#allocation3 + $0xac8] sm:$0xff] }
 0x269   :  { %v1812_v31 = vunpack.c.l.s8.bf16 %v1511_v19  ;;  %v1819_v13 = vunpack.c.h.s8.bf16 %v1511_v19 }
 0x26a   :  { %2217 = vmatpush1.bf16.msra.mxu0 %v1756_v22  ;;  %v1930_v22 = vunpack.c.h.s8.bf16 %v1566_v9 }
 0x26b   :  { %2218 = vmatprep.subr.bf16.mxu0 %v1764_v30  ;;  %2096 = vmatpush1.bf16.msra.mxu1 %v1873_v32 }
 0x26c   :  { %2097 = vmatprep.subr.bf16.mxu1 %v1881_v36  ;;  %v1929_v36 = vunpack.c.h.s8.bf16 %v1565_v15 }
 0x26e   :  { %2219 = vmatpush1.bf16.msra.mxu0 %v1763_v38  ;;  %v1519_v38 = vld [vmem:[#allocation3 + $0x9b8] sm:$0xff] }
 0x26f   :  { %2220 = vmatprep.subr.bf16.mxu0 %v1771_v39  ;;  %2098 = vmatpush1.bf16.msra.mxu1 %v1880_v40  ;;  %v1937_v39 = vunpack.c.l.s8.bf16 %v5697_v26  ;;  %v1518_v40 = vld [vmem:[#allocation3 + $0x9b0] sm:$0xff]  ;;  %v1834_v42 = vunpack.c.h.s8.bf16 %v1519_v38 }
 0x270   :  { %2099 = vmatprep.subr.bf16.mxu1 %v1888_v41  ;;  %v1826_v41 = vunpack.c.l.s8.bf16 %v1518_v40 }
 0x272   :  { %2221 = vmatpush1.bf16.msra.mxu0 %v1770_v44  ;;  %v1526_v44 = vld [vmem:[#allocation3 + $0x9f0] sm:$0xff] }
 0x273   :  { %2222 = vmatprep.subr.bf16.mxu0 %v1778_v46  ;;  %2100 = vmatpush1.bf16.msra.mxu1 %v1887_v28  ;;  %v1833_v46 = vunpack.c.h.s8.bf16 %v1518_v40  ;;  %v1841_v28 = vunpack.c.l.s8.bf16 %v1526_v44  ;;  %v1848_v61 = vunpack.c.h.s8.bf16 %v1526_v44  ;;  %v5705_v40 = vsub.s32 5, %v5633_v45 }
 0x274   :  { %2101 = vmatprep.subr.bf16.mxu1 %v1895_v53  ;;  %v1840_v53 = vunpack.c.l.s8.bf16 %v1525_v43 }
 0x276   :  { %2223 = vmatpush1.bf16.msra.mxu0 %v1777_v48  ;;  %v1533_v48 = vld [vmem:[#allocation3 + $0xa28] sm:$0xff] }
 0x277   :  { %2224 = vmatprep.subr.bf16.mxu0 %v1785_v54  ;;  %2102 = vmatpush1.bf16.msra.mxu1 %v1894_v57  ;;  %v1847_v54 = vunpack.c.h.s8.bf16 %v1525_v43  ;;  %v1855_v56 = vunpack.c.l.s8.bf16 %v1533_v48  ;;  %v1532_v57 = vld [vmem:[#allocation3 + $0xa20] sm:$0xff]  ;;  %v1862_v58 = vunpack.c.h.s8.bf16 %v1533_v48 }
 0x278   :  { %2103 = vmatprep.subr.bf16.mxu1 %v1902_v50  ;;  %v1854_v50 = vunpack.c.l.s8.bf16 %v1532_v57 }
 0x27a   :  { %2225 = vmatpush1.bf16.msra.mxu0 %v1784_v59  ;;  %v1540_v59 = vld [vmem:[#allocation3 + $0xa60] sm:$0xff] }
 0x27b   :  { %2226 = vmatprep.subr.bf16.mxu0 %v1792_v60  ;;  %2104 = vmatpush1.bf16.msra.mxu1 %v1901_v62  ;;  %v1861_v60 = vunpack.c.h.s8.bf16 %v1532_v57  ;;  %v1869_v62 = vunpack.c.l.s8.bf16 %v1540_v59  ;;  %v1876_v3 = vunpack.c.h.s8.bf16 %v1540_v59  ;;  %v1574_v57 = vld [vmem:[#allocation3 + $0xb70] sm:$0xff] }
 0x27c   :  { %2105 = vmatprep.subr.bf16.mxu1 %v1909_v2  ;;  %v1868_v2 = vunpack.c.l.s8.bf16 %v1539_v1 }
 0x27e   :  { %2227 = vmatpush1.bf16.msra.mxu0 %v1791_v4  ;;  %v1547_v4 = vld [vmem:[#allocation3 + $0xa98] sm:$0xff] }
 0x27f   :  { %2228 = vmatprep.subr.bf16.mxu0 %v1799_v5  ;;  %2106 = vmatpush1.bf16.msra.mxu1 %v1908_v7  ;;  %v1875_v5 = vunpack.c.h.s8.bf16 %v1539_v1  ;;  %v1883_v6 = vunpack.c.l.s8.bf16 %v1547_v4  ;;  %v1546_v7 = vld [vmem:[#allocation3 + $0xa90] sm:$0xff]  ;;  %v1890_v9 = vunpack.c.h.s8.bf16 %v1547_v4  ;;  %v1944_v1 = vunpack.c.h.s8.bf16 %v5697_v26  ;;  %v1579_v26 = vld [vmem:[#allocation3 + $0xb98] sm:$0xff] }
 0x280   :  { %2107 = vmatprep.subr.bf16.mxu1 %v1916_v8  ;;  %v1882_v8 = vunpack.c.l.s8.bf16 %v1546_v7  ;;  %v1582_v4 = vld [vmem:[#allocation3 + $0xbb0] sm:$0xff] }
 0x282   :  { %2229 = vmatpush1.bf16.msra.mxu0 %v1798_v11  ;;  %v1554_v11 = vld [vmem:[#allocation3 + $0xad0] sm:$0xff] }
 0x283   :  { %2230 = vmatprep.subr.bf16.mxu0 %v1806_v17  ;;  %2108 = vmatpush1.bf16.msra.mxu1 %v1915_v12  ;;  %v1889_v17 = vunpack.c.h.s8.bf16 %v1546_v7  ;;  %v1897_v12 = vunpack.c.l.s8.bf16 %v1554_v11  ;;  %v1904_v15 = vunpack.c.h.s8.bf16 %v1554_v11  ;;  %v1950_v11 = vunpack.c.l.s8.bf16 %v1579_v26 }
 0x284   :  { %v1331_v0 = vpop.f32.mrb[16].mxu1  ;;  %2109 = vmatprep.subr.bf16.mxu1 %v1923_v35  ;;  %v1896_v35 = vunpack.c.l.s8.bf16 %v1553_v14 }
 0x285   :  { %v5695_v23 = vadd.f32 %v1331_v0, %v5692_v34  ;;  %v5067_v30 = vpop.f32.mrb[17].mxu1  ;;  %v1827_v34 = vunpack.c.l.s8.bf16 %v1519_v38  ;;  %v1575_v38 = vld [vmem:[#allocation3 + $0xb78] sm:$0xff] }
 0x286   :  { %2231 = vmatpush1.bf16.msra.mxu0 %v1805_v16  ;;  %v1334_v32 = vpop.f32.mrb[18].mxu1  ;;  %v1561_v16 = vld [vmem:[#allocation3 + $0xb08] sm:$0xff]  ;;  %v1568_v30 = vld [vmem:[#allocation3 + $0xb40] sm:$0xff] }
 0x287   :  { %2232 = vmatprep.subr.bf16.mxu0 %v1813_v18  ;;  %2110 = vmatpush1.bf16.msra.mxu1 %v1922_v25  ;;  %v5068_v27 = vpop.f32.mrb[19].mxu1  ;;  %v1903_v18 = vunpack.c.h.s8.bf16 %v1553_v14  ;;  %v1911_v19 = vunpack.c.l.s8.bf16 %v1561_v16  ;;  %v1560_v25 = vld [vmem:[#allocation3 + $0xb00] sm:$0xff]  ;;  %v1925_v32 = vunpack.c.l.s8.bf16 %v1568_v30  ;;  %v1960_v14 = vunpack.c.h.s8.bf16 %v1582_v4 }
 0x288   :  { %2111 = vmatprep.subr.bf16.mxu1 %v1930_v22  ;;  %v1910_v0 = vunpack.c.l.s8.bf16 %v1560_v25  ;;  %v1918_v22 = vunpack.c.h.s8.bf16 %v1561_v16  ;;  %v1932_v27 = vunpack.c.h.s8.bf16 %v1568_v30  ;;  %v1957_v16 = vunpack.c.h.s8.bf16 %v1579_v26  ;;  %v1416_v26 = vld [vmem:[#allocation3 + $0x680] sm:$0xff] }
 0x289   :  { %v5725_v30 = vsub.s32 6, %v5633_v45 }
 0x28a   :  { %2233 = vmatpush1.bf16.msra.mxu0 %v1812_v31  ;;  %v1917_v31 = vunpack.c.h.s8.bf16 %v1560_v25 }
 0x28b   :  { %2234 = vmatprep.subr.bf16.mxu0 %v1820_v33  ;;  %2112 = vmatpush1.bf16.msra.mxu1 %v1929_v36  ;;  %v1567_v33 = vld [vmem:[#allocation3 + $0xb38] sm:$0xff] }
 0x28c   :  { %2122 = vmatprep.subr.bf16.mxu1 %v1937_v39  ;;  %v1924_v36 = vunpack.c.l.s8.bf16 %v1567_v33  ;;  %v1931_v39 = vunpack.c.h.s8.bf16 %v1567_v33 }
 0x28e   :  { %2235 = vmatpush1.bf16.msra.mxu0 %v1819_v13  ;;  %v1939_v13 = vunpack.c.l.s8.bf16 %v1575_v38 }
 0x28f   :  { %2245 = vmatprep.subr.bf16.mxu0 %v1827_v34  ;;  %v5702_v34 = vsub.s32 4, %v5633_v45 }
 0x291   :  { %2237 = vmatmul.mubr.bf16.vlgmr.msra.gmra.mrb[8].mxu0 %v5686_v37 }
 0x292   :  { %2246 = vmatpush1.bf16.msra.mxu0 %v1826_v41  ;;  %v1358_v41 = vrot.slane %v5638_v49, %v5702_v34 }
 0x293   :  { %2247 = vmatprep.subr.bf16.mxu0 %v1834_v42  ;;  %v1362_v42 = vrot.slane %v5638_v49, %v5705_v40  ;;  %v1938_v49 = vunpack.c.l.s8.bf16 %v1574_v57 }
 0x296   :  { %2248 = vmatpush1.bf16.msra.mxu0 %v1833_v46 }
 0x297   :  { %2249 = vmatprep.subr.bf16.mxu0 %v1841_v28 }
 0x29a   :  { %2250 = vmatpush1.bf16.msra.mxu0 %v1840_v53 }
 0x29b   :  { %2251 = vmatprep.subr.bf16.mxu0 %v1848_v61 }
 0x29e   :  { %2252 = vmatpush1.bf16.msra.mxu0 %v1847_v54 }
 0x29f   :  { %2253 = vmatprep.subr.bf16.mxu0 %v1855_v56  ;;  %v1572_v56 = vld [vmem:[#allocation3 + $0xb60] sm:$0xff] }
 0x2a2   :  { %2254 = vmatpush1.bf16.msra.mxu0 %v1854_v50 }
 0x2a3   :  { %2255 = vmatprep.subr.bf16.mxu0 %v1862_v58 }
 0x2a6   :  { %2256 = vmatpush1.bf16.msra.mxu0 %v1861_v60  ;;  %v1936_v60 = vunpack.c.l.s8.bf16 %v1572_v56 }
 0x2a7   :  { %2257 = vmatprep.subr.bf16.mxu0 %v1869_v62 }
 0x2aa   :  { %2258 = vmatpush1.bf16.msra.mxu0 %v1868_v2  ;;  %v1946_v2 = vunpack.c.h.s8.bf16 %v1575_v38 }
 0x2ab   :  { %2259 = vmatprep.subr.bf16.mxu0 %v1876_v3  ;;  %v1580_v3 = vld [vmem:[#allocation3 + $0xba0] sm:$0xff] }
 0x2ac   :  { %v1951_v7 = vunpack.c.l.s8.bf16 %v1580_v3 }
 0x2ae   :  { %2260 = vmatpush1.bf16.msra.mxu0 %v1875_v5  ;;  %v1943_v5 = vunpack.c.h.s8.bf16 %v1572_v56 }
 0x2af   :  { %2261 = vmatprep.subr.bf16.mxu0 %v1883_v6  ;;  %v1945_v6 = vunpack.c.h.s8.bf16 %v1574_v57  ;;  %v1409_v57 = vld [vmem:[#allocation3 + $0x648] sm:$0xff] }
 0x2b2   :  { %2262 = vmatpush1.bf16.msra.mxu0 %v1882_v8  ;;  %v1953_v8 = vunpack.c.l.s8.bf16 %v1582_v4 }
 0x2b3   :  { %2263 = vmatprep.subr.bf16.mxu0 %v1890_v9  ;;  %v1581_v9 = vld [vmem:[#allocation3 + $0xba8] sm:$0xff] }
 0x2b6   :  { %2264 = vmatpush1.bf16.msra.mxu0 %v1889_v17  ;;  %v1952_v17 = vunpack.c.l.s8.bf16 %v1581_v9 }
 0x2b7   :  { %2265 = vmatprep.subr.bf16.mxu0 %v1897_v12  ;;  %v1958_v12 = vunpack.c.h.s8.bf16 %v1580_v3  ;;  %v1410_v3 = vld [vmem:[#allocation3 + $0x650] sm:$0xff] }
 0x2ba   :  { %2266 = vmatpush1.bf16.msra.mxu0 %v1896_v35  ;;  %v1587_v35 = vld [vmem:[#allocation3 + $0xbd8] sm:$0xff] }
 0x2bb   :  { %2267 = vmatprep.subr.bf16.mxu0 %v1904_v15  ;;  %v1589_v15 = vld [vmem:[#allocation3 + $0xbe8] sm:$0xff]  ;;  %v1972_v33 = vunpack.c.h.s8.bf16 %v1587_v35 }
 0x2bc   :  { %v1967_v25 = vunpack.c.l.s8.bf16 %v1589_v15 }
 0x2be   :  { %2268 = vmatpush1.bf16.msra.mxu0 %v1903_v18  ;;  %v1959_v18 = vunpack.c.h.s8.bf16 %v1581_v9  ;;  %v1445_v9 = vld [vmem:[#allocation3 + $0x768] sm:$0xff] }
 0x2bf   :  { %2269 = vmatprep.subr.bf16.mxu0 %v1911_v19  ;;  %v1965_v19 = vunpack.c.l.s8.bf16 %v1587_v35  ;;  %v1676_v35 = vunpack.c.l.s8.bf16 %v1445_v9 }
 0x2c2   :  { %2270 = vmatpush1.bf16.msra.mxu0 %v1910_v0  ;;  %v1586_v0 = vld [vmem:[#allocation3 + $0xbd0] sm:$0xff] }
 0x2c3   :  { %2271 = vmatprep.subr.bf16.mxu0 %v1918_v22  ;;  %v1588_v22 = vld [vmem:[#allocation3 + $0xbe0] sm:$0xff] }
 0x2c6   :  { %2272 = vmatpush1.bf16.msra.mxu0 %v1917_v31  ;;  %v1964_v31 = vunpack.c.l.s8.bf16 %v1586_v0 }
 0x2c7   :  { %2273 = vmatprep.subr.bf16.mxu0 %v1925_v32  ;;  %v1966_v32 = vunpack.c.l.s8.bf16 %v1588_v22 }
 0x2ca   :  { %2274 = vmatpush1.bf16.msra.mxu0 %v1924_v36  ;;  %v1974_v36 = vunpack.c.h.s8.bf16 %v1589_v15  ;;  %v1417_v15 = vld [vmem:[#allocation3 + $0x688] sm:$0xff] }
 0x2cb   :  { %2275 = vmatprep.subr.bf16.mxu0 %v1932_v27  ;;  %v5308_v27 = vld [vmem:[#allocation6] sm:$0xff] }
 0x2cc   :  { %v1366_v38 = vrot.slane %v5308_v27, %v5725_v30  ;;  %v1424_v27 = vld [vmem:[#allocation3 + $0x6c0] sm:$0xff] }
 0x2ce   :  { %2276 = vmatpush1.bf16.msra.mxu0 %v1931_v39  ;;  %v1594_v39 = vld [vmem:[#allocation3 + $0xc10] sm:$0xff] }
 0x2cf   :  { %2286 = vmatprep.subr.bf16.mxu0 %v1939_v13  ;;  %v1596_v13 = vld [vmem:[#allocation3 + $0xc20] sm:$0xff]  ;;  %v1979_v45 = vunpack.c.l.s8.bf16 %v1594_v39 }
 0x2e4   :  { %v1170_v44 = vpop.f32.mrb[4].mxu0 }
 0x2e5   :  { %v1378_v46 = vmul.f32 %v1358_v41, %v1170_v44  ;;  %v1172_v28 = vpop.f32.mrb[5].mxu0  ;;  %v1971_v41 = vunpack.c.h.s8.bf16 %v1586_v0  ;;  %v1981_v44 = vunpack.c.l.s8.bf16 %v1596_v13  ;;  %v1423_v0 = vld [vmem:[#allocation3 + $0x6b8] sm:$0xff] }
 0x2e6   :  { %v1379_v43 = vmul.f32 %v1362_v42, %v1172_v28  ;;  %v1174_v53 = vpop.f32.mrb[6].mxu0  ;;  %v1973_v42 = vunpack.c.h.s8.bf16 %v1588_v22  ;;  %v1595_v28 = vld [vmem:[#allocation3 + $0xc18] sm:$0xff]  ;;  %v1452_v22 = vld [vmem:[#allocation3 + $0x7a0] sm:$0xff] }
 0x2e7   :  { %vm1385_vm5 = vcmp.ge.f32.partialorder %v1378_v46, 0.0  ;;  %v1393_v61 = vmul.f32 %v5655_v63, %v1378_v46  ;;  %v1175_v48 = vpop.f32.mrb[7].mxu0 }
 0x2e8   :  { %vm1386_vm6 = vcmp.ge.f32.partialorder %v1379_v43, 0.0  ;;  %v1394_v54 = vmul.f32 %v5655_v63, %v1379_v43  ;;  %v1986_v48 = vunpack.c.h.s8.bf16 %v1594_v39  ;;  %v1634_v39 = vunpack.c.l.s8.bf16 %v1424_v27 }
 0x2e9   :  { %v1400_v50 = vsel %vm1385_vm5, %v1378_v46, %v1393_v61  ;;  %v1593_v46 = vld [vmem:[#allocation3 + $0xc08] sm:$0xff]  ;;  %v1980_v61 = vunpack.c.l.s8.bf16 %v1595_v28 }
 0x2ea   :  { %v1401_v58 = vsel %vm1386_vm6, %v1379_v43, %v1394_v54  ;;  %v5715_v62 = vpack.c.bf16 %v1400_v50, %v1400_v50  ;;  %v1380_v43 = vmul.f32 %v1366_v38, %v5695_v23  ;;  %v1978_v53 = vunpack.c.l.s8.bf16 %v1593_v46  ;;  %v1438_v50 = vld [vmem:[#allocation3 + $0x730] sm:$0xff] }
 0x2eb   :  { %v5713_v59 = vpack.c.bf16 %v1401_v58, %v1401_v58  ;;  %v1988_v54 = vunpack.c.h.s8.bf16 %v1596_v13  ;;  %v1985_v58 = vunpack.c.h.s8.bf16 %v1593_v46  ;;  %v1605_v23 = vunpack.c.l.s8.bf16 %v1409_v57 }
 0x2ec   :  { %v1395_v56 = vmul.f32 %v5655_v63, %v1380_v43  ;;  %vm1387_vm7 = vcmp.ge.f32.partialorder %v1380_v43, 0.0  ;;  %v1640_v13 = vunpack.c.h.s8.bf16 %v1423_v0  ;;  %v1641_v46 = vunpack.c.h.s8.bf16 %v1424_v27  ;;  %v1480_v27 = vld [vmem:[#allocation3 + $0x880] sm:$0xff] }
 0x2ed   :  { %2113 = vmatprep.mubr.bf16.mxu1 %v5713_v59  ;;  %2277 = vmatprep.mubr.bf16.mxu0 %v5713_v59 }
 0x2ee   :  { %2114 = vmatmul.mubr.bf16.vlgmr.msra.gmra.mrb[20].mxu1 %v5715_v62  ;;  %2278 = vmatmul.mubr.bf16.vlgmr.msra.gmra.mrb[8].mxu0 %v5715_v62 }
 0x2ef   :  { %2123 = vmatpush1.bf16.msra.mxu1 %v1936_v60  ;;  %2287 = vmatpush1.bf16.msra.mxu0 %v1938_v49  ;;  %v1987_v60 = vunpack.c.h.s8.bf16 %v1595_v28  ;;  %v1662_v49 = vunpack.c.l.s8.bf16 %v1438_v50 }
 0x2f0   :  { %2124 = vmatprep.subr.bf16.mxu1 %v1944_v1  ;;  %2288 = vmatprep.subr.bf16.mxu0 %v1946_v2  ;;  %v1408_v1 = vld [vmem:[#allocation3 + $0x640] sm:$0xff]  ;;  %v1402_v2 = vsel %vm1387_vm7, %v1380_v43, %v1395_v56  ;;  %v1429_v43 = vld [vmem:[#allocation3 + $0x6e8] sm:$0xff] }
 0x2f1   :  { %2154 = vmatprep.mubr.bf16.mxu1 %v5462_v10  ;;  %2318 = vmatprep.mubr.bf16.mxu0 %v5462_v10  ;;  %v1604_v4 = vunpack.c.l.s8.bf16 %v1408_v1 }
 0x2f3   :  { %2125 = vmatpush1.bf16.msra.mxu1 %v1943_v5  ;;  %2289 = vmatpush1.bf16.msra.mxu0 %v1945_v6  ;;  %v5730_v5 = vpack.c.bf16 %v1402_v2, %v1402_v2  ;;  %v1606_v6 = vunpack.c.l.s8.bf16 %v1410_v3 }
 0x2f4   :  { %2126 = vmatprep.subr.bf16.mxu1 %v1951_v7  ;;  %2290 = vmatprep.subr.bf16.mxu0 %v1953_v8  ;;  %v1612_v7 = vunpack.c.h.s8.bf16 %v1409_v57  ;;  %v1669_v8 = vunpack.c.h.s8.bf16 %v1438_v50  ;;  %v1437_v50 = vld [vmem:[#allocation3 + $0x728] sm:$0xff] }
 0x2f7   :  { %2127 = vmatpush1.bf16.msra.mxu1 %v1950_v11  ;;  %2291 = vmatpush1.bf16.msra.mxu0 %v1952_v17  ;;  %v1611_v11 = vunpack.c.h.s8.bf16 %v1408_v1  ;;  %v1613_v17 = vunpack.c.h.s8.bf16 %v1410_v3  ;;  %v1436_v1 = vld [vmem:[#allocation3 + $0x720] sm:$0xff]  ;;  %v1466_v3 = vld [vmem:[#allocation3 + $0x810] sm:$0xff] }
 0x2f8   :  { %2128 = vmatprep.subr.bf16.mxu1 %v1958_v12  ;;  %2292 = vmatprep.subr.bf16.mxu0 %v1960_v14  ;;  %v1619_v12 = vunpack.c.l.s8.bf16 %v1416_v26  ;;  %v1415_v14 = vld [vmem:[#allocation3 + $0x678] sm:$0xff] }
 0x2fb   :  { %2129 = vmatpush1.bf16.msra.mxu1 %v1957_v16  ;;  %2293 = vmatpush1.bf16.msra.mxu0 %v1959_v18  ;;  %v1618_v16 = vunpack.c.l.s8.bf16 %v1415_v14  ;;  %v1620_v18 = vunpack.c.l.s8.bf16 %v1417_v15 }
 0x2fc   :  { %2130 = vmatprep.subr.bf16.mxu1 %v1965_v19  ;;  %2294 = vmatprep.subr.bf16.mxu0 %v1967_v25  ;;  %v1626_v19 = vunpack.c.h.s8.bf16 %v1416_v26  ;;  %v1683_v25 = vunpack.c.h.s8.bf16 %v1445_v9  ;;  %v1444_v26 = vld [vmem:[#allocation3 + $0x760] sm:$0xff]  ;;  %v1501_v9 = vld [vmem:[#allocation3 + $0x928] sm:$0xff] }
 0x2ff   :  { %2131 = vmatpush1.bf16.msra.mxu1 %v1964_v31  ;;  %2295 = vmatpush1.bf16.msra.mxu0 %v1966_v32  ;;  %v1625_v31 = vunpack.c.h.s8.bf16 %v1415_v14  ;;  %v1633_v32 = vunpack.c.l.s8.bf16 %v1423_v0  ;;  %v1443_v14 = vld [vmem:[#allocation3 + $0x758] sm:$0xff] }
 0x300   :  { %2132 = vmatprep.subr.bf16.mxu1 %v1972_v33  ;;  %2296 = vmatprep.subr.bf16.mxu0 %v1974_v36  ;;  %v1422_v33 = vld [vmem:[#allocation3 + $0x6b0] sm:$0xff]  ;;  %v1690_v36 = vunpack.c.l.s8.bf16 %v1452_v22  ;;  %v1451_v0 = vld [vmem:[#allocation3 + $0x798] sm:$0xff] }
 0x301   :  { %v1632_v38 = vunpack.c.l.s8.bf16 %v1422_v33 }
 0x303   :  { %2133 = vmatpush1.bf16.msra.mxu1 %v1971_v41  ;;  %2297 = vmatpush1.bf16.msra.mxu0 %v1973_v42  ;;  %v1697_v41 = vunpack.c.h.s8.bf16 %v1452_v22  ;;  %v1430_v42 = vld [vmem:[#allocation3 + $0x6f0] sm:$0xff]  ;;  %v1508_v22 = vld [vmem:[#allocation3 + $0x960] sm:$0xff] }
 0x304   :  { %2134 = vmatprep.subr.bf16.mxu1 %v1979_v45  ;;  %2298 = vmatprep.subr.bf16.mxu0 %v1981_v44  ;;  %v1459_v45 = vld [vmem:[#allocation3 + $0x7d8] sm:$0xff]  ;;  %v1639_v44 = vunpack.c.h.s8.bf16 %v1422_v33  ;;  %v1647_v28 = vunpack.c.l.s8.bf16 %v1430_v42  ;;  %v1654_v56 = vunpack.c.h.s8.bf16 %v1430_v42  ;;  %v1450_v33 = vld [vmem:[#allocation3 + $0x790] sm:$0xff] }
 0x305   :  { %v1711_v57 = vunpack.c.h.s8.bf16 %v1459_v45  ;;  %v1458_v42 = vld [vmem:[#allocation3 + $0x7d0] sm:$0xff] }
 0x307   :  { %2135 = vmatpush1.bf16.msra.mxu1 %v1978_v53  ;;  %2299 = vmatpush1.bf16.msra.mxu0 %v1980_v61  ;;  %v1704_v53 = vunpack.c.l.s8.bf16 %v1459_v45  ;;  %v1431_v61 = vld [vmem:[#allocation3 + $0x6f8] sm:$0xff] }
 0x308   :  { %2136 = vmatprep.subr.bf16.mxu1 %v1986_v48  ;;  %2300 = vmatprep.subr.bf16.mxu0 %v1988_v54  ;;  %v1646_v48 = vunpack.c.l.s8.bf16 %v1429_v43  ;;  %v1648_v54 = vunpack.c.l.s8.bf16 %v1431_v61  ;;  %v1515_v45 = vld [vmem:[#allocation3 + $0x998] sm:$0xff] }
 0x30b   :  { %2137 = vmatpush1.bf16.msra.mxu1 %v1985_v58  ;;  %2301 = vmatpush1.bf16.msra.mxu0 %v1987_v60  ;;  %v1494_v58 = vld [vmem:[#allocation3 + $0x8f0] sm:$0xff]  ;;  %v1653_v60 = vunpack.c.h.s8.bf16 %v1429_v43  ;;  %v1457_v43 = vld [vmem:[#allocation3 + $0x7c8] sm:$0xff] }
 0x30c   :  { %2327 = vmatprep.subr.bf16.mxu1 %v1605_v23  ;;  %4824 = vmatprep.subr.bf16.mxu0 %v1662_v49  ;;  %v1655_v23 = vunpack.c.h.s8.bf16 %v1431_v61  ;;  %v1661_v49 = vunpack.c.l.s8.bf16 %v1437_v50  ;;  %v1774_v2 = vunpack.c.l.s8.bf16 %v1494_v58  ;;  %v1487_v61 = vld [vmem:[#allocation3 + $0x8b8] sm:$0xff] }
 0x30e   :  { %2155 = vmatmul.mubr.bf16.vlgmr.msra.gmra.mrb[20].mxu1 %v5730_v5  ;;  %2319 = vmatmul.mubr.bf16.vlgmr.msra.gmra.mrb[8].mxu0 %v5730_v5 }
 0x30f   :  { %2328 = vmatpush1.bf16.msra.mxu1 %v1604_v4  ;;  %2359 = vmatprep.mubr.bf16.mxu1 %v5662_v20  ;;  %v1660_v4 = vunpack.c.l.s8.bf16 %v1436_v1 }
 0x310   :  { %4825 = vmatpush3.bf16.msra.mxu0 %v1606_v6  ;;  %2523 = vmatprep.mubr.bf16.mxu0 %v5662_v20  ;;  %v1627_v20 = vunpack.c.h.s8.bf16 %v1417_v15  ;;  %v1718_v6 = vunpack.c.l.s8.bf16 %v1466_v3  ;;  %v1473_v15 = vld [vmem:[#allocation3 + $0x848] sm:$0xff] }
 0x311   :  { %2329 = vmatprep.subr.bf16.mxu1 %v1612_v7  ;;  %4826 = vmatprep.subr.bf16.mxu0 %v1669_v8  ;;  %v1668_v7 = vunpack.c.h.s8.bf16 %v1437_v50  ;;  %v1781_v8 = vunpack.c.h.s8.bf16 %v1494_v58  ;;  %v1465_v50 = vld [vmem:[#allocation3 + $0x808] sm:$0xff]  ;;  %v1550_v58 = vld [vmem:[#allocation3 + $0xab0] sm:$0xff] }
 0x313   :  { %2330 = vmatpush1.bf16.msra.mxu1 %v1611_v11  ;;  %v1667_v11 = vunpack.c.h.s8.bf16 %v1436_v1  ;;  %v1464_v1 = vld [vmem:[#allocation3 + $0x800] sm:$0xff] }
 0x314   :  { %4827 = vmatpush3.bf16.msra.mxu0 %v1613_v17  ;;  %2331 = vmatprep.subr.bf16.mxu1 %v1619_v12  ;;  %v1725_v17 = vunpack.c.h.s8.bf16 %v1466_v3  ;;  %v1675_v12 = vunpack.c.l.s8.bf16 %v1444_v26  ;;  %v1522_v3 = vld [vmem:[#allocation3 + $0x9d0] sm:$0xff] }
 0x315   :  { %4828 = vmatprep.subr.bf16.mxu0 %v1676_v35  ;;  %v1788_v35 = vunpack.c.l.s8.bf16 %v1501_v9 }
 0x317   :  { %2332 = vmatpush1.bf16.msra.mxu1 %v1618_v16  ;;  %v1674_v16 = vunpack.c.l.s8.bf16 %v1443_v14 }
 0x318   :  { %4829 = vmatpush3.bf16.msra.mxu0 %v1620_v18  ;;  %2333 = vmatprep.subr.bf16.mxu1 %v1626_v19  ;;  %v1732_v18 = vunpack.c.l.s8.bf16 %v1473_v15  ;;  %v1682_v19 = vunpack.c.h.s8.bf16 %v1444_v26  ;;  %v1893_v26 = vunpack.c.h.s8.bf16 %v1550_v58 }
 0x319   :  { %4830 = vmatprep.subr.bf16.mxu0 %v1683_v25  ;;  %v1795_v25 = vunpack.c.h.s8.bf16 %v1501_v9  ;;  %v1557_v9 = vld [vmem:[#allocation3 + $0xae8] sm:$0xff] }
 0x31b   :  { %2334 = vmatpush1.bf16.msra.mxu1 %v1625_v31  ;;  %v1681_v31 = vunpack.c.h.s8.bf16 %v1443_v14  ;;  %v1471_v14 = vld [vmem:[#allocation3 + $0x838] sm:$0xff] }
 0x31c   :  { %4831 = vmatpush3.bf16.msra.mxu0 %v1627_v20  ;;  %2335 = vmatprep.subr.bf16.mxu1 %v1633_v32  ;;  %v1739_v20 = vunpack.c.h.s8.bf16 %v1473_v15  ;;  %v1689_v32 = vunpack.c.l.s8.bf16 %v1451_v0  ;;  %v1529_v15 = vld [vmem:[#allocation3 + $0xa08] sm:$0xff] }
 0x31d   :  { %4832 = vmatprep.subr.bf16.mxu0 %v1690_v36  ;;  %v1802_v36 = vunpack.c.l.s8.bf16 %v1508_v22 }
 0x31f   :  { %2336 = vmatpush1.bf16.msra.mxu1 %v1632_v38  ;;  %v1688_v38 = vunpack.c.l.s8.bf16 %v1450_v33 }
 0x320   :  { %4833 = vmatpush3.bf16.msra.mxu0 %v1634_v39  ;;  %2337 = vmatprep.subr.bf16.mxu1 %v1640_v13  ;;  %v1746_v39 = vunpack.c.l.s8.bf16 %v1480_v27  ;;  %v1696_v13 = vunpack.c.h.s8.bf16 %v1451_v0  ;;  %v1737_v0 = vunpack.c.h.s8.bf16 %v1471_v14 }
 0x321   :  { %4834 = vmatprep.subr.bf16.mxu0 %v1697_v41  ;;  %v1809_v41 = vunpack.c.h.s8.bf16 %v1508_v22  ;;  %v1851_v22 = vunpack.c.h.s8.bf16 %v1529_v15 }
 0x323   :  { %2338 = vmatpush1.bf16.msra.mxu1 %v1639_v44  ;;  %v1695_v44 = vunpack.c.h.s8.bf16 %v1450_v33  ;;  %v1536_v33 = vld [vmem:[#allocation3 + $0xa40] sm:$0xff] }
 0x324   :  { %4835 = vmatpush3.bf16.msra.mxu0 %v1641_v46  ;;  %2339 = vmatprep.subr.bf16.mxu1 %v1647_v28  ;;  %v1753_v46 = vunpack.c.h.s8.bf16 %v1480_v27  ;;  %v1703_v28 = vunpack.c.l.s8.bf16 %v1458_v42  ;;  %v1858_v27 = vunpack.c.l.s8.bf16 %v1536_v33 }
 0x325   :  { %4836 = vmatprep.subr.bf16.mxu0 %v1704_v53  ;;  %v1816_v53 = vunpack.c.l.s8.bf16 %v1515_v45 }
 0x327   :  { %2340 = vmatpush1.bf16.msra.mxu1 %v1646_v48  ;;  %v1702_v48 = vunpack.c.l.s8.bf16 %v1457_v43 }
 0x328   :  { %4837 = vmatpush3.bf16.msra.mxu0 %v1648_v54  ;;  %2341 = vmatprep.subr.bf16.mxu1 %v1654_v56  ;;  %v1760_v54 = vunpack.c.l.s8.bf16 %v1487_v61  ;;  %v1710_v56 = vunpack.c.h.s8.bf16 %v1458_v42 }
 0x329   :  { %4838 = vmatprep.subr.bf16.mxu0 %v1711_v57  ;;  %v1823_v57 = vunpack.c.h.s8.bf16 %v1515_v45  ;;  %v1865_v45 = vunpack.c.h.s8.bf16 %v1536_v33 }
 0x32b   :  { %2342 = vmatpush1.bf16.msra.mxu1 %v1653_v60  ;;  %v1709_v60 = vunpack.c.h.s8.bf16 %v1457_v43  ;;  %v1543_v43 = vld [vmem:[#allocation3 + $0xa78] sm:$0xff] }
 0x32c   :  { %4839 = vmatpush3.bf16.msra.mxu0 %v1655_v23  ;;  %2343 = vmatprep.subr.bf16.mxu1 %v1661_v49  ;;  %v1767_v23 = vunpack.c.h.s8.bf16 %v1487_v61  ;;  %v1717_v49 = vunpack.c.l.s8.bf16 %v1465_v50  ;;  %v1872_v61 = vunpack.c.l.s8.bf16 %v1543_v43 }
 0x32d   :  { %4846 = vmatprep.subr.bf16.mxu0 %v1774_v2  ;;  %v1886_v2 = vunpack.c.l.s8.bf16 %v1550_v58 }
 0x32f   :  { %2524 = vmatmul.mubr.bf16.vlgmr.msra.gmra.mrb[12].mxu0 %v5664_v24  ;;  %2344 = vmatpush1.bf16.msra.mxu1 %v1660_v4  ;;  %v1716_v4 = vunpack.c.l.s8.bf16 %v1464_v1 }
 0x330   :  { %4847 = vmatpush3.bf16.msra.mxu0 %v1718_v6  ;;  %2563 = vmatprep.mubr.bf16.mxu0 %v5667_v29  ;;  %v1830_v6 = vunpack.c.l.s8.bf16 %v1522_v3 }
 0x331   :  { %2345 = vmatprep.subr.bf16.mxu1 %v1668_v7  ;;  %4848 = vmatprep.subr.bf16.mxu0 %v1781_v8  ;;  %v1724_v7 = vunpack.c.h.s8.bf16 %v1465_v50  ;;  %v1472_v8 = vld [vmem:[#allocation3 + $0x840] sm:$0xff]  ;;  %v1879_v50 = vunpack.c.h.s8.bf16 %v1543_v43 }
 0x333   :  { %2346 = vmatpush1.bf16.msra.mxu1 %v1667_v11  ;;  %v1723_v11 = vunpack.c.h.s8.bf16 %v1464_v1 }
 0x334   :  { %4849 = vmatpush3.bf16.msra.mxu0 %v1725_v17  ;;  %2347 = vmatprep.subr.bf16.mxu1 %v1675_v12  ;;  %v1837_v17 = vunpack.c.h.s8.bf16 %v1522_v3  ;;  %v1731_v12 = vunpack.c.l.s8.bf16 %v1472_v8  ;;  %v1500_v3 = vld [vmem:[#allocation3 + $0x920] sm:$0xff] }
 0x335   :  { %4850 = vmatprep.subr.bf16.mxu0 %v1788_v35  ;;  %v1900_v35 = vunpack.c.l.s8.bf16 %v1557_v9 }
 0x337   :  { %2348 = vmatpush1.bf16.msra.mxu1 %v1674_v16  ;;  %v1844_v16 = vunpack.c.l.s8.bf16 %v1529_v15 }
 0x338   :  { %4851 = vmatpush3.bf16.msra.mxu0 %v1732_v18  ;;  %2349 = vmatprep.subr.bf16.mxu1 %v1682_v19  ;;  %v1738_v18 = vunpack.c.h.s8.bf16 %v1472_v8  ;;  %v1907_v19 = vunpack.c.h.s8.bf16 %v1557_v9  ;;  %v1499_v8 = vld [vmem:[#allocation3 + $0x918] sm:$0xff] }
 0x339   :  { %4852 = vmatprep.subr.bf16.mxu0 %v1795_v25  ;;  %v1479_v25 = vld [vmem:[#allocation3 + $0x878] sm:$0xff]  ;;  %v1786_v9 = vunpack.c.l.s8.bf16 %v1499_v8 }
 0x33b   :  { %2350 = vmatpush1.bf16.msra.mxu1 %v1681_v31  ;;  %v1745_v31 = vunpack.c.l.s8.bf16 %v1479_v25 }
 0x33c   :  { %4853 = vmatpush3.bf16.msra.mxu0 %v1739_v20  ;;  %2351 = vmatprep.subr.bf16.mxu1 %v1689_v32  ;;  %v1478_v20 = vld [vmem:[#allocation3 + $0x870] sm:$0xff] }
 0x33d   :  { %4854 = vmatprep.subr.bf16.mxu0 %v1802_v36  ;;  %v1744_v36 = vunpack.c.l.s8.bf16 %v1478_v20  ;;  %v1751_v42 = vunpack.c.h.s8.bf16 %v1478_v20  ;;  %v1513_v20 = vld [vmem:[#allocation3 + $0x988] sm:$0xff] }
 0x33e   :  { %v1814_v33 = vunpack.c.l.s8.bf16 %v1513_v20 }
 0x33f   :  { %2352 = vmatpush1.bf16.msra.mxu1 %v1688_v38  ;;  %v1752_v38 = vunpack.c.h.s8.bf16 %v1479_v25 }
 0x340   :  { %4855 = vmatpush3.bf16.msra.mxu0 %v1746_v39  ;;  %2353 = vmatprep.subr.bf16.mxu1 %v1696_v13  ;;  %v1486_v13 = vld [vmem:[#allocation3 + $0x8b0] sm:$0xff] }
 0x341   :  { %4856 = vmatprep.subr.bf16.mxu0 %v1809_v41  ;;  %v1571_v41 = vld [vmem:[#allocation3 + $0xb58] sm:$0xff] }
 0x343   :  { %2354 = vmatpush1.bf16.msra.mxu1 %v1695_v44  ;;  %v1759_v44 = vunpack.c.l.s8.bf16 %v1486_v13 }
 0x344   :  { %4857 = vmatpush3.bf16.msra.mxu0 %v1753_v46  ;;  %2355 = vmatprep.subr.bf16.mxu1 %v1703_v28  ;;  %v1485_v46 = vld [vmem:[#allocation3 + $0x8a8] sm:$0xff]  ;;  %v1928_v28 = vunpack.c.l.s8.bf16 %v1571_v41 }
 0x345   :  { %4858 = vmatprep.subr.bf16.mxu0 %v1816_v53  ;;  %v1758_v53 = vunpack.c.l.s8.bf16 %v1485_v46 }
 0x347   :  { %2356 = vmatpush1.bf16.msra.mxu1 %v1702_v48  ;;  %v1766_v48 = vunpack.c.h.s8.bf16 %v1486_v13  ;;  %v1821_v13 = vunpack.c.h.s8.bf16 %v1513_v20 }
 0x348   :  { %4859 = vmatpush3.bf16.msra.mxu0 %v1760_v54  ;;  %2357 = vmatprep.subr.bf16.mxu1 %v1710_v56  ;;  %v1935_v54 = vunpack.c.h.s8.bf16 %v1571_v41  ;;  %v1493_v56 = vld [vmem:[#allocation3 + $0x8e8] sm:$0xff] }
 0x349   :  { %4860 = vmatprep.subr.bf16.mxu0 %v1823_v57  ;;  %v1765_v57 = vunpack.c.h.s8.bf16 %v1485_v46  ;;  %v1773_v58 = vunpack.c.l.s8.bf16 %v1493_v56  ;;  %v2718_v46 = vld [vmem:[#allocation3 + $0xc40] sm:$0xff] }
 0x34b   :  { %2358 = vmatpush1.bf16.msra.mxu1 %v1709_v60  ;;  %v1492_v60 = vld [vmem:[#allocation3 + $0x8e0] sm:$0xff] }
 0x34c   :  { %4861 = vmatpush3.bf16.msra.mxu0 %v1767_v23  ;;  %2368 = vmatprep.subr.bf16.mxu1 %v1717_v49  ;;  %v1578_v23 = vld [vmem:[#allocation3 + $0xb90] sm:$0xff]  ;;  %v1772_v49 = vunpack.c.l.s8.bf16 %v1492_v60 }
 0x34d   :  { %4868 = vmatprep.subr.bf16.mxu0 %v1886_v2  ;;  %v1942_v1 = vunpack.c.l.s8.bf16 %v1578_v23  ;;  %v1780_v2 = vunpack.c.h.s8.bf16 %v1493_v56  ;;  %v2726_v56 = vld [vmem:[#allocation3 + $0xc80] sm:$0xff] }
 0x34e   :  { %2360 = vmatmul.mubr.bf16.vlgmr.msra.gmra.mrb[24].mxu1 %v5664_v24  ;;  %v1730_v24 = vunpack.c.l.s8.bf16 %v1471_v14  ;;  %v1793_v14 = vunpack.c.h.s8.bf16 %v1499_v8 }
 0x34f   :  { %2564 = vmatmul.mubr.bf16.vlgmr.msra.gmra.mrb[16].mxu0 %v5686_v37  ;;  %2369 = vmatpush1.bf16.msra.mxu1 %v1716_v4  ;;  %v1779_v4 = vunpack.c.h.s8.bf16 %v1492_v60  ;;  %v2929_v60 = vunpack.c.l.s8.bf16 %v2726_v56 }
 0x350   :  { %2400 = vmatprep.mubr.bf16.mxu1 %v5667_v29  ;;  %4869 = vmatpush3.bf16.msra.mxu0 %v1830_v6  ;;  %v1564_v29 = vld [vmem:[#allocation3 + $0xb20] sm:$0xff]  ;;  %v1949_v6 = vunpack.c.h.s8.bf16 %v1578_v23  ;;  %v2725_v23 = vld [vmem:[#allocation3 + $0xc78] sm:$0xff] }
 0x351   :  { %2603 = vmatprep.mubr.bf16.mxu0 %v5713_v59  ;;  %2370 = vmatprep.subr.bf16.mxu1 %v1724_v7  ;;  %v1914_v32 = vunpack.c.l.s8.bf16 %v1564_v29  ;;  %v1921_v39 = vunpack.c.h.s8.bf16 %v1564_v29  ;;  %v1787_v7 = vunpack.c.l.s8.bf16 %v1500_v3  ;;  %v1514_v29 = vld [vmem:[#allocation3 + $0x990] sm:$0xff]  ;;  %v2935_v8 = vunpack.c.h.s8.bf16 %v2725_v23 }
 0x352   :  { %4870 = vmatprep.subr.bf16.mxu0 %v1893_v26  ;;  %v1585_v26 = vld [vmem:[#allocation3 + $0xbc8] sm:$0xff] }
 0x353   :  { %2371 = vmatpush1.bf16.msra.mxu1 %v1723_v11  ;;  %v1956_v11 = vunpack.c.l.s8.bf16 %v1585_v26 }
 0x354   :  { %4871 = vmatpush3.bf16.msra.mxu0 %v1837_v17  ;;  %2372 = vmatprep.subr.bf16.mxu1 %v1731_v12  ;;  %v1794_v17 = vunpack.c.h.s8.bf16 %v1500_v3  ;;  %v1507_v12 = vld [vmem:[#allocation3 + $0x958] sm:$0xff]  ;;  %v2936_v3 = vunpack.c.h.s8.bf16 %v2726_v56 }
 0x355   :  { %4872 = vmatprep.subr.bf16.mxu0 %v1900_v35  ;;  %v1963_v35 = vunpack.c.h.s8.bf16 %v1585_v26  ;;  %v1801_v15 = vunpack.c.l.s8.bf16 %v1507_v12  ;;  %v1808_v25 = vunpack.c.h.s8.bf16 %v1507_v12  ;;  %v1542_v12 = vld [vmem:[#allocation3 + $0xa70] sm:$0xff] }
 0x357   :  { %2373 = vmatpush1.bf16.msra.mxu1 %v1730_v24  ;;  %v1506_v24 = vld [vmem:[#allocation3 + $0x950] sm:$0xff] }
 0x358   :  { %4873 = vmatpush3.bf16.msra.mxu0 %v1844_v16  ;;  %2374 = vmatprep.subr.bf16.mxu1 %v1738_v18  ;;  %v1592_v16 = vld [vmem:[#allocation3 + $0xc00] sm:$0xff]  ;;  %v1800_v18 = vunpack.c.l.s8.bf16 %v1506_v24 }
 0x359   :  { %4874 = vmatprep.subr.bf16.mxu0 %v1907_v19  ;;  %v1970_v19 = vunpack.c.l.s8.bf16 %v1592_v16 }
 0x35b   :  { %2375 = vmatpush1.bf16.msra.mxu1 %v1737_v0  ;;  %v1807_v0 = vunpack.c.h.s8.bf16 %v1506_v24  ;;  %v2740_v24 = vld [vmem:[#allocation3 + $0xcf0] sm:$0xff] }
 0x35c   :  { %4875 = vmatpush3.bf16.msra.mxu0 %v1851_v22  ;;  %2376 = vmatprep.subr.bf16.mxu1 %v1745_v31  ;;  %v1977_v22 = vunpack.c.h.s8.bf16 %v1592_v16  ;;  %v1815_v31 = vunpack.c.l.s8.bf16 %v1514_v29  ;;  %v1871_v16 = vunpack.c.l.s8.bf16 %v1542_v12 }
 0x35d   :  { %4876 = vmatprep.subr.bf16.mxu0 %v1914_v32  ;;  %v1599_v32 = vld [vmem:[#allocation3 + $0xc38] sm:$0xff] }
 0x35e   :  { %v1991_v41 = vunpack.c.h.s8.bf16 %v1599_v32 }
 0x35f   :  { %2377 = vmatpush1.bf16.msra.mxu1 %v1744_v36  ;;  %v1984_v36 = vunpack.c.l.s8.bf16 %v1599_v32  ;;  %v2964_v32 = vunpack.c.h.s8.bf16 %v2740_v24 }
 0x360   :  { %4877 = vmatpush3.bf16.msra.mxu0 %v1858_v27  ;;  %2378 = vmatprep.subr.bf16.mxu1 %v1752_v38  ;;  %v1822_v27 = vunpack.c.h.s8.bf16 %v1514_v29  ;;  %v1521_v38 = vld [vmem:[#allocation3 + $0x9c8] sm:$0xff] }
 0x361   :  { %4878 = vmatprep.subr.bf16.mxu0 %v1921_v39  ;;  %v2719_v39 = vld [vmem:[#allocation3 + $0xc48] sm:$0xff]  ;;  %v1836_v43 = vunpack.c.h.s8.bf16 %v1521_v38 }
 0x362   :  { %v2739_v29 = vld [vmem:[#allocation3 + $0xce8] sm:$0xff] }
 0x363   :  { %2379 = vmatpush1.bf16.msra.mxu1 %v1751_v42  ;;  %v1829_v42 = vunpack.c.l.s8.bf16 %v1521_v38  ;;  %v2956_v20 = vunpack.c.l.s8.bf16 %v2739_v29  ;;  %v1548_v38 = vld [vmem:[#allocation3 + $0xaa0] sm:$0xff] }
 0x364   :  { %4879 = vmatpush3.bf16.msra.mxu0 %v1865_v45  ;;  %2380 = vmatprep.subr.bf16.mxu1 %v1759_v44  ;;  %v1520_v45 = vld [vmem:[#allocation3 + $0x9c0] sm:$0xff]  ;;  %v2915_v44 = vunpack.c.l.s8.bf16 %v2719_v39 }
 0x365   :  { %4880 = vmatprep.subr.bf16.mxu0 %v1928_v28  ;;  %v1828_v28 = vunpack.c.l.s8.bf16 %v1520_v45 }
 0x367   :  { %2381 = vmatpush1.bf16.msra.mxu1 %v1758_v53  ;;  %v1528_v53 = vld [vmem:[#allocation3 + $0xa00] sm:$0xff] }
 0x368   :  { %4881 = vmatpush3.bf16.msra.mxu0 %v1872_v61  ;;  %2382 = vmatprep.subr.bf16.mxu1 %v1766_v48  ;;  %v2914_v61 = vunpack.c.l.s8.bf16 %v2718_v46  ;;  %v2922_v48 = vunpack.c.h.s8.bf16 %v2719_v39  ;;  %v2963_v39 = vunpack.c.h.s8.bf16 %v2739_v29 }
 0x369   :  { %4882 = vmatprep.subr.bf16.mxu0 %v1935_v54  ;;  %v1835_v54 = vunpack.c.h.s8.bf16 %v1520_v45 }
 0x36b   :  { %2383 = vmatpush1.bf16.msra.mxu1 %v1765_v57  ;;  %v1843_v57 = vunpack.c.l.s8.bf16 %v1528_v53 }
 0x36c   :  { %4883 = vmatpush3.bf16.msra.mxu0 %v1879_v50  ;;  %2384 = vmatprep.subr.bf16.mxu1 %v1773_v58  ;;  %v1527_v50 = vld [vmem:[#allocation3 + $0x9f8] sm:$0xff]  ;;  %v2921_v58 = vunpack.c.h.s8.bf16 %v2718_v46 }
 0x36d   :  { %5069 = vmatprep.subr.bf16.mxu0 %v5463_v21 }
 0x36f   :  { %2604 = vmatmul.mubr.bf16.vlgmr.msra.gmra.mrb[20].mxu0 %v5715_v62  ;;  %2385 = vmatpush1.bf16.msra.mxu1 %v1772_v49  ;;  %v1842_v49 = vunpack.c.l.s8.bf16 %v1527_v50 }
 0x370   :  { %5070 = vmatpush3.bf16.msra.mxu0 %v1942_v1  ;;  %2386 = vmatprep.subr.bf16.mxu1 %v1780_v2  ;;  %v1535_v1 = vld [vmem:[#allocation3 + $0xa38] sm:$0xff]  ;;  %v2928_v2 = vunpack.c.l.s8.bf16 %v2725_v23 }
 0x371   :  { %5071 = vmatprep.subr.bf16.mxu0 %v5463_v21  ;;  %5085 = vmatprep.mubr.msk.bf16.mxu0 %vm5464_vm0, %v5463_v21 }
 0x373   :  { %2387 = vmatpush1.bf16.msra.mxu1 %v1779_v4  ;;  %v1849_v4 = vunpack.c.h.s8.bf16 %v1527_v50 }
 0x374   :  { %5072 = vmatpush3.bf16.msra.mxu0 %v1949_v6  ;;  %2388 = vmatprep.subr.bf16.mxu1 %v1787_v7  ;;  %v1857_v6 = vunpack.c.l.s8.bf16 %v1535_v1  ;;  %v1534_v7 = vld [vmem:[#allocation3 + $0xa30] sm:$0xff] }
 0x375   :  { %5073 = vmatprep.subr.bf16.mxu0 %v5463_v21 }
 0x377   :  { %2389 = vmatpush1.bf16.msra.mxu1 %v1786_v9  ;;  %v2732_v9 = vld [vmem:[#allocation3 + $0xcb0] sm:$0xff] }
 0x378   :  { %5074 = vmatpush3.bf16.msra.mxu0 %v1956_v11  ;;  %2390 = vmatprep.subr.bf16.mxu1 %v1794_v17  ;;  %v1856_v11 = vunpack.c.l.s8.bf16 %v1534_v7  ;;  %v1864_v17 = vunpack.c.h.s8.bf16 %v1535_v1  ;;  %v2761_v1 = vld [vmem:[#allocation3 + $0xd98] sm:$0xff] }
 0x379   :  { %5075 = vmatprep.subr.bf16.mxu0 %v5463_v21 }
 0x37b   :  { %2391 = vmatpush1.bf16.msra.mxu1 %v1793_v14  ;;  %v2942_v14 = vunpack.c.l.s8.bf16 %v2732_v9 }
 0x37c   :  { %5076 = vmatpush3.bf16.msra.mxu0 %v1963_v35  ;;  %2392 = vmatprep.subr.bf16.mxu1 %v1801_v15  ;;  %v1863_v15 = vunpack.c.h.s8.bf16 %v1534_v7 }
 0x37d   :  { %5077 = vmatprep.subr.bf16.mxu0 %v5463_v21 }
 0x37f   :  { %2393 = vmatpush1.bf16.msra.mxu1 %v1800_v18  ;;  %v1541_v18 = vld [vmem:[#allocation3 + $0xa68] sm:$0xff] }
 0x380   :  { %5078 = vmatpush3.bf16.msra.mxu0 %v1970_v19  ;;  %2394 = vmatprep.subr.bf16.mxu1 %v1808_v25  ;;  %v2949_v19 = vunpack.c.h.s8.bf16 %v2732_v9  ;;  %v2957_v25 = vunpack.c.l.s8.bf16 %v2740_v24 }
 0x381   :  { %5079 = vmatprep.subr.bf16.mxu0 %v5463_v21 }
 0x383   :  { %2395 = vmatpush1.bf16.msra.mxu1 %v1807_v0  ;;  %v1870_v0 = vunpack.c.l.s8.bf16 %v1541_v18 }
 0x384   :  { %5080 = vmatpush3.bf16.msra.mxu0 %v1977_v22  ;;  %2396 = vmatprep.subr.bf16.mxu1 %v1815_v31  ;;  %v1878_v22 = vunpack.c.h.s8.bf16 %v1542_v12  ;;  %v1549_v31 = vld [vmem:[#allocation3 + $0xaa8] sm:$0xff]  ;;  %v2768_v12 = vld [vmem:[#allocation3 + $0xdd0] sm:$0xff] }
 0x385   :  { %5081 = vmatprep.subr.bf16.mxu0 %v5463_v21  ;;  %v1892_v45 = vunpack.c.h.s8.bf16 %v1549_v31  ;;  %v3013_v24 = vunpack.c.l.s8.bf16 %v2768_v12 }
 0x387   :  { %2397 = vmatpush1.bf16.msra.mxu1 %v1814_v33  ;;  %v1877_v33 = vunpack.c.h.s8.bf16 %v1541_v18 }
 0x388   :  { %5082 = vmatpush3.bf16.msra.mxu0 %v1984_v36  ;;  %2398 = vmatprep.subr.bf16.mxu1 %v1822_v27  ;;  %v2747_v36 = vld [vmem:[#allocation3 + $0xd28] sm:$0xff]  ;;  %v1885_v27 = vunpack.c.l.s8.bf16 %v1549_v31 }
 0x389   :  { %5083 = vmatprep.subr.bf16.mxu0 %v5463_v21  ;;  %v5756_v31 = vld [vmem:[#allocation3 + $0xe08] sm:$0xff] }
 0x38b   :  { %2399 = vmatpush1.bf16.msra.mxu1 %v1821_v13  ;;  %v2971_v13 = vunpack.c.l.s8.bf16 %v2747_v36 }
 0x38c   :  { %5084 = vmatpush3.bf16.msra.mxu0 %v1991_v41  ;;  %2409 = vmatprep.subr.bf16.mxu1 %v1829_v42  ;;  %v2746_v41 = vld [vmem:[#allocation3 + $0xd20] sm:$0xff]  ;;  %v1884_v42 = vunpack.c.l.s8.bf16 %v1548_v38 }
 0x38d   :  { %3313 = vmatprep.subr.bf16.mxu0 %v2915_v44  ;;  %v1556_v44 = vld [vmem:[#allocation3 + $0xae0] sm:$0xff]  ;;  %v2970_v46 = vunpack.c.l.s8.bf16 %v2746_v41 }
 0x38e   :  { %2401 = vmatmul.mubr.bf16.vlgmr.msra.gmra.mrb[24].mxu1 %v5686_v37  ;;  %v1850_v37 = vunpack.c.h.s8.bf16 %v1528_v53  ;;  %v2754_v53 = vld [vmem:[#allocation3 + $0xd60] sm:$0xff] }
 0x38f   :  { %5086 = vmatmul.mubr.bf16.vlgmr.msra.gmra.mrb[24].mxu0 %v5730_v5  ;;  %2410 = vmatpush1.bf16.msra.mxu1 %v1828_v28  ;;  %v2978_v28 = vunpack.c.h.s8.bf16 %v2747_v36  ;;  %v2985_v56 = vunpack.c.l.s8.bf16 %v2754_v53  ;;  %v3027_v36 = vunpack.c.l.s8.bf16 %v5756_v31 }
 0x390   :  { %2441 = vmatprep.mubr.bf16.mxu1 %v5713_v59  ;;  %2411 = vmatprep.subr.bf16.mxu1 %v1836_v43  ;;  %v2733_v59 = vld [vmem:[#allocation3 + $0xcb8] sm:$0xff]  ;;  %v1891_v43 = vunpack.c.h.s8.bf16 %v1548_v38 }
 0x391   :  { %3314 = vmatpush1.bf16.msra.mxu0 %v2914_v61  ;;  %v2943_v26 = vunpack.c.l.s8.bf16 %v2733_v59  ;;  %v2950_v35 = vunpack.c.h.s8.bf16 %v2733_v59  ;;  %v1899_v61 = vunpack.c.l.s8.bf16 %v1556_v44  ;;  %v2999_v59 = vunpack.c.l.s8.bf16 %v2761_v1 }
 0x392   :  { %3315 = vmatprep.subr.bf16.mxu0 %v2922_v48  ;;  %v1555_v48 = vld [vmem:[#allocation3 + $0xad8] sm:$0xff] }
 0x393   :  { %2412 = vmatpush1.bf16.msra.mxu1 %v1835_v54  ;;  %v2977_v54 = vunpack.c.h.s8.bf16 %v2746_v41  ;;  %v1898_v50 = vunpack.c.l.s8.bf16 %v1555_v48 }
 0x394   :  { %2413 = vmatprep.subr.bf16.mxu1 %v1843_v57  ;;  %v2753_v57 = vld [vmem:[#allocation3 + $0xd58] sm:$0xff] }
 0x395   :  { %3316 = vmatpush1.bf16.msra.mxu0 %v2921_v58  ;;  %v1906_v58 = vunpack.c.h.s8.bf16 %v1556_v44  ;;  %v2984_v23 = vunpack.c.l.s8.bf16 %v2753_v57 }
 0x396   :  { %3317 = vmatprep.subr.bf16.mxu0 %v2929_v60  ;;  %v1563_v60 = vld [vmem:[#allocation3 + $0xb18] sm:$0xff] }
 0x397   :  { %2414 = vmatpush1.bf16.msra.mxu1 %v1842_v49  ;;  %v2992_v49 = vunpack.c.h.s8.bf16 %v2754_v53  ;;  %v1590_v53 = vld [vmem:[#allocation3 + $0xbf0] sm:$0xff] }
 0x398   :  { %2415 = vmatprep.subr.bf16.mxu1 %v1850_v37  ;;  %v1905_v37 = vunpack.c.h.s8.bf16 %v1555_v48 }
 0x399   :  { %3318 = vmatpush1.bf16.msra.mxu0 %v2928_v2  ;;  %v1913_v2 = vunpack.c.l.s8.bf16 %v1563_v60 }
 0x39a   :  { %3319 = vmatprep.subr.bf16.mxu0 %v2936_v3  ;;  %v1562_v3 = vld [vmem:[#allocation3 + $0xb10] sm:$0xff] }
 0x39b   :  { %2416 = vmatpush1.bf16.msra.mxu1 %v1849_v4  ;;  %v2991_v4 = vunpack.c.h.s8.bf16 %v2753_v57  ;;  %v1912_v7 = vunpack.c.l.s8.bf16 %v1562_v3 }
 0x39c   :  { %2417 = vmatprep.subr.bf16.mxu1 %v1857_v6  ;;  %v2760_v6 = vld [vmem:[#allocation3 + $0xd90] sm:$0xff] }
 0x39d   :  { %3320 = vmatpush1.bf16.msra.mxu0 %v2935_v8  ;;  %v1920_v8 = vunpack.c.h.s8.bf16 %v1563_v60  ;;  %v2998_v9 = vunpack.c.l.s8.bf16 %v2760_v6 }
 0x39e   :  { %3321 = vmatprep.subr.bf16.mxu0 %v2943_v26  ;;  %v1570_v26 = vld [vmem:[#allocation3 + $0xb50] sm:$0xff] }
 0x39f   :  { %2418 = vmatpush1.bf16.msra.mxu1 %v1856_v11  ;;  %v3006_v11 = vunpack.c.h.s8.bf16 %v2761_v1 }
 0x3a0   :  { %2419 = vmatprep.subr.bf16.mxu1 %v1864_v17  ;;  %v1919_v17 = vunpack.c.h.s8.bf16 %v1562_v3 }
 0x3a1   :  { %3322 = vmatpush1.bf16.msra.mxu0 %v2942_v14  ;;  %v1927_v14 = vunpack.c.l.s8.bf16 %v1570_v26 }
 0x3a2   :  { %3323 = vmatprep.subr.bf16.mxu0 %v2950_v35  ;;  %v1569_v35 = vld [vmem:[#allocation3 + $0xb48] sm:$0xff] }
 0x3a3   :  { %2420 = vmatpush1.bf16.msra.mxu1 %v1863_v15  ;;  %v3005_v15 = vunpack.c.h.s8.bf16 %v2760_v6  ;;  %v1926_v18 = vunpack.c.l.s8.bf16 %v1569_v35 }
 0x3a4   :  { %2421 = vmatprep.subr.bf16.mxu1 %v1871_v16  ;;  %v2767_v16 = vld [vmem:[#allocation3 + $0xdc8] sm:$0xff] }
 0x3a5   :  { %3324 = vmatpush1.bf16.msra.mxu0 %v2949_v19  ;;  %v1934_v19 = vunpack.c.h.s8.bf16 %v1570_v26  ;;  %v3012_v29 = vunpack.c.l.s8.bf16 %v2767_v16 }
 0x3a6   :  { %3325 = vmatprep.subr.bf16.mxu0 %v2957_v25  ;;  %v1577_v25 = vld [vmem:[#allocation3 + $0xb88] sm:$0xff] }
 0x3a7   :  { %2422 = vmatpush1.bf16.msra.mxu1 %v1870_v0  ;;  %v3020_v0 = vunpack.c.h.s8.bf16 %v2768_v12  ;;  %v1948_v38 = vunpack.c.h.s8.bf16 %v1577_v25 }
 0x3a8   :  { %2423 = vmatprep.subr.bf16.mxu1 %v1878_v22  ;;  %v1933_v22 = vunpack.c.h.s8.bf16 %v1569_v35  ;;  %v2774_v35 = vld [vmem:[#allocation3 + $0xe00] sm:$0xff] }
 0x3a9   :  { %3326 = vmatpush1.bf16.msra.mxu0 %v2956_v20  ;;  %v1941_v20 = vunpack.c.l.s8.bf16 %v1577_v25 }
 0x3aa   :  { %3327 = vmatprep.subr.bf16.mxu0 %v2964_v32  ;;  %v1576_v32 = vld [vmem:[#allocation3 + $0xb80] sm:$0xff] }
 0x3ab   :  { %2424 = vmatpush1.bf16.msra.mxu1 %v1877_v33  ;;  %v3019_v33 = vunpack.c.h.s8.bf16 %v2767_v16 }
 0x3ac   :  { %2425 = vmatprep.subr.bf16.mxu1 %v1885_v27  ;;  %v1940_v27 = vunpack.c.l.s8.bf16 %v1576_v32 }
 0x3ad   :  { %3328 = vmatpush1.bf16.msra.mxu0 %v2963_v39  ;;  %v1584_v39 = vld [vmem:[#allocation3 + $0xbc0] sm:$0xff] }
 0x3ae   :  { %3329 = vmatprep.subr.bf16.mxu0 %v2971_v13  ;;  %v1947_v13 = vunpack.c.h.s8.bf16 %v1576_v32  ;;  %v1955_v41 = vunpack.c.l.s8.bf16 %v1584_v39  ;;  %v1962_v44 = vunpack.c.h.s8.bf16 %v1584_v39 }
 0x3af   :  { %2426 = vmatpush1.bf16.msra.mxu1 %v1884_v42  ;;  %v1583_v42 = vld [vmem:[#allocation3 + $0xbb8] sm:$0xff] }
 0x3b0   :  { %2427 = vmatprep.subr.bf16.mxu1 %v1892_v45  ;;  %v1954_v45 = vunpack.c.l.s8.bf16 %v1583_v42 }
 0x3b1   :  { %3330 = vmatpush1.bf16.msra.mxu0 %v2970_v46  ;;  %v1591_v46 = vld [vmem:[#allocation3 + $0xbf8] sm:$0xff] }
 0x3b2   :  { %3331 = vmatprep.subr.bf16.mxu0 %v2978_v28  ;;  %v1961_v28 = vunpack.c.h.s8.bf16 %v1583_v42  ;;  %v1976_v48 = vunpack.c.h.s8.bf16 %v1591_v46 }
 0x3b3   :  { %2428 = vmatpush1.bf16.msra.mxu1 %v1891_v43  ;;  %v1969_v43 = vunpack.c.l.s8.bf16 %v1591_v46  ;;  %v2727_v46 = vld [vmem:[#allocation3 + $0xc88] sm:$0xff] }
 0x3b4   :  { %2429 = vmatprep.subr.bf16.mxu1 %v1899_v61  ;;  %v5761_v61 = vld [vmem:[#allocation6 + $0x7] sm:$0xff] }
 0x3b5   :  { %3332 = vmatpush1.bf16.msra.mxu0 %v2977_v54  ;;  %v1598_v54 = vld [vmem:[#allocation3 + $0xc30] sm:$0xff]  ;;  %v2661_v57 = vrot.slane %v5761_v61, %v5641_v51 }
 0x3b6   :  { %3333 = vmatprep.subr.bf16.mxu0 %v2985_v56  ;;  %v2657_v56 = vrot.slane %v5761_v61, %v5636_v47  ;;  %v1983_v60 = vunpack.c.l.s8.bf16 %v1598_v54 }
 0x3b7   :  { %2430 = vmatpush1.bf16.msra.mxu1 %v1898_v50  ;;  %v2669_v50 = vrot.slane %v5761_v61, %v5644_v52 }
 0x3b8   :  { %2431 = vmatprep.subr.bf16.mxu1 %v1906_v58  ;;  %v1975_v58 = vunpack.c.h.s8.bf16 %v1590_v53 }
 0x3b9   :  { %3334 = vmatpush1.bf16.msra.mxu0 %v2984_v23  ;;  %v1597_v23 = vld [vmem:[#allocation3 + $0xc28] sm:$0xff] }
 0x3ba   :  { %3335 = vmatprep.subr.bf16.mxu0 %v2992_v49 }
 0x3bb   :  { %2432 = vmatpush1.bf16.msra.mxu1 %v1905_v37 }
 0x3bc   :  { %2433 = vmatprep.subr.bf16.mxu1 %v1913_v2 }
 0x3bd   :  { %3336 = vmatpush1.bf16.msra.mxu0 %v2991_v4 }
 0x3be   :  { %3337 = vmatprep.subr.bf16.mxu0 %v2999_v59 }
 0x3bf   :  { %2434 = vmatpush1.bf16.msra.mxu1 %v1912_v7 }
 0x3c0   :  { %2435 = vmatprep.subr.bf16.mxu1 %v1920_v8  ;;  %v1982_v8 = vunpack.c.l.s8.bf16 %v1597_v23 }
 0x3c1   :  { %3338 = vmatpush1.bf16.msra.mxu0 %v2998_v9 }
 0x3c2   :  { %3339 = vmatprep.subr.bf16.mxu0 %v3006_v11 }
 0x3c3   :  { %2436 = vmatpush1.bf16.msra.mxu1 %v1919_v17  ;;  %v1990_v17 = vunpack.c.h.s8.bf16 %v1598_v54  ;;  %v2788_v54 = vld [vmem:[#allocation3 + $0xe70] sm:$0xff] }
 0x3c4   :  { %2437 = vmatprep.subr.bf16.mxu1 %v1927_v14 }
 0x3c5   :  { %3340 = vmatpush1.bf16.msra.mxu0 %v3005_v15 }
 0x3c6   :  { %3341 = vmatprep.subr.bf16.mxu0 %v3013_v24  ;;  %v2721_v24 = vld [vmem:[#allocation3 + $0xc58] sm:$0xff] }
 0x3c7   :  { %2438 = vmatpush1.bf16.msra.mxu1 %v1926_v18  ;;  %v2917_v32 = vunpack.c.l.s8.bf16 %v2721_v24  ;;  %v2924_v39 = vunpack.c.h.s8.bf16 %v2721_v24 }
 0x3c8   :  { %2439 = vmatprep.subr.bf16.mxu1 %v1934_v19  ;;  %v1989_v19 = vunpack.c.h.s8.bf16 %v1597_v23 }
 0x3c9   :  { %3342 = vmatpush1.bf16.msra.mxu0 %v3012_v29  ;;  %v3026_v29 = vunpack.c.l.s8.bf16 %v2774_v35 }
 0x3ca   :  { %3343 = vmatprep.subr.bf16.mxu0 %v3020_v0  ;;  %v2720_v0 = vld [vmem:[#allocation3 + $0xc50] sm:$0xff] }
 0x3cb   :  { %2440 = vmatpush1.bf16.msra.mxu1 %v1933_v22  ;;  %v2923_v42 = vunpack.c.h.s8.bf16 %v2720_v0 }
 0x3cc   :  { %2450 = vmatprep.subr.bf16.mxu1 %v1941_v20  ;;  %v3034_v20 = vunpack.c.h.s8.bf16 %v5756_v31  ;;  %v2728_v31 = vld [vmem:[#allocation3 + $0xc90] sm:$0xff] }
 0x3cd   :  { %3344 = vmatpush1.bf16.msra.mxu0 %v3019_v33 }
 0x3ce   :  { %2442 = vmatmul.mubr.bf16.vlgmr.msra.gmra.mrb[24].mxu1 %v5715_v62  ;;  %3354 = vmatprep.subr.bf16.mxu0 %v3027_v36  ;;  %v1968_v62 = vunpack.c.l.s8.bf16 %v1590_v53  ;;  %v2782_v36 = vld [vmem:[#allocation3 + $0xe40] sm:$0xff]  ;;  %v2930_v53 = vunpack.c.l.s8.bf16 %v2727_v46 }
 0x3cf   :  { %2451 = vmatpush1.bf16.msra.mxu1 %v1940_v27  ;;  %2482 = vmatprep.mubr.bf16.mxu1 %v5462_v10  ;;  %v2916_v27 = vunpack.c.l.s8.bf16 %v2720_v0  ;;  %v2802_v0 = vld [vmem:[#allocation3 + $0xee0] sm:$0xff] }
 0x3d0   :  { %2452 = vmatprep.subr.bf16.mxu1 %v1948_v38  ;;  %v3033_v38 = vunpack.c.h.s8.bf16 %v2774_v35 }
 0x3d3   :  { %2453 = vmatpush1.bf16.msra.mxu1 %v1947_v13  ;;  %v3041_v13 = vunpack.c.l.s8.bf16 %v2782_v36 }
 0x3d4   :  { %2454 = vmatprep.subr.bf16.mxu1 %v1955_v41  ;;  %v2781_v41 = vld [vmem:[#allocation3 + $0xe38] sm:$0xff] }
 0x3d7   :  { %2455 = vmatpush1.bf16.msra.mxu1 %v1954_v45  ;;  %v3040_v45 = vunpack.c.l.s8.bf16 %v2781_v41 }
 0x3d8   :  { %2456 = vmatprep.subr.bf16.mxu1 %v1962_v44  ;;  %v2931_v44 = vunpack.c.l.s8.bf16 %v2728_v31 }
 0x3db   :  { %2457 = vmatpush1.bf16.msra.mxu1 %v1961_v28  ;;  %v3048_v28 = vunpack.c.h.s8.bf16 %v2782_v36  ;;  %v3082_v36 = vunpack.c.l.s8.bf16 %v2802_v0 }
 0x3dc   :  { %2458 = vmatprep.subr.bf16.mxu1 %v1969_v43  ;;  %v2789_v43 = vld [vmem:[#allocation3 + $0xe78] sm:$0xff] }
 0x3dd   :  { %v3062_v23 = vunpack.c.h.s8.bf16 %v2789_v43 }
 0x3df   :  { %2459 = vmatpush1.bf16.msra.mxu1 %v1968_v62  ;;  %v3047_v62 = vunpack.c.h.s8.bf16 %v2781_v41 }
 0x3e0   :  { %2460 = vmatprep.subr.bf16.mxu1 %v1976_v48  ;;  %v2938_v48 = vunpack.c.h.s8.bf16 %v2728_v31  ;;  %v3089_v31 = vunpack.c.h.s8.bf16 %v2802_v0 }
 0x3e1   :  { %v2156_v49 = vpop.f32.mrb[20].mxu1  ;;  %v5769_v37 = vpop.f32.mrb[8].mxu0 }
 0x3e2   :  { %v2689_v1 = vmul.f32 %v2657_v56, %v2156_v49  ;;  %v2158_v2 = vpop.f32.mrb[21].mxu1  ;;  %v2322_v3 = vpop.f32.mrb[9].mxu0  ;;  %v2735_v56 = vld [vmem:[#allocation3 + $0xcc8] sm:$0xff]  ;;  %v2796_v49 = vld [vmem:[#allocation3 + $0xeb0] sm:$0xff] }
 0x3e3   :  { %v2690_v4 = vmul.f32 %v2661_v57, %v2158_v2  ;;  %v2692_v59 = vmul.f32 %v2669_v50, %v2322_v3  ;;  %v2160_v6 = vpop.f32.mrb[22].mxu1  ;;  %v2324_v7 = vpop.f32.mrb[10].mxu0  ;;  %2461 = vmatpush1.bf16.msra.mxu1 %v1975_v58  ;;  %v2937_v57 = vunpack.c.h.s8.bf16 %v2727_v46  ;;  %v3054_v50 = vunpack.c.l.s8.bf16 %v2788_v54  ;;  %v2756_v46 = vld [vmem:[#allocation3 + $0xd70] sm:$0xff] }
 0x3e4   :  { %vm2696_vm8 = vcmp.ge.f32.partialorder %v2689_v1, 0.0  ;;  %v2703_v26 = vmul.f32 %v2689_v1, %v5655_v63  ;;  %v2161_v9 = vpop.f32.mrb[23].mxu1  ;;  %v2325_v11 = vpop.f32.mrb[11].mxu0  ;;  %2462 = vmatprep.subr.bf16.mxu1 %v1983_v60  ;;  %v2945_v58 = vunpack.c.l.s8.bf16 %v2735_v56  ;;  %v2734_v60 = vld [vmem:[#allocation3 + $0xcc0] sm:$0xff]  ;;  %v3061_v2 = vunpack.c.h.s8.bf16 %v2788_v54 }
 0x3e5   :  { %vm2697_vm9 = vcmp.ge.f32.partialorder %v2690_v4, 0.0  ;;  %v2704_v12 = vmul.f32 %v2690_v4, %v5655_v63  ;;  %vm2699_vm10 = vcmp.ge.f32.partialorder %v2692_v59, 0.0  ;;  %v2706_v14 = vmul.f32 %v2692_v59, %v5655_v63  ;;  %v2742_v6 = vld [vmem:[#allocation3 + $0xd00] sm:$0xff]  ;;  %v2741_v9 = vld [vmem:[#allocation3 + $0xcf8] sm:$0xff] }
 0x3e6   :  { %v2710_v15 = vsel %vm2696_vm8, %v2689_v1, %v2703_v26  ;;  %v2944_v1 = vunpack.c.l.s8.bf16 %v2734_v60  ;;  %v2952_v3 = vunpack.c.h.s8.bf16 %v2735_v56  ;;  %v2951_v7 = vunpack.c.h.s8.bf16 %v2734_v60  ;;  %v2763_v60 = vld [vmem:[#allocation3 + $0xda8] sm:$0xff] }
 0x3e7   :  { %v2711_v16 = vsel %vm2697_vm9, %v2690_v4, %v2704_v12  ;;  %v2713_v18 = vsel %vm2699_vm10, %v2692_v59, %v2706_v14  ;;  %2463 = vmatpush1.bf16.msra.mxu1 %v1982_v8  ;;  %v5776_v22 = vpack.c.bf16 %v2710_v15, %v2710_v15  ;;  %v3069_v4 = vunpack.c.l.s8.bf16 %v2796_v49  ;;  %v2795_v59 = vld [vmem:[#allocation3 + $0xea8] sm:$0xff] }
 0x3e8   :  { %v5774_v25 = vpack.c.bf16 %v2711_v16, %v2711_v16  ;;  %2464 = vmatprep.subr.bf16.mxu1 %v1990_v17  ;;  %v5779_v33 = vpack.c.bf16 %v2713_v18, %v2713_v18  ;;  %v3068_v8 = vunpack.c.l.s8.bf16 %v2795_v59  ;;  %v2959_v26 = vunpack.c.l.s8.bf16 %v2742_v6  ;;  %v2803_v12 = vld [vmem:[#allocation3 + $0xee8] sm:$0xff] }
 0x3e9   :  { %v3076_v11 = vunpack.c.h.s8.bf16 %v2796_v49  ;;  %v2958_v35 = vunpack.c.l.s8.bf16 %v2741_v9  ;;  %v3075_v16 = vunpack.c.h.s8.bf16 %v2795_v59  ;;  %v2966_v18 = vunpack.c.h.s8.bf16 %v2742_v6  ;;  %v2824_v59 = vld [vmem:[#allocation3 + $0xf90] sm:$0xff] }
 0x3ea   :  { %3345 = vmatprep.mubr.bf16.mxu0 %v5774_v25 }
 0x3eb   :  { %2465 = vmatpush1.bf16.msra.mxu1 %v1989_v19  ;;  %3346 = vmatmul.mubr.bf16.vlgmr.msra.gmra.mrb[28].mxu0 %v5776_v22 }
 0x3ec   :  { %3355 = vmatpush1.bf16.msra.mxu0 %v3026_v29  ;;  %3386 = vmatprep.mubr.bf16.mxu0 %v5779_v33  ;;  %v3083_v29 = vunpack.c.l.s8.bf16 %v2803_v12 }
 0x3ed   :  { %3356 = vmatprep.subr.bf16.mxu0 %v3034_v20  ;;  %3477 = vmatprep.subr.bf16.mxu1 %v2917_v32  ;;  %v2749_v20 = vld [vmem:[#allocation3 + $0xd38] sm:$0xff]  ;;  %v2965_v32 = vunpack.c.h.s8.bf16 %v2741_v9  ;;  %v2823_v9 = vld [vmem:[#allocation3 + $0xf88] sm:$0xff] }
 0x3ee   :  { %2483 = vmatmul.mubr.bf16.vlgmr.msra.gmra.mrb[24].mxu1 %v5730_v5  ;;  %v3055_v5 = vunpack.c.l.s8.bf16 %v2789_v43 }
 0x3ef   :  { %3478 = vmatpush1.bf16.msra.mxu1 %v2916_v27  ;;  %3509 = vmatprep.mubr.bf16.mxu1 %v5774_v25  ;;  %v2973_v27 = vunpack.c.l.s8.bf16 %v2749_v20 }
 0x3f0   :  { %3357 = vmatpush1.bf16.msra.mxu0 %v3033_v38  ;;  %3479 = vmatprep.subr.bf16.mxu1 %v2924_v39  ;;  %v2748_v38 = vld [vmem:[#allocation3 + $0xd30] sm:$0xff]  ;;  %v3090_v39 = vunpack.c.h.s8.bf16 %v2803_v12 }
 0x3f1   :  { %3358 = vmatprep.subr.bf16.mxu0 %v3041_v13  ;;  %v2810_v13 = vld [vmem:[#allocation3 + $0xf20] sm:$0xff]  ;;  %v2972_v41 = vunpack.c.l.s8.bf16 %v2748_v38 }
 0x3f3   :  { %3480 = vmatpush1.bf16.msra.mxu1 %v2923_v42  ;;  %v2980_v42 = vunpack.c.h.s8.bf16 %v2749_v20 }
 0x3f4   :  { %3359 = vmatpush1.bf16.msra.mxu0 %v3040_v45  ;;  %3481 = vmatprep.subr.bf16.mxu1 %v2931_v44  ;;  %v3097_v45 = vunpack.c.l.s8.bf16 %v2810_v13  ;;  %v2809_v44 = vld [vmem:[#allocation3 + $0xf18] sm:$0xff] }
 0x3f5   :  { %3360 = vmatprep.subr.bf16.mxu0 %v3048_v28  ;;  %v2979_v28 = vunpack.c.h.s8.bf16 %v2748_v38  ;;  %v3096_v43 = vunpack.c.l.s8.bf16 %v2809_v44  ;;  %v3103_v56 = vunpack.c.h.s8.bf16 %v2809_v44 }
 0x3f7   :  { %3482 = vmatpush1.bf16.msra.mxu1 %v2930_v53  ;;  %v2987_v53 = vunpack.c.l.s8.bf16 %v2756_v46 }
 0x3f8   :  { %3361 = vmatpush1.bf16.msra.mxu0 %v3047_v62  ;;  %3483 = vmatprep.subr.bf16.mxu1 %v2938_v48  ;;  %v2755_v62 = vld [vmem:[#allocation3 + $0xd68] sm:$0xff]  ;;  %v3104_v48 = vunpack.c.h.s8.bf16 %v2810_v13 }
 0x3f9   :  { %3362 = vmatprep.subr.bf16.mxu0 %v3055_v5  ;;  %v2817_v5 = vld [vmem:[#allocation3 + $0xf58] sm:$0xff]  ;;  %v2986_v54 = vunpack.c.l.s8.bf16 %v2755_v62 }
 0x3fb   :  { %3484 = vmatpush1.bf16.msra.mxu1 %v2937_v57  ;;  %v2994_v57 = vunpack.c.h.s8.bf16 %v2756_v46  ;;  %v2776_v46 = vld [vmem:[#allocation3 + $0xe10] sm:$0xff] }
 0x3fc   :  { %3363 = vmatpush1.bf16.msra.mxu0 %v3054_v50  ;;  %3485 = vmatprep.subr.bf16.mxu1 %v2945_v58  ;;  %v3111_v50 = vunpack.c.l.s8.bf16 %v2817_v5  ;;  %v2816_v58 = vld [vmem:[#allocation3 + $0xf50] sm:$0xff] }
 0x3fd   :  { %3364 = vmatprep.subr.bf16.mxu0 %v3062_v23  ;;  %v2993_v23 = vunpack.c.h.s8.bf16 %v2755_v62  ;;  %v3110_v49 = vunpack.c.l.s8.bf16 %v2816_v58  ;;  %v2838_v62 = vld [vmem:[#allocation3 + $0x1000] sm:$0xff] }
 0x3ff   :  { %3486 = vmatpush1.bf16.msra.mxu1 %v2944_v1  ;;  %v3001_v1 = vunpack.c.l.s8.bf16 %v2763_v60 }
 0x400   :  { %3365 = vmatpush1.bf16.msra.mxu0 %v3061_v2  ;;  %3487 = vmatprep.subr.bf16.mxu1 %v2952_v3  ;;  %v2762_v2 = vld [vmem:[#allocation3 + $0xda0] sm:$0xff]  ;;  %v3118_v3 = vunpack.c.h.s8.bf16 %v2817_v5 }
 0x401   :  { %3366 = vmatprep.subr.bf16.mxu0 %v3069_v4  ;;  %v2665_v4 = vrot.slane %v5761_v61, %v5677_v55  ;;  %v3000_v6 = vunpack.c.l.s8.bf16 %v2762_v2  ;;  %v3007_v12 = vunpack.c.h.s8.bf16 %v2762_v2 }
 0x402   :  { %v4840_v17 = vpop.f32.mrb[12].mxu0 }
 0x403   :  { %v4841_v14 = vpop.f32.mrb[13].mxu0  ;;  %3488 = vmatpush1.bf16.msra.mxu1 %v2951_v7  ;;  %v3117_v7 = vunpack.c.h.s8.bf16 %v2816_v58 }
 0x404   :  { %v5786_v15 = vadd.f32 %v4841_v14, %v4840_v17  ;;  %v4843_v24 = vpop.f32.mrb[14].mxu0  ;;  %3367 = vmatpush1.bf16.msra.mxu0 %v3068_v8  ;;  %3489 = vmatprep.subr.bf16.mxu1 %v2959_v26  ;;  %v3008_v8 = vunpack.c.h.s8.bf16 %v2763_v60  ;;  %v3125_v26 = vunpack.c.l.s8.bf16 %v2824_v59  ;;  %v2691_v17 = vmul.f32 %v2665_v4, %v5769_v37  ;;  %v2783_v60 = vld [vmem:[#allocation3 + $0xe48] sm:$0xff] }
 0x405   :  { %v4844_v19 = vpop.f32.mrb[15].mxu0  ;;  %3368 = vmatprep.subr.bf16.mxu0 %v3076_v11  ;;  %v2770_v11 = vld [vmem:[#allocation3 + $0xde0] sm:$0xff]  ;;  %v3124_v14 = vunpack.c.l.s8.bf16 %v2823_v9  ;;  %v2769_v24 = vld [vmem:[#allocation3 + $0xdd8] sm:$0xff]  ;;  %v3131_v37 = vunpack.c.h.s8.bf16 %v2823_v9  ;;  %v3042_v2 = vunpack.c.l.s8.bf16 %v2783_v60 }
 0x406   :  { %vm2698_vm11 = vcmp.ge.f32.partialorder %v2691_v17, 0.0  ;;  %v3014_v20 = vunpack.c.l.s8.bf16 %v2769_v24  ;;  %v2790_v9 = vld [vmem:[#allocation3 + $0xe80] sm:$0xff] }
 0x407   :  { %3490 = vmatpush1.bf16.msra.mxu1 %v2958_v35  ;;  %v3015_v35 = vunpack.c.l.s8.bf16 %v2770_v11 }
 0x408   :  { %3369 = vmatpush1.bf16.msra.mxu0 %v3075_v16  ;;  %3491 = vmatprep.subr.bf16.mxu1 %v2966_v18  ;;  %v3132_v16 = vunpack.c.h.s8.bf16 %v2824_v59  ;;  %v2705_v18 = vmul.f32 %v2691_v17, %v5655_v63  ;;  %v2791_v59 = vld [vmem:[#allocation3 + $0xe88] sm:$0xff] }
 0x409   :  { %3370 = vmatprep.subr.bf16.mxu0 %v3083_v29  ;;  %v2831_v29 = vld [vmem:[#allocation3 + $0xfc8] sm:$0xff] }
 0x40a   :  { %v3139_v13 = vunpack.c.l.s8.bf16 %v2831_v29 }
 0x40b   :  { %3492 = vmatpush1.bf16.msra.mxu1 %v2965_v32 }
 0x40c   :  { %3371 = vmatpush1.bf16.msra.mxu0 %v3082_v36  ;;  %3493 = vmatprep.subr.bf16.mxu1 %v2973_v27  ;;  %v3022_v27 = vunpack.c.h.s8.bf16 %v2770_v11 }
 0x40d   :  { %3372 = vmatprep.subr.bf16.mxu0 %v3090_v39  ;;  %v2777_v39 = vld [vmem:[#allocation3 + $0xe18] sm:$0xff] }
 0x40e   :  { %v3029_v44 = vunpack.c.l.s8.bf16 %v2777_v39  ;;  %v3036_v5 = vunpack.c.h.s8.bf16 %v2777_v39 }
 0x40f   :  { %3494 = vmatpush1.bf16.msra.mxu1 %v2972_v41  ;;  %v2830_v41 = vld [vmem:[#allocation3 + $0xfc0] sm:$0xff] }
 0x410   :  { %3373 = vmatpush1.bf16.msra.mxu0 %v3089_v31  ;;  %3495 = vmatprep.subr.bf16.mxu1 %v2980_v42  ;;  %v2712_v31 = vsel %vm2698_vm11, %v2691_v17, %v2705_v18 }
 0x411   :  { %3374 = vmatprep.subr.bf16.mxu0 %v3097_v45  ;;  %v3021_v45 = vunpack.c.h.s8.bf16 %v2769_v24 }
 0x413   :  { %3496 = vmatpush1.bf16.msra.mxu1 %v2979_v28  ;;  %v3138_v28 = vunpack.c.l.s8.bf16 %v2830_v41 }
 0x414   :  { %3375 = vmatpush1.bf16.msra.mxu0 %v3096_v43  ;;  %3497 = vmatprep.subr.bf16.mxu1 %v2987_v53  ;;  %v5795_v43 = vpack.c.bf16 %v2712_v31, %v2712_v31  ;;  %v3146_v53 = vunpack.c.h.s8.bf16 %v2831_v29  ;;  %v3063_v29 = vunpack.c.h.s8.bf16 %v2790_v9 }
 0x415   :  { %3376 = vmatprep.subr.bf16.mxu0 %v3104_v48  ;;  %v3028_v48 = vunpack.c.l.s8.bf16 %v2776_v46 }
 0x417   :  { %3498 = vmatpush1.bf16.msra.mxu1 %v2986_v54  ;;  %v2784_v54 = vld [vmem:[#allocation3 + $0xe50] sm:$0xff] }
 0x418   :  { %3377 = vmatpush1.bf16.msra.mxu0 %v3103_v56  ;;  %3499 = vmatprep.subr.bf16.mxu1 %v2994_v57  ;;  %v3153_v56 = vunpack.c.l.s8.bf16 %v2838_v62  ;;  %v2837_v57 = vld [vmem:[#allocation3 + $0xff8] sm:$0xff]  ;;  %v3043_v58 = vunpack.c.l.s8.bf16 %v2784_v54 }
 0x419   :  { %3378 = vmatprep.subr.bf16.mxu0 %v3111_v50  ;;  %v3035_v50 = vunpack.c.h.s8.bf16 %v2776_v46  ;;  %v3159_v4 = vunpack.c.h.s8.bf16 %v2837_v57  ;;  %v2805_v46 = vld [vmem:[#allocation3 + $0xef8] sm:$0xff] }
 0x41b   :  { %3500 = vmatpush1.bf16.msra.mxu1 %v2993_v23  ;;  %v3152_v23 = vunpack.c.l.s8.bf16 %v2837_v57  ;;  %v2866_v57 = vld [vmem:[#allocation3 + $0x10e0] sm:$0xff] }
 0x41c   :  { %3379 = vmatpush1.bf16.msra.mxu0 %v3110_v49  ;;  %3501 = vmatprep.subr.bf16.mxu1 %v3001_v1  ;;  %v3160_v49 = vunpack.c.h.s8.bf16 %v2838_v62  ;;  %v2845_v1 = vld [vmem:[#allocation3 + $0x1038] sm:$0xff] }
 0x41d   :  { %3380 = vmatprep.subr.bf16.mxu0 %v3118_v3  ;;  %v3050_v3 = vunpack.c.h.s8.bf16 %v2784_v54  ;;  %v3174_v17 = vunpack.c.h.s8.bf16 %v2845_v1 }
 0x41f   :  { %3502 = vmatpush1.bf16.msra.mxu1 %v3000_v6  ;;  %v3167_v6 = vunpack.c.l.s8.bf16 %v2845_v1 }
 0x420   :  { %3381 = vmatpush1.bf16.msra.mxu0 %v3117_v7  ;;  %3503 = vmatprep.subr.bf16.mxu1 %v3008_v8  ;;  %v2844_v7 = vld [vmem:[#allocation3 + $0x1030] sm:$0xff]  ;;  %v3049_v8 = vunpack.c.h.s8.bf16 %v2783_v60 }
 0x421   :  { %3382 = vmatprep.subr.bf16.mxu0 %v3125_v26  ;;  %v3057_v26 = vunpack.c.l.s8.bf16 %v2791_v59  ;;  %v3166_v11 = vunpack.c.l.s8.bf16 %v2844_v7  ;;  %v3173_v24 = vunpack.c.h.s8.bf16 %v2844_v7 }
 0x422   :  { %v4862_v19 = vpop.f32.mrb[16].mxu0 }
 0x423   :  { %v4863_v0 = vpop.f32.mrb[17].mxu0  ;;  %3504 = vmatpush1.bf16.msra.mxu1 %v3007_v12  ;;  %v2852_v12 = vld [vmem:[#allocation3 + $0x1070] sm:$0xff] }
 0x424   :  { %v4864_v32 = vadd.f32 %v4863_v0, %v4862_v19  ;;  %v4865_v36 = vpop.f32.mrb[18].mxu0  ;;  %3383 = vmatpush1.bf16.msra.mxu0 %v3124_v14  ;;  %3505 = vmatprep.subr.bf16.mxu1 %v3015_v35  ;;  %v3056_v14 = vunpack.c.l.s8.bf16 %v2790_v9  ;;  %v3064_v35 = vunpack.c.h.s8.bf16 %v2791_v59  ;;  %v3181_v18 = vunpack.c.l.s8.bf16 %v2852_v12  ;;  %v2851_v19 = vld [vmem:[#allocation3 + $0x1068] sm:$0xff] }
 0x425   :  { %v4866_v38 = vpop.f32.mrb[19].mxu0  ;;  %3384 = vmatprep.subr.bf16.mxu0 %v3132_v16  ;;  %v2798_v16 = vld [vmem:[#allocation3 + $0xec0] sm:$0xff]  ;;  %v3188_v36 = vunpack.c.h.s8.bf16 %v2852_v12  ;;  %v3216_v59 = vunpack.c.h.s8.bf16 %v2866_v57  ;;  %v2819_v9 = vld [vmem:[#allocation3 + $0xf68] sm:$0xff] }
 0x426   :  { %v5793_v42 = vadd.f32 %v4864_v32, %v5786_v15  ;;  %v3145_v15 = vunpack.c.h.s8.bf16 %v2830_v41  ;;  %v3071_v0 = vunpack.c.l.s8.bf16 %v2798_v16  ;;  %v3180_v32 = vunpack.c.l.s8.bf16 %v2851_v19 }
 0x427   :  { %3506 = vmatpush1.bf16.msra.mxu1 %v3014_v20  ;;  %v2797_v20 = vld [vmem:[#allocation3 + $0xeb8] sm:$0xff]  ;;  %v3078_v31 = vunpack.c.h.s8.bf16 %v2798_v16 }
 0x428   :  { %3385 = vmatpush1.bf16.msra.mxu0 %v3131_v37  ;;  %3507 = vmatprep.subr.bf16.mxu1 %v3022_v27  ;;  %v2859_v27 = vld [vmem:[#allocation3 + $0x10a8] sm:$0xff]  ;;  %v3070_v39 = vunpack.c.l.s8.bf16 %v2797_v20 }
 0x429   :  { %3395 = vmatprep.subr.bf16.mxu0 %v3139_v13 }
 0x42b   :  { %3387 = vmatmul.mubr.bf16.vlgmr.msra.gmra.mrb[28].mxu0 %v5795_v43  ;;  %3508 = vmatpush1.bf16.msra.mxu1 %v3021_v45  ;;  %v3187_v45 = vunpack.c.h.s8.bf16 %v2851_v19 }
 0x42c   :  { %3518 = vmatprep.subr.bf16.mxu1 %v3029_v44  ;;  %3396 = vmatpush1.bf16.msra.mxu0 %v3138_v28  ;;  %v3195_v28 = vunpack.c.l.s8.bf16 %v2859_v27 }
 0x42d   :  { %3397 = vmatprep.subr.bf16.mxu0 %v3146_v53  ;;  %v2858_v53 = vld [vmem:[#allocation3 + $0x10a0] sm:$0xff] }
 0x42e   :  { %3510 = vmatmul.mubr.bf16.vlgmr.msra.gmra.mrb[28].mxu1 %v5776_v22  ;;  %v3194_v54 = vunpack.c.l.s8.bf16 %v2858_v53  ;;  %v3201_v60 = vunpack.c.h.s8.bf16 %v2858_v53 }
 0x42f   :  { %3519 = vmatpush1.bf16.msra.mxu1 %v3028_v48  ;;  %3550 = vmatprep.mubr.bf16.mxu1 %v5779_v33  ;;  %v3077_v48 = vunpack.c.h.s8.bf16 %v2797_v20  ;;  %v2826_v20 = vld [vmem:[#allocation3 + $0xfa0] sm:$0xff] }
 0x430   :  { %3520 = vmatprep.subr.bf16.mxu1 %v3036_v5  ;;  %3398 = vmatpush1.bf16.msra.mxu0 %v3145_v15  ;;  %v3085_v5 = vunpack.c.l.s8.bf16 %v2805_v46  ;;  %v2804_v15 = vld [vmem:[#allocation3 + $0xef0] sm:$0xff]  ;;  %v3134_v53 = vunpack.c.h.s8.bf16 %v2826_v20 }
 0x431   :  { %3399 = vmatprep.subr.bf16.mxu0 %v3153_v56  ;;  %v3202_v56 = vunpack.c.h.s8.bf16 %v2859_v27  ;;  %v3091_v1 = vunpack.c.h.s8.bf16 %v2804_v15  ;;  %v3127_v27 = vunpack.c.l.s8.bf16 %v2826_v20 }
 0x433   :  { %3521 = vmatpush1.bf16.msra.mxu1 %v3035_v50  ;;  %v3084_v50 = vunpack.c.l.s8.bf16 %v2804_v15  ;;  %v2833_v15 = vld [vmem:[#allocation3 + $0xfd8] sm:$0xff] }
 0x434   :  { %3522 = vmatprep.subr.bf16.mxu1 %v3043_v58  ;;  %3400 = vmatpush1.bf16.msra.mxu0 %v3152_v23  ;;  %v3092_v58 = vunpack.c.h.s8.bf16 %v2805_v46  ;;  %v2812_v23 = vld [vmem:[#allocation3 + $0xf30] sm:$0xff] }
 0x435   :  { %3401 = vmatprep.subr.bf16.mxu0 %v3160_v49  ;;  %v2865_v49 = vld [vmem:[#allocation3 + $0x10d8] sm:$0xff] }
 0x437   :  { %3523 = vmatpush1.bf16.msra.mxu1 %v3042_v2  ;;  %v3099_v2 = vunpack.c.l.s8.bf16 %v2812_v23 }
 0x438   :  { %3524 = vmatprep.subr.bf16.mxu1 %v3050_v3  ;;  %3402 = vmatpush1.bf16.msra.mxu0 %v3159_v4  ;;  %v2811_v3 = vld [vmem:[#allocation3 + $0xf28] sm:$0xff]  ;;  %v3208_v4 = vunpack.c.l.s8.bf16 %v2865_v49 }
 0x439   :  { %3403 = vmatprep.subr.bf16.mxu0 %v3167_v6  ;;  %v2873_v6 = vld [vmem:[#allocation3 + $0x1118] sm:$0xff]  ;;  %v3098_v7 = vunpack.c.l.s8.bf16 %v2811_v3  ;;  %v3105_v12 = vunpack.c.h.s8.bf16 %v2811_v3  ;;  %v2847_v3 = vld [vmem:[#allocation3 + $0x1048] sm:$0xff] }
 0x43a   :  { %v3230_v16 = vunpack.c.h.s8.bf16 %v2873_v6 }
 0x43b   :  { %3525 = vmatpush1.bf16.msra.mxu1 %v3049_v8  ;;  %v3106_v8 = vunpack.c.h.s8.bf16 %v2812_v23 }
 0x43c   :  { %3526 = vmatprep.subr.bf16.mxu1 %v3057_v26  ;;  %3404 = vmatpush1.bf16.msra.mxu0 %v3166_v11  ;;  %v3215_v26 = vunpack.c.h.s8.bf16 %v2865_v49  ;;  %v3223_v11 = vunpack.c.l.s8.bf16 %v2873_v6  ;;  %v2839_v49 = vld [vmem:[#allocation3 + $0x1008] sm:$0xff]  ;;  %v2846_v6 = vld [vmem:[#allocation3 + $0x1040] sm:$0xff] }
 0x43d   :  { %3405 = vmatprep.subr.bf16.mxu0 %v3174_v17  ;;  %v2872_v17 = vld [vmem:[#allocation3 + $0x1110] sm:$0xff] }
 0x43f   :  { %3527 = vmatpush1.bf16.msra.mxu1 %v3056_v14  ;;  %v3113_v14 = vunpack.c.l.s8.bf16 %v2819_v9 }
 0x440   :  { %3528 = vmatprep.subr.bf16.mxu1 %v3064_v35  ;;  %3406 = vmatpush1.bf16.msra.mxu0 %v3173_v24  ;;  %v2818_v35 = vld [vmem:[#allocation3 + $0xf60] sm:$0xff]  ;;  %v3222_v24 = vunpack.c.l.s8.bf16 %v2872_v17 }
 0x441   :  { %3407 = vmatprep.subr.bf16.mxu0 %v3181_v18  ;;  %v2880_v18 = vld [vmem:[#allocation3 + $0x1150] sm:$0xff]  ;;  %v3112_v19 = vunpack.c.l.s8.bf16 %v2818_v35 }
 0x442   :  { %v4884_v37 = vpop.f32.mrb[20].mxu0 }
 0x443   :  { %v4885_v38 = vpop.f32.mrb[21].mxu0  ;;  %3529 = vmatpush1.bf16.msra.mxu1 %v3063_v29  ;;  %v3120_v29 = vunpack.c.h.s8.bf16 %v2819_v9  ;;  %v3175_v9 = vunpack.c.h.s8.bf16 %v2846_v6 }
 0x444   :  { %v4886_v13 = vadd.f32 %v4885_v38, %v4884_v37  ;;  %v4887_v41 = vpop.f32.mrb[22].mxu0  ;;  %3530 = vmatprep.subr.bf16.mxu1 %v3071_v0  ;;  %3408 = vmatpush1.bf16.msra.mxu0 %v3180_v32  ;;  %v3229_v0 = vunpack.c.h.s8.bf16 %v2872_v17  ;;  %v3237_v32 = vunpack.c.l.s8.bf16 %v2880_v18  ;;  %v3119_v37 = vunpack.c.h.s8.bf16 %v2818_v35  ;;  %v2825_v38 = vld [vmem:[#allocation3 + $0xf98] sm:$0xff] }
 0x445   :  { %v4888_v44 = vpop.f32.mrb[23].mxu0  ;;  %3409 = vmatprep.subr.bf16.mxu0 %v3188_v36  ;;  %v2879_v36 = vld [vmem:[#allocation3 + $0x1148] sm:$0xff]  ;;  %v3126_v46 = vunpack.c.l.s8.bf16 %v2825_v38  ;;  %v2853_v17 = vld [vmem:[#allocation3 + $0x1078] sm:$0xff] }
 0x446   :  { %v5801_v62 = vadd.f32 %v4886_v13, %v5793_v42  ;;  %v3209_v42 = vunpack.c.l.s8.bf16 %v2866_v57  ;;  %v3244_v13 = vunpack.c.h.s8.bf16 %v2880_v18  ;;  %v3141_v57 = vunpack.c.l.s8.bf16 %v2833_v15  ;;  %v2861_v35 = vld [vmem:[#allocation3 + $0x10b8] sm:$0xff]  ;;  %v2860_v18 = vld [vmem:[#allocation3 + $0x10b0] sm:$0xff] }
 0x447   :  { %3531 = vmatpush1.bf16.msra.mxu1 %v3070_v39  ;;  %v3236_v39 = vunpack.c.l.s8.bf16 %v2879_v36  ;;  %v3203_v20 = vunpack.c.h.s8.bf16 %v2860_v18 }
 0x448   :  { %3532 = vmatprep.subr.bf16.mxu1 %v3078_v31  ;;  %3410 = vmatpush1.bf16.msra.mxu0 %v3187_v45  ;;  %v5803_v31 = vld [vmem:[#allocation3 + $0x1188] sm:$0xff] }
 0x449   :  { %3411 = vmatprep.subr.bf16.mxu0 %v3195_v28 }
 0x44b   :  { %3533 = vmatpush1.bf16.msra.mxu1 %v3077_v48  ;;  %v3243_v48 = vunpack.c.h.s8.bf16 %v2879_v36  ;;  %v2867_v36 = vld [vmem:[#allocation3 + $0x10e8] sm:$0xff] }
 0x44c   :  { %3534 = vmatprep.subr.bf16.mxu1 %v3085_v5  ;;  %3412 = vmatpush1.bf16.msra.mxu0 %v3194_v54  ;;  %v3251_v54 = vunpack.c.l.s8.bf16 %v5803_v31 }
 0x44d   :  { %3413 = vmatprep.subr.bf16.mxu0 %v3202_v56  ;;  %v3133_v56 = vunpack.c.h.s8.bf16 %v2825_v38  ;;  %v2875_v38 = vld [vmem:[#allocation3 + $0x1128] sm:$0xff] }
 0x44f   :  { %3535 = vmatpush1.bf16.msra.mxu1 %v3084_v50  ;;  %v2832_v50 = vld [vmem:[#allocation3 + $0xfd0] sm:$0xff] }
 0x450   :  { %3536 = vmatprep.subr.bf16.mxu1 %v3092_v58  ;;  %3414 = vmatpush1.bf16.msra.mxu0 %v3201_v60  ;;  %v3148_v58 = vunpack.c.h.s8.bf16 %v2833_v15  ;;  %v2840_v60 = vld [vmem:[#allocation3 + $0x1010] sm:$0xff]  ;;  %v3147_v23 = vunpack.c.h.s8.bf16 %v2832_v50 }
 0x451   :  { %3415 = vmatprep.subr.bf16.mxu0 %v3209_v42  ;;  %v3155_v42 = vunpack.c.l.s8.bf16 %v2840_v60 }
 0x453   :  { %3537 = vmatpush1.bf16.msra.mxu1 %v3091_v1  ;;  %v3154_v1 = vunpack.c.l.s8.bf16 %v2839_v49 }
 0x454   :  { %3538 = vmatprep.subr.bf16.mxu1 %v3099_v2  ;;  %3416 = vmatpush1.bf16.msra.mxu0 %v3208_v4  ;;  %v3162_v2 = vunpack.c.h.s8.bf16 %v2840_v60  ;;  %v3161_v4 = vunpack.c.h.s8.bf16 %v2839_v49 }
 0x455   :  { %3417 = vmatprep.subr.bf16.mxu0 %v3216_v59  ;;  %v3169_v59 = vunpack.c.l.s8.bf16 %v2847_v3 }
 0x457   :  { %3539 = vmatpush1.bf16.msra.mxu1 %v3098_v7  ;;  %v3168_v7 = vunpack.c.l.s8.bf16 %v2846_v6  ;;  %v2888_v6 = vld [vmem:[#allocation3 + $0x1190] sm:$0xff] }
 0x458   :  { %3540 = vmatprep.subr.bf16.mxu1 %v3106_v8  ;;  %3418 = vmatpush1.bf16.msra.mxu0 %v3215_v26  ;;  %v3176_v8 = vunpack.c.h.s8.bf16 %v2847_v3  ;;  %v2854_v26 = vld [vmem:[#allocation3 + $0x1080] sm:$0xff] }
 0x459   :  { %3419 = vmatprep.subr.bf16.mxu0 %v3223_v11  ;;  %v3183_v11 = vunpack.c.l.s8.bf16 %v2854_v26 }
 0x45b   :  { %3541 = vmatpush1.bf16.msra.mxu1 %v3105_v12  ;;  %v3182_v12 = vunpack.c.l.s8.bf16 %v2853_v17 }
 0x45c   :  { %3542 = vmatprep.subr.bf16.mxu1 %v3113_v14  ;;  %3420 = vmatpush1.bf16.msra.mxu0 %v3222_v24  ;;  %v3190_v14 = vunpack.c.h.s8.bf16 %v2854_v26  ;;  %v3189_v24 = vunpack.c.h.s8.bf16 %v2853_v17  ;;  %v3258_v17 = vunpack.c.h.s8.bf16 %v5803_v31  ;;  %v2893_v31 = vld [vmem:[#allocation3 + $0x11b8] sm:$0xff] }
 0x45d   :  { %3421 = vmatprep.subr.bf16.mxu0 %v3230_v16  ;;  %v3197_v16 = vunpack.c.l.s8.bf16 %v2861_v35 }
 0x45f   :  { %3543 = vmatpush1.bf16.msra.mxu1 %v3112_v19  ;;  %v3196_v19 = vunpack.c.l.s8.bf16 %v2860_v18 }
 0x460   :  { %3544 = vmatprep.subr.bf16.mxu1 %v3120_v29  ;;  %3422 = vmatpush1.bf16.msra.mxu0 %v3229_v0  ;;  %v3204_v29 = vunpack.c.h.s8.bf16 %v2861_v35  ;;  %v2868_v0 = vld [vmem:[#allocation3 + $0x10f0] sm:$0xff] }
 0x461   :  { %3423 = vmatprep.subr.bf16.mxu0 %v3237_v32  ;;  %v3211_v32 = vunpack.c.l.s8.bf16 %v2868_v0  ;;  %v2896_v35 = vld [vmem:[#allocation3 + $0x11d0] sm:$0xff] }
 0x462   :  { %v2645_v41 = vpop.f32.mrb[24].mxu0 }
 0x463   :  { %v5806_v45 = vadd.f32 %v2645_v41, %v5801_v62  ;;  %v5087_v44 = vpop.f32.mrb[25].mxu0  ;;  %3545 = vmatpush1.bf16.msra.mxu1 %v3119_v37  ;;  %v3140_v62 = vunpack.c.l.s8.bf16 %v2832_v50  ;;  %v3210_v37 = vunpack.c.l.s8.bf16 %v2867_v36  ;;  %v2874_v41 = vld [vmem:[#allocation3 + $0x1120] sm:$0xff] }
 0x464   :  { %v2648_v28 = vpop.f32.mrb[26].mxu0  ;;  %3546 = vmatprep.subr.bf16.mxu1 %v3127_v27  ;;  %3424 = vmatpush1.bf16.msra.mxu0 %v3236_v39  ;;  %v3218_v27 = vunpack.c.h.s8.bf16 %v2868_v0  ;;  %v3217_v39 = vunpack.c.h.s8.bf16 %v2867_v36  ;;  %v3224_v44 = vunpack.c.l.s8.bf16 %v2874_v41  ;;  %v3264_v0 = vunpack.c.l.s8.bf16 %v2893_v31 }
 0x465   :  { %v5088_v5 = vpop.f32.mrb[27].mxu0  ;;  %3425 = vmatprep.subr.bf16.mxu0 %v3244_v13  ;;  %v3225_v13 = vunpack.c.l.s8.bf16 %v2875_v38  ;;  %v2882_v28 = vld [vmem:[#allocation3 + $0x1160] sm:$0xff]  ;;  %v3274_v36 = vunpack.c.h.s8.bf16 %v2896_v35 }
 0x466   :  { %v2881_v5 = vld [vmem:[#allocation3 + $0x1158] sm:$0xff] }
 0x467   :  { %3547 = vmatpush1.bf16.msra.mxu1 %v3126_v46  ;;  %v3232_v46 = vunpack.c.h.s8.bf16 %v2875_v38  ;;  %v3238_v15 = vunpack.c.l.s8.bf16 %v2881_v5  ;;  %v3271_v38 = vunpack.c.h.s8.bf16 %v2893_v31  ;;  %v2730_v31 = vld [vmem:[#allocation3 + $0xca0] sm:$0xff] }
 0x468   :  { %3548 = vmatprep.subr.bf16.mxu1 %v3134_v53  ;;  %3426 = vmatpush1.bf16.msra.mxu0 %v3243_v48  ;;  %v3231_v53 = vunpack.c.h.s8.bf16 %v2874_v41  ;;  %v3239_v48 = vunpack.c.l.s8.bf16 %v2882_v28 }
 0x469   :  { %3436 = vmatprep.subr.bf16.mxu0 %v3251_v54  ;;  %v3246_v54 = vunpack.c.h.s8.bf16 %v2882_v28 }
 0x46b   :  { %3549 = vmatpush1.bf16.msra.mxu1 %v3133_v56  ;;  %v2889_v56 = vld [vmem:[#allocation3 + $0x1198] sm:$0xff] }
 0x46c   :  { %3559 = vmatprep.subr.bf16.mxu1 %v3141_v57  ;;  %v3245_v57 = vunpack.c.h.s8.bf16 %v2881_v5  ;;  %v3253_v50 = vunpack.c.l.s8.bf16 %v2889_v56 }
 0x46e   :  { %3551 = vmatmul.mubr.bf16.vlgmr.msra.gmra.mrb[28].mxu1 %v5795_v43 }
 0x46f   :  { %3560 = vmatpush1.bf16.msra.mxu1 %v3140_v62  ;;  %v2673_v62 = vrot.slane %v5761_v61, %v5702_v34 }
 0x470   :  { %3561 = vmatprep.subr.bf16.mxu1 %v3148_v58  ;;  %v2677_v58 = vrot.slane %v5761_v61, %v5705_v40  ;;  %v3252_v61 = vunpack.c.l.s8.bf16 %v2888_v6 }
 0x473   :  { %3562 = vmatpush1.bf16.msra.mxu1 %v3147_v23 }
 0x474   :  { %3563 = vmatprep.subr.bf16.mxu1 %v3155_v42 }
 0x477   :  { %3564 = vmatpush1.bf16.msra.mxu1 %v3154_v1 }
 0x478   :  { %3565 = vmatprep.subr.bf16.mxu1 %v3162_v2 }
 0x47b   :  { %3566 = vmatpush1.bf16.msra.mxu1 %v3161_v4 }
 0x47c   :  { %3567 = vmatprep.subr.bf16.mxu1 %v3169_v59  ;;  %v2886_v59 = vld [vmem:[#allocation3 + $0x1180] sm:$0xff] }
 0x47f   :  { %3568 = vmatpush1.bf16.msra.mxu1 %v3168_v7 }
 0x480   :  { %3569 = vmatprep.subr.bf16.mxu1 %v3176_v8 }
 0x483   :  { %3570 = vmatpush1.bf16.msra.mxu1 %v3175_v9  ;;  %v3250_v9 = vunpack.c.l.s8.bf16 %v2886_v59 }
 0x484   :  { %3571 = vmatprep.subr.bf16.mxu1 %v3183_v11 }
 0x487   :  { %3572 = vmatpush1.bf16.msra.mxu1 %v3182_v12  ;;  %v3260_v12 = vunpack.c.h.s8.bf16 %v2889_v56  ;;  %v2908_v56 = vld [vmem:[#allocation3 + $0x1230] sm:$0xff] }
 0x488   :  { %3573 = vmatprep.subr.bf16.mxu1 %v3190_v14  ;;  %v2894_v14 = vld [vmem:[#allocation3 + $0x11c0] sm:$0xff] }
 0x489   :  { %v3265_v18 = vunpack.c.l.s8.bf16 %v2894_v14 }
 0x48b   :  { %3574 = vmatpush1.bf16.msra.mxu1 %v3189_v24  ;;  %v3257_v24 = vunpack.c.h.s8.bf16 %v2886_v59 }
 0x48c   :  { %3575 = vmatprep.subr.bf16.mxu1 %v3197_v16  ;;  %v3259_v16 = vunpack.c.h.s8.bf16 %v2888_v6  ;;  %v2723_v6 = vld [vmem:[#allocation3 + $0xc68] sm:$0xff] }
 0x48f   :  { %3576 = vmatpush1.bf16.msra.mxu1 %v3196_v19  ;;  %v3267_v19 = vunpack.c.l.s8.bf16 %v2896_v35 }
 0x490   :  { %3577 = vmatprep.subr.bf16.mxu1 %v3204_v29  ;;  %v2895_v29 = vld [vmem:[#allocation3 + $0x11c8] sm:$0xff] }
 0x493   :  { %3578 = vmatpush1.bf16.msra.mxu1 %v3203_v20  ;;  %v3266_v20 = vunpack.c.l.s8.bf16 %v2895_v29 }
 0x494   :  { %3579 = vmatprep.subr.bf16.mxu1 %v3211_v32  ;;  %v3272_v32 = vunpack.c.h.s8.bf16 %v2894_v14  ;;  %v2724_v14 = vld [vmem:[#allocation3 + $0xc70] sm:$0xff] }
 0x497   :  { %3580 = vmatpush1.bf16.msra.mxu1 %v3210_v37  ;;  %v2901_v37 = vld [vmem:[#allocation3 + $0x11f8] sm:$0xff] }
 0x498   :  { %3581 = vmatprep.subr.bf16.mxu1 %v3218_v27  ;;  %v2903_v27 = vld [vmem:[#allocation3 + $0x1208] sm:$0xff] }
 0x499   :  { %v3281_v41 = vunpack.c.l.s8.bf16 %v2903_v27  ;;  %v3288_v5 = vunpack.c.h.s8.bf16 %v2903_v27  ;;  %v2731_v27 = vld [vmem:[#allocation3 + $0xca8] sm:$0xff] }
 0x49b   :  { %3582 = vmatpush1.bf16.msra.mxu1 %v3217_v39  ;;  %v3273_v39 = vunpack.c.h.s8.bf16 %v2895_v29  ;;  %v2759_v29 = vld [vmem:[#allocation3 + $0xd88] sm:$0xff] }
 0x49c   :  { %3583 = vmatprep.subr.bf16.mxu1 %v3225_v13  ;;  %v3279_v13 = vunpack.c.l.s8.bf16 %v2901_v37 }
 0x49f   :  { %3584 = vmatpush1.bf16.msra.mxu1 %v3224_v44  ;;  %v2900_v44 = vld [vmem:[#allocation3 + $0x11f0] sm:$0xff] }
 0x4a0   :  { %3585 = vmatprep.subr.bf16.mxu1 %v3232_v46  ;;  %v2902_v46 = vld [vmem:[#allocation3 + $0x1200] sm:$0xff]  ;;  %v3278_v28 = vunpack.c.l.s8.bf16 %v2900_v44 }
 0x4a3   :  { %3586 = vmatpush1.bf16.msra.mxu1 %v3231_v53  ;;  %v3280_v53 = vunpack.c.l.s8.bf16 %v2902_v46 }
 0x4a4   :  { %3587 = vmatprep.subr.bf16.mxu1 %v3239_v48  ;;  %v3286_v48 = vunpack.c.h.s8.bf16 %v2901_v37  ;;  %v2990_v37 = vunpack.c.l.s8.bf16 %v2759_v29 }
 0x4a7   :  { %3588 = vmatpush1.bf16.msra.mxu1 %v3238_v15  ;;  %v5309_v15 = vld [vmem:[#allocation6 + $0x7] sm:$0xff] }
 0x4a8   :  { %3589 = vmatprep.subr.bf16.mxu1 %v3246_v54  ;;  %v2681_v54 = vrot.slane %v5309_v15, %v5725_v30  ;;  %v2738_v15 = vld [vmem:[#allocation3 + $0xce0] sm:$0xff] }
 0x4ab   :  { %3590 = vmatpush1.bf16.msra.mxu1 %v3245_v57  ;;  %v2910_v57 = vld [vmem:[#allocation3 + $0x1240] sm:$0xff] }
 0x4ac   :  { %3600 = vmatprep.subr.bf16.mxu1 %v3253_v50  ;;  %v3285_v50 = vunpack.c.h.s8.bf16 %v2900_v44  ;;  %v2737_v44 = vld [vmem:[#allocation3 + $0xcd8] sm:$0xff] }
 0x4c1   :  { %v2484_v60 = vpop.f32.mrb[24].mxu1 }
 0x4c2   :  { %v2693_v23 = vmul.f32 %v2673_v62, %v2484_v60  ;;  %v2486_v42 = vpop.f32.mrb[25].mxu1  ;;  %v3287_v62 = vunpack.c.h.s8.bf16 %v2902_v46  ;;  %v3295_v60 = vunpack.c.l.s8.bf16 %v2910_v57  ;;  %v2766_v46 = vld [vmem:[#allocation3 + $0xdc0] sm:$0xff] }
 0x4c3   :  { %v2694_v49 = vmul.f32 %v2677_v58, %v2486_v42  ;;  %v2488_v1 = vpop.f32.mrb[26].mxu1  ;;  %v3293_v58 = vunpack.c.l.s8.bf16 %v2908_v56  ;;  %v2909_v42 = vld [vmem:[#allocation3 + $0x1238] sm:$0xff] }
 0x4c4   :  { %vm2700_vm12 = vcmp.ge.f32.partialorder %v2693_v23, 0.0  ;;  %v2707_v2 = vmul.f32 %v2693_v23, %v5655_v63  ;;  %v2489_v3 = vpop.f32.mrb[27].mxu1 }
 0x4c5   :  { %vm2701_vm13 = vcmp.ge.f32.partialorder %v2694_v49, 0.0  ;;  %v2708_v4 = vmul.f32 %v2694_v49, %v5655_v63  ;;  %v3300_v3 = vunpack.c.h.s8.bf16 %v2908_v56  ;;  %v2948_v56 = vunpack.c.l.s8.bf16 %v2738_v15 }
 0x4c6   :  { %v2714_v7 = vsel %vm2700_vm12, %v2693_v23, %v2707_v2  ;;  %v2907_v23 = vld [vmem:[#allocation3 + $0x1228] sm:$0xff]  ;;  %v3294_v2 = vunpack.c.l.s8.bf16 %v2909_v42 }
 0x4c7   :  { %v2715_v8 = vsel %vm2701_vm13, %v2694_v49, %v2708_v4  ;;  %v5818_v11 = vpack.c.bf16 %v2714_v7, %v2714_v7  ;;  %v2695_v49 = vmul.f32 %v2681_v54, %v5806_v45  ;;  %v3292_v1 = vunpack.c.l.s8.bf16 %v2907_v23  ;;  %v2752_v7 = vld [vmem:[#allocation3 + $0xd50] sm:$0xff] }
 0x4c8   :  { %v5816_v26 = vpack.c.bf16 %v2715_v8, %v2715_v8  ;;  %v3302_v4 = vunpack.c.h.s8.bf16 %v2910_v57  ;;  %v3299_v8 = vunpack.c.h.s8.bf16 %v2907_v23  ;;  %v2919_v45 = vunpack.c.l.s8.bf16 %v2723_v6 }
 0x4c9   :  { %v2709_v59 = vmul.f32 %v2695_v49, %v5655_v63  ;;  %vm2702_vm14 = vcmp.ge.f32.partialorder %v2695_v49, 0.0  ;;  %v2954_v57 = vunpack.c.h.s8.bf16 %v2737_v44  ;;  %v2955_v23 = vunpack.c.h.s8.bf16 %v2738_v15  ;;  %v2794_v15 = vld [vmem:[#allocation3 + $0xea0] sm:$0xff] }
 0x4ca   :  { %3427 = vmatprep.mubr.bf16.mxu0 %v5816_v26  ;;  %3591 = vmatprep.mubr.bf16.mxu1 %v5816_v26 }
 0x4cb   :  { %3428 = vmatmul.mubr.bf16.vlgmr.msra.gmra.mrb[28].mxu0 %v5818_v11  ;;  %3592 = vmatmul.mubr.bf16.vlgmr.msra.gmra.mrb[28].mxu1 %v5818_v11 }
 0x4cc   :  { %3437 = vmatpush1.bf16.msra.mxu0 %v3250_v9  ;;  %3601 = vmatpush1.bf16.msra.mxu1 %v3252_v61  ;;  %v3301_v9 = vunpack.c.h.s8.bf16 %v2909_v42  ;;  %v2976_v61 = vunpack.c.l.s8.bf16 %v2752_v7 }
 0x4cd   :  { %3438 = vmatprep.subr.bf16.mxu0 %v3258_v17  ;;  %3602 = vmatprep.subr.bf16.mxu1 %v3260_v12  ;;  %v2722_v17 = vld [vmem:[#allocation3 + $0xc60] sm:$0xff]  ;;  %v2716_v12 = vsel %vm2702_vm14, %v2695_v49, %v2709_v59  ;;  %v2743_v49 = vld [vmem:[#allocation3 + $0xd08] sm:$0xff] }
 0x4ce   :  { %3468 = vmatprep.mubr.bf16.mxu0 %v5462_v10  ;;  %3632 = vmatprep.mubr.bf16.mxu1 %v5462_v10  ;;  %v2918_v35 = vunpack.c.l.s8.bf16 %v2722_v17 }
 0x4d0   :  { %3439 = vmatpush1.bf16.msra.mxu0 %v3257_v24  ;;  %3603 = vmatpush1.bf16.msra.mxu1 %v3259_v16  ;;  %v5830_v24 = vpack.c.bf16 %v2716_v12, %v2716_v12  ;;  %v2920_v16 = vunpack.c.l.s8.bf16 %v2724_v14 }
 0x4d1   :  { %3440 = vmatprep.subr.bf16.mxu0 %v3265_v18  ;;  %3604 = vmatprep.subr.bf16.mxu1 %v3267_v19  ;;  %v2926_v18 = vunpack.c.h.s8.bf16 %v2723_v6  ;;  %v2983_v19 = vunpack.c.h.s8.bf16 %v2752_v7  ;;  %v2751_v7 = vld [vmem:[#allocation3 + $0xd48] sm:$0xff] }
 0x4d4   :  { %3441 = vmatpush1.bf16.msra.mxu0 %v3264_v0  ;;  %3605 = vmatpush1.bf16.msra.mxu1 %v3266_v20  ;;  %v2925_v0 = vunpack.c.h.s8.bf16 %v2722_v17  ;;  %v2927_v20 = vunpack.c.h.s8.bf16 %v2724_v14  ;;  %v2750_v17 = vld [vmem:[#allocation3 + $0xd40] sm:$0xff]  ;;  %v2780_v14 = vld [vmem:[#allocation3 + $0xe30] sm:$0xff] }
 0x4d5   :  { %3442 = vmatprep.subr.bf16.mxu0 %v3272_v32  ;;  %3606 = vmatprep.subr.bf16.mxu1 %v3274_v36  ;;  %v2933_v32 = vunpack.c.l.s8.bf16 %v2730_v31  ;;  %v2729_v36 = vld [vmem:[#allocation3 + $0xc98] sm:$0xff] }
 0x4d8   :  { %3443 = vmatpush1.bf16.msra.mxu0 %v3271_v38  ;;  %3607 = vmatpush1.bf16.msra.mxu1 %v3273_v39  ;;  %v2932_v38 = vunpack.c.l.s8.bf16 %v2729_v36  ;;  %v2934_v39 = vunpack.c.l.s8.bf16 %v2731_v27 }
 0x4d9   :  { %3444 = vmatprep.subr.bf16.mxu0 %v3279_v13  ;;  %3608 = vmatprep.subr.bf16.mxu1 %v3281_v41  ;;  %v2940_v13 = vunpack.c.h.s8.bf16 %v2730_v31  ;;  %v2997_v41 = vunpack.c.h.s8.bf16 %v2759_v29  ;;  %v2758_v31 = vld [vmem:[#allocation3 + $0xd80] sm:$0xff]  ;;  %v2815_v29 = vld [vmem:[#allocation3 + $0xf48] sm:$0xff] }
 0x4dc   :  { %3445 = vmatpush1.bf16.msra.mxu0 %v3278_v28  ;;  %3609 = vmatpush1.bf16.msra.mxu1 %v3280_v53  ;;  %v2939_v28 = vunpack.c.h.s8.bf16 %v2729_v36  ;;  %v2947_v53 = vunpack.c.l.s8.bf16 %v2737_v44  ;;  %v2757_v36 = vld [vmem:[#allocation3 + $0xd78] sm:$0xff] }
 0x4dd   :  { %3446 = vmatprep.subr.bf16.mxu0 %v3286_v48  ;;  %3610 = vmatprep.subr.bf16.mxu1 %v3288_v5  ;;  %v2736_v48 = vld [vmem:[#allocation3 + $0xcd0] sm:$0xff]  ;;  %v3004_v5 = vunpack.c.l.s8.bf16 %v2766_v46  ;;  %v2765_v44 = vld [vmem:[#allocation3 + $0xdb8] sm:$0xff] }
 0x4de   :  { %v2946_v54 = vunpack.c.l.s8.bf16 %v2736_v48 }
 0x4e0   :  { %3447 = vmatpush1.bf16.msra.mxu0 %v3285_v50  ;;  %3611 = vmatpush1.bf16.msra.mxu1 %v3287_v62  ;;  %v3011_v50 = vunpack.c.h.s8.bf16 %v2766_v46  ;;  %v2744_v62 = vld [vmem:[#allocation3 + $0xd10] sm:$0xff]  ;;  %v2822_v46 = vld [vmem:[#allocation3 + $0xf80] sm:$0xff] }
 0x4e1   :  { %3448 = vmatprep.subr.bf16.mxu0 %v3293_v58  ;;  %3612 = vmatprep.subr.bf16.mxu1 %v3295_v60  ;;  %v2773_v58 = vld [vmem:[#allocation3 + $0xdf8] sm:$0xff]  ;;  %v2953_v60 = vunpack.c.h.s8.bf16 %v2736_v48  ;;  %v2961_v42 = vunpack.c.l.s8.bf16 %v2744_v62  ;;  %v2968_v59 = vunpack.c.h.s8.bf16 %v2744_v62  ;;  %v2764_v48 = vld [vmem:[#allocation3 + $0xdb0] sm:$0xff] }
 0x4e2   :  { %v3025_v6 = vunpack.c.h.s8.bf16 %v2773_v58  ;;  %v2772_v62 = vld [vmem:[#allocation3 + $0xdf0] sm:$0xff] }
 0x4e4   :  { %3449 = vmatpush1.bf16.msra.mxu0 %v3292_v1  ;;  %3613 = vmatpush1.bf16.msra.mxu1 %v3294_v2  ;;  %v3018_v1 = vunpack.c.l.s8.bf16 %v2773_v58  ;;  %v2745_v2 = vld [vmem:[#allocation3 + $0xd18] sm:$0xff] }
 0x4e5   :  { %3450 = vmatprep.subr.bf16.mxu0 %v3300_v3  ;;  %3614 = vmatprep.subr.bf16.mxu1 %v3302_v4  ;;  %v2960_v3 = vunpack.c.l.s8.bf16 %v2743_v49  ;;  %v2962_v4 = vunpack.c.l.s8.bf16 %v2745_v2  ;;  %v2829_v58 = vld [vmem:[#allocation3 + $0xfb8] sm:$0xff] }
 0x4e8   :  { %3451 = vmatpush1.bf16.msra.mxu0 %v3299_v8  ;;  %3615 = vmatpush1.bf16.msra.mxu1 %v3301_v9  ;;  %v2808_v8 = vld [vmem:[#allocation3 + $0xf10] sm:$0xff]  ;;  %v2967_v9 = vunpack.c.h.s8.bf16 %v2743_v49  ;;  %v2771_v49 = vld [vmem:[#allocation3 + $0xde8] sm:$0xff] }
 0x4e9   :  { %3641 = vmatprep.subr.bf16.mxu0 %v2919_v45  ;;  %4899 = vmatprep.subr.bf16.mxu1 %v2976_v61  ;;  %v2969_v45 = vunpack.c.h.s8.bf16 %v2745_v2  ;;  %v2975_v61 = vunpack.c.l.s8.bf16 %v2751_v7  ;;  %v3088_v12 = vunpack.c.l.s8.bf16 %v2808_v8  ;;  %v2801_v2 = vld [vmem:[#allocation3 + $0xed8] sm:$0xff] }
 0x4eb   :  { %3469 = vmatmul.mubr.bf16.vlgmr.msra.gmra.mrb[28].mxu0 %v5830_v24  ;;  %3633 = vmatmul.mubr.bf16.vlgmr.msra.gmra.mrb[28].mxu1 %v5830_v24 }
 0x4ec   :  { %3642 = vmatpush1.bf16.msra.mxu0 %v2918_v35  ;;  %3673 = vmatprep.mubr.bf16.mxu0 %v5774_v25  ;;  %v2974_v35 = vunpack.c.l.s8.bf16 %v2750_v17 }
 0x4ed   :  { %4900 = vmatpush3.bf16.msra.mxu1 %v2920_v16  ;;  %3837 = vmatprep.mubr.bf16.mxu1 %v5774_v25  ;;  %v2941_v25 = vunpack.c.h.s8.bf16 %v2731_v27  ;;  %v3032_v16 = vunpack.c.l.s8.bf16 %v2780_v14  ;;  %v2787_v27 = vld [vmem:[#allocation3 + $0xe68] sm:$0xff] }
 0x4ee   :  { %3643 = vmatprep.subr.bf16.mxu0 %v2926_v18  ;;  %4901 = vmatprep.subr.bf16.mxu1 %v2983_v19  ;;  %v2982_v18 = vunpack.c.h.s8.bf16 %v2751_v7  ;;  %v3095_v19 = vunpack.c.h.s8.bf16 %v2808_v8  ;;  %v2779_v7 = vld [vmem:[#allocation3 + $0xe28] sm:$0xff]  ;;  %v2864_v8 = vld [vmem:[#allocation3 + $0x10d0] sm:$0xff] }
 0x4f0   :  { %3644 = vmatpush1.bf16.msra.mxu0 %v2925_v0  ;;  %v2981_v0 = vunpack.c.h.s8.bf16 %v2750_v17  ;;  %v2778_v17 = vld [vmem:[#allocation3 + $0xe20] sm:$0xff] }
 0x4f1   :  { %4902 = vmatpush3.bf16.msra.mxu1 %v2927_v20  ;;  %3645 = vmatprep.subr.bf16.mxu0 %v2933_v32  ;;  %v3039_v20 = vunpack.c.h.s8.bf16 %v2780_v14  ;;  %v2989_v32 = vunpack.c.l.s8.bf16 %v2758_v31  ;;  %v2836_v14 = vld [vmem:[#allocation3 + $0xff0] sm:$0xff] }
 0x4f2   :  { %4903 = vmatprep.subr.bf16.mxu1 %v2990_v37  ;;  %v3102_v37 = vunpack.c.l.s8.bf16 %v2815_v29 }
 0x4f4   :  { %3646 = vmatpush1.bf16.msra.mxu0 %v2932_v38  ;;  %v2988_v38 = vunpack.c.l.s8.bf16 %v2757_v36 }
 0x4f5   :  { %4904 = vmatpush3.bf16.msra.mxu1 %v2934_v39  ;;  %3647 = vmatprep.subr.bf16.mxu0 %v2940_v13  ;;  %v3046_v39 = vunpack.c.l.s8.bf16 %v2787_v27  ;;  %v2996_v13 = vunpack.c.h.s8.bf16 %v2758_v31  ;;  %v3207_v31 = vunpack.c.h.s8.bf16 %v2864_v8 }
 0x4f6   :  { %4905 = vmatprep.subr.bf16.mxu1 %v2997_v41  ;;  %v3109_v41 = vunpack.c.h.s8.bf16 %v2815_v29  ;;  %v2871_v29 = vld [vmem:[#allocation3 + $0x1108] sm:$0xff] }
 0x4f8   :  { %3648 = vmatpush1.bf16.msra.mxu0 %v2939_v28  ;;  %v2995_v28 = vunpack.c.h.s8.bf16 %v2757_v36  ;;  %v2785_v36 = vld [vmem:[#allocation3 + $0xe58] sm:$0xff] }
 0x4f9   :  { %4906 = vmatpush3.bf16.msra.mxu1 %v2941_v25  ;;  %3649 = vmatprep.subr.bf16.mxu0 %v2947_v53  ;;  %v3053_v25 = vunpack.c.h.s8.bf16 %v2787_v27  ;;  %v3003_v53 = vunpack.c.l.s8.bf16 %v2765_v44  ;;  %v2843_v27 = vld [vmem:[#allocation3 + $0x1028] sm:$0xff] }
 0x4fa   :  { %4907 = vmatprep.subr.bf16.mxu1 %v3004_v5  ;;  %v3116_v5 = vunpack.c.l.s8.bf16 %v2822_v46 }
 0x4fc   :  { %3650 = vmatpush1.bf16.msra.mxu0 %v2946_v54  ;;  %v3002_v54 = vunpack.c.l.s8.bf16 %v2764_v48 }
 0x4fd   :  { %4908 = vmatpush3.bf16.msra.mxu1 %v2948_v56  ;;  %3651 = vmatprep.subr.bf16.mxu0 %v2954_v57  ;;  %v3060_v56 = vunpack.c.l.s8.bf16 %v2794_v15  ;;  %v3010_v57 = vunpack.c.h.s8.bf16 %v2765_v44  ;;  %v3051_v44 = vunpack.c.h.s8.bf16 %v2785_v36 }
 0x4fe   :  { %4909 = vmatprep.subr.bf16.mxu1 %v3011_v50  ;;  %v3123_v50 = vunpack.c.h.s8.bf16 %v2822_v46  ;;  %v3165_v46 = vunpack.c.h.s8.bf16 %v2843_v27 }
 0x500   :  { %3652 = vmatpush1.bf16.msra.mxu0 %v2953_v60  ;;  %v3009_v60 = vunpack.c.h.s8.bf16 %v2764_v48  ;;  %v2850_v48 = vld [vmem:[#allocation3 + $0x1060] sm:$0xff] }
 0x501   :  { %4910 = vmatpush3.bf16.msra.mxu1 %v2955_v23  ;;  %3653 = vmatprep.subr.bf16.mxu0 %v2961_v42  ;;  %v3067_v23 = vunpack.c.h.s8.bf16 %v2794_v15  ;;  %v3017_v42 = vunpack.c.l.s8.bf16 %v2772_v62  ;;  %v3172_v15 = vunpack.c.l.s8.bf16 %v2850_v48 }
 0x502   :  { %4911 = vmatprep.subr.bf16.mxu1 %v3018_v1  ;;  %v3130_v1 = vunpack.c.l.s8.bf16 %v2829_v58 }
 0x504   :  { %3654 = vmatpush1.bf16.msra.mxu0 %v2960_v3  ;;  %v3016_v3 = vunpack.c.l.s8.bf16 %v2771_v49 }
 0x505   :  { %4912 = vmatpush3.bf16.msra.mxu1 %v2962_v4  ;;  %3655 = vmatprep.subr.bf16.mxu0 %v2968_v59  ;;  %v3074_v4 = vunpack.c.l.s8.bf16 %v2801_v2  ;;  %v3024_v59 = vunpack.c.h.s8.bf16 %v2772_v62 }
 0x506   :  { %4913 = vmatprep.subr.bf16.mxu1 %v3025_v6  ;;  %v3137_v6 = vunpack.c.h.s8.bf16 %v2829_v58  ;;  %v3179_v58 = vunpack.c.h.s8.bf16 %v2850_v48 }
 0x508   :  { %3656 = vmatpush1.bf16.msra.mxu0 %v2967_v9  ;;  %v3023_v9 = vunpack.c.h.s8.bf16 %v2771_v49  ;;  %v2857_v49 = vld [vmem:[#allocation3 + $0x1098] sm:$0xff] }
 0x509   :  { %4914 = vmatpush3.bf16.msra.mxu1 %v2969_v45  ;;  %3657 = vmatprep.subr.bf16.mxu0 %v2975_v61  ;;  %v3081_v45 = vunpack.c.h.s8.bf16 %v2801_v2  ;;  %v3031_v61 = vunpack.c.l.s8.bf16 %v2779_v7  ;;  %v3186_v2 = vunpack.c.l.s8.bf16 %v2857_v49 }
 0x50a   :  { %4921 = vmatprep.subr.bf16.mxu1 %v3088_v12  ;;  %v3200_v12 = vunpack.c.l.s8.bf16 %v2864_v8 }
 0x50c   :  { %3838 = vmatmul.mubr.bf16.vlgmr.msra.gmra.mrb[32].mxu1 %v5776_v22  ;;  %3658 = vmatpush1.bf16.msra.mxu0 %v2974_v35  ;;  %v3030_v35 = vunpack.c.l.s8.bf16 %v2778_v17 }
 0x50d   :  { %4922 = vmatpush3.bf16.msra.mxu1 %v3032_v16  ;;  %3877 = vmatprep.mubr.bf16.mxu1 %v5779_v33  ;;  %v3144_v16 = vunpack.c.l.s8.bf16 %v2836_v14 }
 0x50e   :  { %3659 = vmatprep.subr.bf16.mxu0 %v2982_v18  ;;  %4923 = vmatprep.subr.bf16.mxu1 %v3095_v19  ;;  %v3038_v18 = vunpack.c.h.s8.bf16 %v2779_v7  ;;  %v2786_v19 = vld [vmem:[#allocation3 + $0xe60] sm:$0xff]  ;;  %v3193_v7 = vunpack.c.h.s8.bf16 %v2857_v49  ;;  %v5253_v49 = vld [vmem:[#allocation8] sm:$0xff]  }
 0x510   :  { %3660 = vmatpush1.bf16.msra.mxu0 %v2981_v0  ;;  %v3037_v0 = vunpack.c.h.s8.bf16 %v2778_v17 }
 0x511   :  { %4924 = vmatpush3.bf16.msra.mxu1 %v3039_v20  ;;  %3661 = vmatprep.subr.bf16.mxu0 %v2989_v32  ;;  %v3151_v20 = vunpack.c.h.s8.bf16 %v2836_v14  ;;  %v3045_v32 = vunpack.c.l.s8.bf16 %v2786_v19  ;;  %v2814_v14 = vld [vmem:[#allocation3 + $0xf40] sm:$0xff] }
 0x512   :  { %4925 = vmatprep.subr.bf16.mxu1 %v3102_v37  ;;  %v3214_v37 = vunpack.c.l.s8.bf16 %v2871_v29 }
 0x514   :  { %3662 = vmatpush1.bf16.msra.mxu0 %v2988_v38  ;;  %v3158_v38 = vunpack.c.l.s8.bf16 %v2843_v27 }
 0x515   :  { %4926 = vmatpush3.bf16.msra.mxu1 %v3046_v39  ;;  %3663 = vmatprep.subr.bf16.mxu0 %v2996_v13  ;;  %v3052_v39 = vunpack.c.h.s8.bf16 %v2786_v19  ;;  %v3221_v13 = vunpack.c.h.s8.bf16 %v2871_v29  ;;  %v2813_v19 = vld [vmem:[#allocation3 + $0xf38] sm:$0xff] }
 0x516   :  { %4927 = vmatprep.subr.bf16.mxu1 %v3109_v41  ;;  %v2793_v41 = vld [vmem:[#allocation3 + $0xe98] sm:$0xff]  ;;  %v3100_v29 = vunpack.c.l.s8.bf16 %v2813_v19 }
 0x518   :  { %3664 = vmatpush1.bf16.msra.mxu0 %v2995_v28  ;;  %v3059_v28 = vunpack.c.l.s8.bf16 %v2793_v41 }
 0x519   :  { %4928 = vmatpush3.bf16.msra.mxu1 %v3053_v25  ;;  %3665 = vmatprep.subr.bf16.mxu0 %v3003_v53  ;;  %v2792_v25 = vld [vmem:[#allocation3 + $0xe90] sm:$0xff] }
 0x51a   :  { %4929 = vmatprep.subr.bf16.mxu1 %v3116_v5  ;;  %v3058_v5 = vunpack.c.l.s8.bf16 %v2792_v25  ;;  %v3065_v62 = vunpack.c.h.s8.bf16 %v2792_v25  ;;  %v2827_v25 = vld [vmem:[#allocation3 + $0xfa8] sm:$0xff] }
 0x51b   :  { %v3128_v48 = vunpack.c.l.s8.bf16 %v2827_v25 }
 0x51c   :  { %3666 = vmatpush1.bf16.msra.mxu0 %v3002_v54  ;;  %v3066_v54 = vunpack.c.h.s8.bf16 %v2793_v41 }
 0x51d   :  { %4930 = vmatpush3.bf16.msra.mxu1 %v3060_v56  ;;  %3667 = vmatprep.subr.bf16.mxu0 %v3010_v57  ;;  %v2800_v57 = vld [vmem:[#allocation3 + $0xed0] sm:$0xff] }
 0x51e   :  { %4931 = vmatprep.subr.bf16.mxu1 %v3123_v50  ;;  %v2885_v50 = vld [vmem:[#allocation3 + $0x1178] sm:$0xff] }
 0x520   :  { %3668 = vmatpush1.bf16.msra.mxu0 %v3009_v60  ;;  %v3073_v60 = vunpack.c.l.s8.bf16 %v2800_v57 }
 0x521   :  { %4932 = vmatpush3.bf16.msra.mxu1 %v3067_v23  ;;  %3669 = vmatprep.subr.bf16.mxu0 %v3017_v42  ;;  %v2799_v23 = vld [vmem:[#allocation3 + $0xec8] sm:$0xff]  ;;  %v3242_v42 = vunpack.c.l.s8.bf16 %v2885_v50 }
 0x522   :  { %4933 = vmatprep.subr.bf16.mxu1 %v3130_v1  ;;  %v3072_v1 = vunpack.c.l.s8.bf16 %v2799_v23 }
 0x524   :  { %3670 = vmatpush1.bf16.msra.mxu0 %v3016_v3  ;;  %v3080_v3 = vunpack.c.h.s8.bf16 %v2800_v57 }
 0x525   :  { %4934 = vmatpush3.bf16.msra.mxu1 %v3074_v4  ;;  %3671 = vmatprep.subr.bf16.mxu0 %v3024_v59  ;;  %v3249_v4 = vunpack.c.h.s8.bf16 %v2885_v50  ;;  %v2807_v59 = vld [vmem:[#allocation3 + $0xf08] sm:$0xff] }
 0x526   :  { %4935 = vmatprep.subr.bf16.mxu1 %v3137_v6  ;;  %v3079_v6 = vunpack.c.h.s8.bf16 %v2799_v23  ;;  %v3087_v8 = vunpack.c.l.s8.bf16 %v2807_v59 }
 0x528   :  { %3672 = vmatpush1.bf16.msra.mxu0 %v3023_v9  ;;  %v2806_v9 = vld [vmem:[#allocation3 + $0xf00] sm:$0xff] }
 0x529   :  { %4936 = vmatpush3.bf16.msra.mxu1 %v3081_v45  ;;  %3682 = vmatprep.subr.bf16.mxu0 %v3031_v61  ;;  %v2892_v45 = vld [vmem:[#allocation3 + $0x11b0] sm:$0xff]  ;;  %v3086_v61 = vunpack.c.l.s8.bf16 %v2806_v9 }
 0x52a   :  { %4943 = vmatprep.subr.bf16.mxu1 %v3200_v12  ;;  %v3256_v17 = vunpack.c.l.s8.bf16 %v2892_v45  ;;  %v3094_v12 = vunpack.c.h.s8.bf16 %v2807_v59  ;;  %v5255_v59 = vld [vmem:[#allocation8 + $0x8] sm:$0xff]  }
 0x52b   :  { %3674 = vmatmul.mubr.bf16.vlgmr.msra.gmra.mrb[32].mxu0 %v5776_v22  ;;  %v3044_v22 = vunpack.c.l.s8.bf16 %v2785_v36  ;;  %v3107_v36 = vunpack.c.h.s8.bf16 %v2813_v19  ;;  %v5261_v19 = vld [vmem:[#allocation8 + $0x20] sm:$0xff]  }
 0x52c   :  { %3878 = vmatmul.mubr.bf16.vlgmr.msra.gmra.mrb[36].mxu1 %v5795_v43  ;;  %3683 = vmatpush1.bf16.msra.mxu0 %v3030_v35  ;;  %v3093_v35 = vunpack.c.h.s8.bf16 %v2806_v9  ;;  %v2849_v9 = vld [vmem:[#allocation3 + $0x1058] sm:$0xff] }
 0x52d   :  { %3714 = vmatprep.mubr.bf16.mxu0 %v5779_v33  ;;  %4944 = vmatpush3.bf16.msra.mxu1 %v3144_v16  ;;  %v2878_v33 = vld [vmem:[#allocation3 + $0x1140] sm:$0xff]  ;;  %v3263_v16 = vunpack.c.h.s8.bf16 %v2892_v45  ;;  %v5258_v45 = vld [vmem:[#allocation8 + $0x58] sm:$0xff]  }
 0x52e   :  { %3917 = vmatprep.mubr.bf16.mxu1 %v5816_v26  ;;  %3684 = vmatprep.subr.bf16.mxu0 %v3038_v18  ;;  %v3228_v53 = vunpack.c.l.s8.bf16 %v2878_v33  ;;  %v3235_v56 = vunpack.c.h.s8.bf16 %v2878_v33  ;;  %v3101_v18 = vunpack.c.l.s8.bf16 %v2814_v14  ;;  %v2828_v33 = vld [vmem:[#allocation3 + $0xfb0] sm:$0xff] }
 0x52f   :  { %4945 = vmatprep.subr.bf16.mxu1 %v3207_v31  ;;  %v2899_v31 = vld [vmem:[#allocation3 + $0x11e8] sm:$0xff] }
 0x530   :  { %3685 = vmatpush1.bf16.msra.mxu0 %v3037_v0  ;;  %v3270_v0 = vunpack.c.l.s8.bf16 %v2899_v31 }
 0x531   :  { %4946 = vmatpush3.bf16.msra.mxu1 %v3151_v20  ;;  %3686 = vmatprep.subr.bf16.mxu0 %v3045_v32  ;;  %v3108_v20 = vunpack.c.h.s8.bf16 %v2814_v14  ;;  %v2821_v32 = vld [vmem:[#allocation3 + $0xf78] sm:$0xff] }
 0x532   :  { %4947 = vmatprep.subr.bf16.mxu1 %v3214_v37  ;;  %v3277_v37 = vunpack.c.h.s8.bf16 %v2899_v31  ;;  %v3115_v27 = vunpack.c.l.s8.bf16 %v2821_v32  ;;  %v3122_v41 = vunpack.c.h.s8.bf16 %v2821_v32  ;;  %v5260_v14 = vld [vmem:[#allocation8 + $0x60] sm:$0xff]   ;;  %v5262_v31 = vld [vmem:[#allocation8 + $0x68] sm:$0xff]  }
 0x533   :  { %v5263_v32 = vld [vmem:[#allocation8 + $0x28] sm:$0xff]  }
 0x534   :  { %3687 = vmatpush1.bf16.msra.mxu0 %v3044_v22  ;;  %v2820_v22 = vld [vmem:[#allocation3 + $0xf70] sm:$0xff] }
 0x535   :  { %4948 = vmatpush3.bf16.msra.mxu1 %v3158_v38  ;;  %3688 = vmatprep.subr.bf16.mxu0 %v3052_v39  ;;  %v2906_v38 = vld [vmem:[#allocation3 + $0x1220] sm:$0xff]  ;;  %v3114_v39 = vunpack.c.l.s8.bf16 %v2820_v22 }
 0x536   :  { %4949 = vmatprep.subr.bf16.mxu1 %v3221_v13  ;;  %v3284_v13 = vunpack.c.l.s8.bf16 %v2906_v38 }
 0x538   :  { %3689 = vmatpush1.bf16.msra.mxu0 %v3051_v44  ;;  %v3121_v44 = vunpack.c.h.s8.bf16 %v2820_v22  ;;  %v2863_v22 = vld [vmem:[#allocation3 + $0x10c8] sm:$0xff] }
 0x539   :  { %4950 = vmatpush3.bf16.msra.mxu1 %v3165_v46  ;;  %3690 = vmatprep.subr.bf16.mxu0 %v3059_v28  ;;  %v3291_v46 = vunpack.c.h.s8.bf16 %v2906_v38  ;;  %v3129_v28 = vunpack.c.l.s8.bf16 %v2828_v33  ;;  %v5265_v38 = vld [vmem:[#allocation8 + $0x30] sm:$0xff]  }
 0x53a   :  { %4951 = vmatprep.subr.bf16.mxu1 %v3228_v53  ;;  %v2913_v53 = vld [vmem:[#allocation3 + $0x1258] sm:$0xff] }
 0x53b   :  { %v3305_v57 = vunpack.c.h.s8.bf16 %v2913_v53 }
 0x53c   :  { %3691 = vmatpush1.bf16.msra.mxu0 %v3058_v5  ;;  %v3298_v5 = vunpack.c.l.s8.bf16 %v2913_v53  ;;  %v2870_v53 = vld [vmem:[#allocation3 + $0x1100] sm:$0xff] }
 0x53d   :  { %4952 = vmatpush3.bf16.msra.mxu1 %v3172_v15  ;;  %3692 = vmatprep.subr.bf16.mxu0 %v3066_v54  ;;  %v3136_v15 = vunpack.c.h.s8.bf16 %v2828_v33  ;;  %v2835_v54 = vld [vmem:[#allocation3 + $0xfe8] sm:$0xff]  ;;  %v2862_v33 = vld [vmem:[#allocation3 + $0x10c0] sm:$0xff] }
 0x53e   :  { %4953 = vmatprep.subr.bf16.mxu1 %v3235_v56  ;;  %v3135_v56 = vunpack.c.h.s8.bf16 %v2827_v25  ;;  %v3143_v50 = vunpack.c.l.s8.bf16 %v2835_v54  ;;  %v3150_v23 = vunpack.c.h.s8.bf16 %v2835_v54  ;;  %v3206_v25 = vunpack.c.h.s8.bf16 %v2863_v22 }
 0x540   :  { %3693 = vmatpush1.bf16.msra.mxu0 %v3065_v62  ;;  %v2834_v62 = vld [vmem:[#allocation3 + $0xfe0] sm:$0xff] }
 0x541   :  { %4954 = vmatpush3.bf16.msra.mxu1 %v3179_v58  ;;  %3694 = vmatprep.subr.bf16.mxu0 %v3073_v60  ;;  %v5252_v58 = vld [vmem:[#allocation8 + $0x40] sm:$0xff]   ;;  %v3142_v60 = vunpack.c.l.s8.bf16 %v2834_v62 }
 0x542   :  { %4955 = vmatprep.subr.bf16.mxu1 %v3242_v42  ;;  %v2842_v42 = vld [vmem:[#allocation3 + $0x1020] sm:$0xff] }
 0x544   :  { %3695 = vmatpush1.bf16.msra.mxu0 %v3072_v1  ;;  %v5254_v1 = vld [vmem:[#allocation8 + $0x48] sm:$0xff]  }
 0x545   :  { %4956 = vmatpush3.bf16.msra.mxu1 %v3186_v2  ;;  %3696 = vmatprep.subr.bf16.mxu0 %v3080_v3  ;;  %v3149_v2 = vunpack.c.h.s8.bf16 %v2834_v62  ;;  %v3157_v3 = vunpack.c.l.s8.bf16 %v2842_v42 }
 0x546   :  { %4957 = vmatprep.subr.bf16.mxu1 %v3249_v4  ;;  %v2841_v4 = vld [vmem:[#allocation3 + $0x1018] sm:$0xff] }
 0x548   :  { %3697 = vmatpush1.bf16.msra.mxu0 %v3079_v6  ;;  %v5256_v6 = vld [vmem:[#allocation8 + $0x50] sm:$0xff]  }
 0x549   :  { %4958 = vmatpush3.bf16.msra.mxu1 %v3193_v7  ;;  %3698 = vmatprep.subr.bf16.mxu0 %v3087_v8  ;;  %v3156_v7 = vunpack.c.l.s8.bf16 %v2841_v4  ;;  %v3164_v8 = vunpack.c.h.s8.bf16 %v2842_v42  ;;  %v2884_v42 = vld [vmem:[#allocation3 + $0x1170] sm:$0xff] }
 0x54a   :  { %5089 = vmatprep.subr.bf16.mxu1 %v5463_v21 }
 0x54c   :  { %3918 = vmatmul.mubr.bf16.vlgmr.msra.gmra.mrb[40].mxu1 %v5818_v11  ;;  %3699 = vmatpush1.bf16.msra.mxu0 %v3086_v61  ;;  %v3163_v61 = vunpack.c.h.s8.bf16 %v2841_v4  ;;  %v3248_v4 = vunpack.c.h.s8.bf16 %v2884_v42 }
 0x54d   :  { %5090 = vmatpush3.bf16.msra.mxu1 %v3256_v17  ;;  %3700 = vmatprep.subr.bf16.mxu0 %v3094_v12  ;;  %v2848_v17 = vld [vmem:[#allocation3 + $0x1050] sm:$0xff] }
 0x54e   :  { %5091 = vmatprep.subr.bf16.mxu1 %v5463_v21  ;;  %5105 = vmatprep.mubr.msk.bf16.mxu1 %vm5464_vm0, %v5463_v21  ;;  %v5259_v12 = vld [vmem:[#allocation8 + $0x18] sm:$0xff]  }
 0x550   :  { %3701 = vmatpush1.bf16.msra.mxu0 %v3093_v35  ;;  %v3170_v35 = vunpack.c.l.s8.bf16 %v2848_v17 }
 0x551   :  { %5092 = vmatpush3.bf16.msra.mxu1 %v3263_v16  ;;  %3702 = vmatprep.subr.bf16.mxu0 %v3101_v18  ;;  %v3178_v16 = vunpack.c.h.s8.bf16 %v2849_v9  ;;  %v2856_v18 = vld [vmem:[#allocation3 + $0x1090] sm:$0xff] }
 0x552   :  { %5093 = vmatprep.subr.bf16.mxu1 %v5463_v21 }
 0x554   :  { %3703 = vmatpush1.bf16.msra.mxu0 %v3100_v29  ;;  %v3177_v29 = vunpack.c.h.s8.bf16 %v2848_v17  ;;  %v2897_v17 = vld [vmem:[#allocation3 + $0x11d8] sm:$0xff] }
 0x555   :  { %5094 = vmatpush3.bf16.msra.mxu1 %v3270_v0  ;;  %3704 = vmatprep.subr.bf16.mxu0 %v3108_v20  ;;  %v3185_v0 = vunpack.c.l.s8.bf16 %v2856_v18  ;;  %v2855_v20 = vld [vmem:[#allocation3 + $0x1088] sm:$0xff] }
 0x556   :  { %5095 = vmatprep.subr.bf16.mxu1 %v5463_v21 }
 0x558   :  { %3705 = vmatpush1.bf16.msra.mxu0 %v3107_v36  ;;  %v5264_v36 = vld [vmem:[#allocation8 + $0x70] sm:$0xff]  }
 0x559   :  { %5096 = vmatpush3.bf16.msra.mxu1 %v3277_v37  ;;  %3706 = vmatprep.subr.bf16.mxu0 %v3115_v27  ;;  %v3184_v37 = vunpack.c.l.s8.bf16 %v2855_v20  ;;  %v3192_v27 = vunpack.c.h.s8.bf16 %v2856_v18 }
 0x55a   :  { %5097 = vmatprep.subr.bf16.mxu1 %v5463_v21 }
 0x55c   :  { %3707 = vmatpush1.bf16.msra.mxu0 %v3114_v39  ;;  %v5266_v39 = vld [vmem:[#allocation8 + $0x78] sm:$0xff]  }
 0x55d   :  { %5098 = vmatpush3.bf16.msra.mxu1 %v3284_v13  ;;  %3708 = vmatprep.subr.bf16.mxu0 %v3122_v41  ;;  %v3191_v13 = vunpack.c.h.s8.bf16 %v2855_v20  ;;  %v3199_v41 = vunpack.c.l.s8.bf16 %v2863_v22  ;;  %v2911_v22 = vld [vmem:[#allocation3 + $0x1248] sm:$0xff] }
 0x55e   :  { %5099 = vmatprep.subr.bf16.mxu1 %v5463_v21 }
 0x560   :  { %3709 = vmatpush1.bf16.msra.mxu0 %v3121_v44  ;;  %v5267_v44 = vld [vmem:[#allocation8 + $0x38] sm:$0xff]  }
 0x561   :  { %5100 = vmatpush3.bf16.msra.mxu1 %v3291_v46  ;;  %3710 = vmatprep.subr.bf16.mxu0 %v3129_v28  ;;  %v5268_v46 = vld [vmem:[#allocation8 + $0xc0] sm:$0xff]   ;;  %v3198_v28 = vunpack.c.l.s8.bf16 %v2862_v33 }
 0x562   :  { %5101 = vmatprep.subr.bf16.mxu1 %v5463_v21 }
 0x564   :  { %3711 = vmatpush1.bf16.msra.mxu0 %v3128_v48  ;;  %v3205_v48 = vunpack.c.h.s8.bf16 %v2862_v33 }
 0x565   :  { %5102 = vmatpush3.bf16.msra.mxu1 %v3298_v5  ;;  %3712 = vmatprep.subr.bf16.mxu0 %v3136_v15  ;;  %v3213_v5 = vunpack.c.l.s8.bf16 %v2870_v53  ;;  %v2869_v15 = vld [vmem:[#allocation3 + $0x10f8] sm:$0xff] }
 0x566   :  { %5103 = vmatprep.subr.bf16.mxu1 %v5463_v21  ;;  %v3212_v54 = vunpack.c.l.s8.bf16 %v2869_v15 }
 0x568   :  { %3713 = vmatpush1.bf16.msra.mxu0 %v3135_v56  ;;  %v3220_v56 = vunpack.c.h.s8.bf16 %v2870_v53 }
 0x569   :  { %5104 = vmatpush3.bf16.msra.mxu1 %v3305_v57  ;;  %3723 = vmatprep.subr.bf16.mxu0 %v3143_v50  ;;  %v2877_v57 = vld [vmem:[#allocation3 + $0x1138] sm:$0xff]  ;;  %v3219_v50 = vunpack.c.h.s8.bf16 %v2869_v15 }
 0x56a   :  { %4974 = vmatprep.subr.bf16.mxu1 %v5252_v58  ;;  %v3227_v62 = vunpack.c.l.s8.bf16 %v2877_v57  ;;  %v2876_v58 = vld [vmem:[#allocation3 + $0x1130] sm:$0xff] }
 0x56b   :  { %3715 = vmatmul.mubr.bf16.vlgmr.msra.gmra.mrb[32].mxu0 %v5795_v43  ;;  %v5257_v43 = vld [vmem:[#allocation8 + $0x10] sm:$0xff]  }
 0x56c   :  { %5106 = vmatmul.mubr.bf16.vlgmr.msra.gmra.mrb[44].mxu1 %v5830_v24  ;;  %3724 = vmatpush1.bf16.msra.mxu0 %v3142_v60  ;;  %v3226_v60 = vunpack.c.l.s8.bf16 %v2876_v58 }
 0x56d   :  { %3755 = vmatprep.mubr.bf16.mxu0 %v5816_v26  ;;  %3725 = vmatprep.subr.bf16.mxu0 %v3150_v23  ;;  %v3171_v26 = vunpack.c.l.s8.bf16 %v2849_v9  ;;  %v3234_v23 = vunpack.c.h.s8.bf16 %v2877_v57 }
 0x56e   :  { %4975 = vmatpush3.bf16.msra.mxu1 %v5253_v49  ;;  %v3233_v49 = vunpack.c.h.s8.bf16 %v2876_v58 }
 0x56f   :  { %4976 = vmatprep.subr.bf16.mxu1 %v5254_v1  ;;  %v3241_v1 = vunpack.c.l.s8.bf16 %v2884_v42 }
 0x570   :  { %3726 = vmatpush1.bf16.msra.mxu0 %v3149_v2  ;;  %v2883_v2 = vld [vmem:[#allocation3 + $0x1168] sm:$0xff] }
 0x571   :  { %3727 = vmatprep.subr.bf16.mxu0 %v3157_v3  ;;  %v3240_v3 = vunpack.c.l.s8.bf16 %v2883_v2 }
 0x572   :  { %4977 = vmatpush3.bf16.msra.mxu1 %v5255_v59  ;;  %v2891_v59 = vld [vmem:[#allocation3 + $0x11a8] sm:$0xff] }
 0x573   :  { %4978 = vmatprep.subr.bf16.mxu1 %v5256_v6  ;;  %v3247_v6 = vunpack.c.h.s8.bf16 %v2883_v2  ;;  %v5284_v2 = vld [vmem:[#allocation8 + $0x180] sm:$0xff]  }
 0x574   :  { %3728 = vmatpush1.bf16.msra.mxu0 %v3156_v7  ;;  %v3255_v7 = vunpack.c.l.s8.bf16 %v2891_v59 }
 0x575   :  { %3729 = vmatprep.subr.bf16.mxu0 %v3164_v8  ;;  %v2890_v8 = vld [vmem:[#allocation3 + $0x11a0] sm:$0xff] }
 0x576   :  { %4979 = vmatpush3.bf16.msra.mxu1 %v5257_v43  ;;  %v3254_v9 = vunpack.c.l.s8.bf16 %v2890_v8  ;;  %v3262_v43 = vunpack.c.h.s8.bf16 %v2891_v59  ;;  %v5285_v59 = vld [vmem:[#allocation8 + $0x188] sm:$0xff]  }
 0x577   :  { %4980 = vmatprep.subr.bf16.mxu1 %v5258_v45  ;;  %v2898_v45 = vld [vmem:[#allocation3 + $0x11e0] sm:$0xff] }
 0x578   :  { %3730 = vmatpush1.bf16.msra.mxu0 %v3163_v61  ;;  %v3261_v61 = vunpack.c.h.s8.bf16 %v2890_v8  ;;  %v5286_v8 = vld [vmem:[#allocation8 + $0x190] sm:$0xff]  }
 0x579   :  { %3731 = vmatprep.subr.bf16.mxu0 %v3171_v26  ;;  %v3269_v26 = vunpack.c.l.s8.bf16 %v2898_v45 }
 0x57a   :  { %4981 = vmatpush3.bf16.msra.mxu1 %v5259_v12  ;;  %v3268_v12 = vunpack.c.l.s8.bf16 %v2897_v17 }
 0x57b   :  { %4982 = vmatprep.subr.bf16.mxu1 %v5260_v14  ;;  %v3276_v14 = vunpack.c.h.s8.bf16 %v2898_v45  ;;  %v5277_v45 = vld [vmem:[#allocation8 + $0xa0] sm:$0xff]  }
 0x57c   :  { %3732 = vmatpush1.bf16.msra.mxu0 %v3170_v35  ;;  %v2905_v35 = vld [vmem:[#allocation3 + $0x1218] sm:$0xff] }
 0x57d   :  { %3733 = vmatprep.subr.bf16.mxu0 %v3178_v16  ;;  %v3275_v16 = vunpack.c.h.s8.bf16 %v2897_v17  ;;  %v3283_v18 = vunpack.c.l.s8.bf16 %v2905_v35  ;;  %v5279_v17 = vld [vmem:[#allocation8 + $0xa8] sm:$0xff]  }
 0x57e   :  { %4983 = vmatpush3.bf16.msra.mxu1 %v5261_v19  ;;  %v2904_v19 = vld [vmem:[#allocation3 + $0x1210] sm:$0xff] }
 0x57f   :  { %4984 = vmatprep.subr.bf16.mxu1 %v5262_v31  ;;  %v3282_v31 = vunpack.c.l.s8.bf16 %v2904_v19 }
 0x580   :  { %3734 = vmatpush1.bf16.msra.mxu0 %v3177_v29  ;;  %v3290_v29 = vunpack.c.h.s8.bf16 %v2905_v35  ;;  %v5281_v35 = vld [vmem:[#allocation8 + $0xb0] sm:$0xff]  }
 0x581   :  { %3735 = vmatprep.subr.bf16.mxu0 %v3185_v0 }
 0x582   :  { %4985 = vmatpush3.bf16.msra.mxu1 %v5263_v32 }
 0x583   :  { %4986 = vmatprep.subr.bf16.mxu1 %v5264_v36 }
 0x584   :  { %3736 = vmatpush1.bf16.msra.mxu0 %v3184_v37  ;;  %v3289_v37 = vunpack.c.h.s8.bf16 %v2904_v19 }
 0x585   :  { %3737 = vmatprep.subr.bf16.mxu0 %v3192_v27 }
 0x586   :  { %4987 = vmatpush3.bf16.msra.mxu1 %v5265_v38 }
 0x587   :  { %4988 = vmatprep.subr.bf16.mxu1 %v5266_v39 }
 0x588   :  { %3738 = vmatpush1.bf16.msra.mxu0 %v3191_v13 }
 0x589   :  { %3739 = vmatprep.subr.bf16.mxu0 %v3199_v41 }
 0x58a   :  { %4989 = vmatpush3.bf16.msra.mxu1 %v5267_v44 }
 0x58b   :  { %4996 = vmatprep.subr.bf16.mxu1 %v5268_v46 }
 0x58c   :  { %3740 = vmatpush1.bf16.msra.mxu0 %v3198_v28 }
 0x58d   :  { %3741 = vmatprep.subr.bf16.mxu0 %v3206_v25  ;;  %v3296_v25 = vunpack.c.l.s8.bf16 %v2911_v22 }
 0x590   :  { %3742 = vmatpush1.bf16.msra.mxu0 %v3205_v48 }
 0x591   :  { %3743 = vmatprep.subr.bf16.mxu0 %v3213_v5 }
 0x594   :  { %3744 = vmatpush1.bf16.msra.mxu0 %v3212_v54 }
 0x595   :  { %3745 = vmatprep.subr.bf16.mxu0 %v3220_v56 }
 0x598   :  { %3746 = vmatpush1.bf16.msra.mxu0 %v3219_v50 }
 0x599   :  { %3747 = vmatprep.subr.bf16.mxu0 %v3227_v62  ;;  %v3303_v62 = vunpack.c.h.s8.bf16 %v2911_v22  ;;  %v5294_v22 = vld [vmem:[#allocation8 + $0x148] sm:$0xff]  }
 0x59c   :  { %3748 = vmatpush1.bf16.msra.mxu0 %v3226_v60 }
 0x59d   :  { %3749 = vmatprep.subr.bf16.mxu0 %v3234_v23  ;;  %v5269_v23 = vld [vmem:[#allocation8 + $0x80] sm:$0xff]  }
 0x5a0   :  { %3750 = vmatpush1.bf16.msra.mxu0 %v3233_v49  ;;  %v5270_v49 = vld [vmem:[#allocation8 + $0xc8] sm:$0xff]  }
 0x5a1   :  { %3751 = vmatprep.subr.bf16.mxu0 %v3241_v1 }
 0x5a4   :  { %3752 = vmatpush1.bf16.msra.mxu0 %v3240_v3  ;;  %v5271_v3 = vld [vmem:[#allocation8 + $0x88] sm:$0xff]  }
 0x5a5   :  { %3753 = vmatprep.subr.bf16.mxu0 %v3248_v4  ;;  %v5272_v4 = vld [vmem:[#allocation8 + $0xd0] sm:$0xff]  }
 0x5a8   :  { %3754 = vmatpush1.bf16.msra.mxu0 %v3247_v6  ;;  %v5273_v6 = vld [vmem:[#allocation8 + $0x90] sm:$0xff]  }
 0x5a9   :  { %3764 = vmatprep.subr.bf16.mxu0 %v3255_v7  ;;  %v5274_v7 = vld [vmem:[#allocation8 + $0xd8] sm:$0xff]  }
 0x5ab   :  { %3756 = vmatmul.mubr.bf16.vlgmr.msra.gmra.mrb[32].mxu0 %v5818_v11  ;;  %v5858_v11 = vld [vmem:[#allocation6 + $0xe] sm:$0xff] }
 0x5ac   :  { %3765 = vmatpush1.bf16.msra.mxu0 %v3254_v9  ;;  %3796 = vmatprep.mubr.bf16.mxu0 %v5462_v10  ;;  %v2912_v10 = vld [vmem:[#allocation3 + $0x1250] sm:$0xff]  ;;  %v3971_v0 = vrot.slane %v5858_v11, %v5636_v47  ;;  %v3979_v20 = vrot.slane %v5858_v11, %v5677_v55  ;;  %v3975_v32 = vrot.slane %v5858_v11, %v5641_v51 }
 0x5ad   :  { %3766 = vmatprep.subr.bf16.mxu0 %v3262_v43  ;;  %v3983_v36 = vrot.slane %v5858_v11, %v5644_v52  ;;  %v3297_v27 = vunpack.c.l.s8.bf16 %v2912_v10  ;;  %v3304_v51 = vunpack.c.h.s8.bf16 %v2912_v10  ;;  %v5275_v9 = vld [vmem:[#allocation8 + $0x98] sm:$0xff]   ;;  %v5276_v43 = vld [vmem:[#allocation8 + $0xe0] sm:$0xff]  }
 0x5b0   :  { %3767 = vmatpush1.bf16.msra.mxu0 %v3261_v61  ;;  %v5278_v61 = vld [vmem:[#allocation8 + $0xe8] sm:$0xff]  }
 0x5b1   :  { %3768 = vmatprep.subr.bf16.mxu0 %v3269_v26  ;;  %v5288_v26 = vld [vmem:[#allocation8 + $0x1a0] sm:$0xff]  }
 0x5b4   :  { %3769 = vmatpush1.bf16.msra.mxu0 %v3268_v12  ;;  %v5280_v12 = vld [vmem:[#allocation8 + $0xf0] sm:$0xff]  }
 0x5b5   :  { %3770 = vmatprep.subr.bf16.mxu0 %v3276_v14  ;;  %v5289_v14 = vld [vmem:[#allocation8 + $0x1a8] sm:$0xff]  }
 0x5b8   :  { %3771 = vmatpush1.bf16.msra.mxu0 %v3275_v16  ;;  %v5282_v16 = vld [vmem:[#allocation8 + $0xf8] sm:$0xff]  }
 0x5b9   :  { %3772 = vmatprep.subr.bf16.mxu0 %v3283_v18 }
 0x5bc   :  { %3773 = vmatpush1.bf16.msra.mxu0 %v3282_v31  ;;  %v5290_v31 = vld [vmem:[#allocation8 + $0x1b0] sm:$0xff]  }
 0x5bd   :  { %3774 = vmatprep.subr.bf16.mxu0 %v3290_v29 }
 0x5be   :  { %v3470_v38 = vpop.f32.mrb[28].mxu0  ;;  %v3634_v39 = vpop.f32.mrb[28].mxu1 }
 0x5bf   :  { %v4003_v13 = vmul.f32 %v3971_v0, %v3470_v38  ;;  %v4005_v41 = vmul.f32 %v3979_v20, %v3634_v39  ;;  %v3472_v33 = vpop.f32.mrb[29].mxu0  ;;  %v3636_v47 = vpop.f32.mrb[29].mxu1  ;;  %v5283_v0 = vld [vmem:[#allocation8 + $0xb8] sm:$0xff]   ;;  %v5295_v38 = vld [vmem:[#allocation8 + $0x108] sm:$0xff]   ;;  %v5296_v39 = vld [vmem:[#allocation8 + $0x150] sm:$0xff]  }
 0x5c0   :  { %v4004_v44 = vmul.f32 %v3975_v32, %v3472_v33  ;;  %v4006_v46 = vmul.f32 %v3983_v36, %v3636_v47  ;;  %v3474_v55 = vpop.f32.mrb[30].mxu0  ;;  %v3638_v28 = vpop.f32.mrb[30].mxu1  ;;  %3775 = vmatpush1.bf16.msra.mxu0 %v3289_v37  ;;  %v5292_v32 = vld [vmem:[#allocation8 + $0x140] sm:$0xff]   ;;  %v5291_v36 = vld [vmem:[#allocation8 + $0x1b8] sm:$0xff]  }
 0x5c1   :  { %vm4010_vm15 = vcmp.ge.f32.partialorder %v4003_v13, 0.0  ;;  %v4017_v52 = vmul.f32 %v4003_v13, %v5655_v63  ;;  %vm4012_vm1 = vcmp.ge.f32.partialorder %v4005_v41, 0.0  ;;  %v4019_v53 = vmul.f32 %v4005_v41, %v5655_v63  ;;  %v3475_v48 = vpop.f32.mrb[31].mxu0  ;;  %v3639_v5 = vpop.f32.mrb[31].mxu1  ;;  %3776 = vmatprep.subr.bf16.mxu0 %v3297_v27  ;;  %v5293_v37 = vld [vmem:[#allocation8 + $0x100] sm:$0xff]   ;;  %v5299_v33 = vld [vmem:[#allocation8 + $0x118] sm:$0xff]  }
 0x5c2   :  { %vm4011_vm2 = vcmp.ge.f32.partialorder %v4004_v44, 0.0  ;;  %v4018_v15 = vmul.f32 %v4004_v44, %v5655_v63  ;;  %vm4013_vm3 = vcmp.ge.f32.partialorder %v4006_v46, 0.0  ;;  %v4020_v54 = vmul.f32 %v4006_v46, %v5655_v63  ;;  %v5301_v47 = vld [vmem:[#allocation8 + $0x120] sm:$0xff]  }
 0x5c3   :  { %v4024_v56 = vsel %vm4010_vm15, %v4003_v13, %v4017_v52  ;;  %v5872_v57 = vsel %vm4012_vm1, %v4005_v41, %v4019_v53  ;;  %v5297_v13 = vld [vmem:[#allocation8 + $0x110] sm:$0xff]   ;;  %v5298_v41 = vld [vmem:[#allocation8 + $0x158] sm:$0xff]   ;;  %v5302_v52 = vld [vmem:[#allocation8 + $0x168] sm:$0xff]  }
 0x5c4   :  { %4031 = vst [vmem:[#allocation12] sm:$0xff] %v4024_v56  ;;  %4033 = vst [vmem:[#allocation12 + $0x10] sm:$0xff] %v5872_v57  ;;  %3777 = vmatpush1.bf16.msra.mxu0 %v3296_v25  ;;  %v4025_v50 = vsel %vm4011_vm2, %v4004_v44, %v4018_v15  ;;  %v4027_v58 = vsel %vm4013_vm3, %v4006_v46, %v4020_v54  ;;  %v4038_v42 = vpack.c.bf16 %v4024_v56, %v4024_v56  ;;  %v5303_v53 = vld [vmem:[#allocation8 + $0x128] sm:$0xff]   ;;  %v5304_v15 = vld [vmem:[#allocation8 + $0x170] sm:$0xff]  }
 0x5c5   :  { %3778 = vmatprep.subr.bf16.mxu0 %v3304_v51  ;;  %4032 = vst [vmem:[#allocation12 + $0x8] sm:$0xff] %v4025_v50  ;;  %v4039_v60 = vpack.c.bf16 %v4025_v50, %v4025_v50  ;;  %4034 = vst [vmem:[#allocation12 + $0x18] sm:$0xff] %v4027_v58  ;;  %v4041_v1 = vpack.c.bf16 %v4027_v58, %v4027_v58  ;;  %v4040_v27 = vpack.c.bf16 %v5872_v57, %v5872_v57  ;;  %v5305_v57 = vld [vmem:[#allocation8 + $0x130] sm:$0xff]   ;;  %v5306_v58 = vld [vmem:[#allocation8 + $0x178] sm:$0xff]  }
 0x5c7   :  { %4532 = vmatprep.mubr.bf16.mxu1 %v4039_v60  ;;  %v5307_v60 = vld [vmem:[#allocation8 + $0x138] sm:$0xff]  }
 0x5c8   :  { %3779 = vmatpush1.bf16.msra.mxu0 %v3303_v62  ;;  %4533 = vmatmul.mubr.bf16.vlgmr.msra.gmra.mrb[48].mxu1 %v4038_v42 }
 0x5c9   :  { %4997 = vmatpush3.bf16.msra.mxu1 %v5269_v23  ;;  %4572 = vmatprep.mubr.bf16.mxu1 %v4041_v1  ;;  %v3995_v23 = vrot.slane %v5858_v11, %v5725_v30  ;;  %v3991_v30 = vrot.slane %v5858_v11, %v5705_v40 }
 0x5ca   :  { %4998 = vmatprep.subr.bf16.mxu1 %v5270_v49  ;;  %5109 = vmatprep.subr.bf16.mxu0 %v5463_v21 }
 0x5cb   :  { %3797 = vmatmul.mubr.bf16.vlgmr.msra.gmra.mrb[32].mxu0 %v5830_v24  ;;  %v5287_v24 = vld [vmem:[#allocation8 + $0x198] sm:$0xff]  }
 0x5cc   :  { %5110 = vmatpush3.bf16.msra.mxu0 %v5284_v2  ;;  %5125 = vmatprep.mubr.msk.bf16.mxu0 %vm5464_vm0, %v5463_v21 }
 0x5cd   :  { %4999 = vmatpush3.bf16.msra.mxu1 %v5271_v3  ;;  %5111 = vmatprep.subr.bf16.mxu0 %v5463_v21 }
 0x5ce   :  { %5000 = vmatprep.subr.bf16.mxu1 %v5272_v4 }
 0x5d0   :  { %5112 = vmatpush3.bf16.msra.mxu0 %v5285_v59 }
 0x5d1   :  { %5001 = vmatpush3.bf16.msra.mxu1 %v5273_v6  ;;  %5113 = vmatprep.subr.bf16.mxu0 %v5463_v21 }
 0x5d2   :  { %5002 = vmatprep.subr.bf16.mxu1 %v5274_v7 }
 0x5d4   :  { %5114 = vmatpush3.bf16.msra.mxu0 %v5286_v8 }
 0x5d5   :  { %5003 = vmatpush3.bf16.msra.mxu1 %v5275_v9  ;;  %5115 = vmatprep.subr.bf16.mxu0 %v5463_v21  ;;  %v3987_v9 = vrot.slane %v5858_v11, %v5702_v34 }
 0x5d6   :  { %5004 = vmatprep.subr.bf16.mxu1 %v5276_v43 }
 0x5d8   :  { %5116 = vmatpush3.bf16.msra.mxu0 %v5287_v24 }
 0x5d9   :  { %5005 = vmatpush3.bf16.msra.mxu1 %v5277_v45  ;;  %5117 = vmatprep.subr.bf16.mxu0 %v5463_v21 }
 0x5da   :  { %5006 = vmatprep.subr.bf16.mxu1 %v5278_v61 }
 0x5dc   :  { %5118 = vmatpush3.bf16.msra.mxu0 %v5288_v26 }
 0x5dd   :  { %5007 = vmatpush3.bf16.msra.mxu1 %v5279_v17  ;;  %5119 = vmatprep.subr.bf16.mxu0 %v5463_v21 }
 0x5de   :  { %5008 = vmatprep.subr.bf16.mxu1 %v5280_v12 }
 0x5df   :  { %v4915_v18 = vpop.f32.mrb[32].mxu1 }
 0x5e0   :  { %v4916_v19 = vpop.f32.mrb[33].mxu1  ;;  %5120 = vmatpush3.bf16.msra.mxu0 %v5289_v14 }
 0x5e1   :  { %v4917_v29 = vadd.f32 %v4916_v19, %v4915_v18  ;;  %v4918_v10 = vpop.f32.mrb[34].mxu1  ;;  %5009 = vmatpush3.bf16.msra.mxu1 %v5281_v35  ;;  %5121 = vmatprep.subr.bf16.mxu0 %v5463_v21 }
 0x5e2   :  { %v4919_v20 = vpop.f32.mrb[35].mxu1  ;;  %5010 = vmatprep.subr.bf16.mxu1 %v5282_v16 }
 0x5e4   :  { %5122 = vmatpush3.bf16.msra.mxu0 %v5290_v31 }
 0x5e5   :  { %5011 = vmatpush3.bf16.msra.mxu1 %v5283_v0  ;;  %5123 = vmatprep.subr.bf16.mxu0 %v5463_v21  ;;  %v5300_v21 = vld [vmem:[#allocation8 + $0x160] sm:$0xff]  }
 0x5e6   :  { %5018 = vmatprep.subr.bf16.mxu1 %v5292_v32 }
 0x5e8   :  { %4573 = vmatmul.mubr.bf16.vlgmr.msra.gmra.mrb[52].mxu1 %v4040_v27  ;;  %5124 = vmatpush3.bf16.msra.mxu0 %v5291_v36 }
 0x5e9   :  { %5019 = vmatpush3.bf16.msra.mxu1 %v5293_v37 }
 0x5ea   :  { %5020 = vmatprep.subr.bf16.mxu1 %v5294_v22 }
 0x5ed   :  { %5021 = vmatpush3.bf16.msra.mxu1 %v5295_v38 }
 0x5ee   :  { %5022 = vmatprep.subr.bf16.mxu1 %v5296_v39 }
 0x5f1   :  { %5023 = vmatpush3.bf16.msra.mxu1 %v5297_v13 }
 0x5f2   :  { %5024 = vmatprep.subr.bf16.mxu1 %v5298_v41 }
 0x5f5   :  { %5025 = vmatpush3.bf16.msra.mxu1 %v5299_v33 }
 0x5f6   :  { %5026 = vmatprep.subr.bf16.mxu1 %v5300_v21 }
 0x5f9   :  { %5027 = vmatpush3.bf16.msra.mxu1 %v5301_v47 }
 0x5fa   :  { %5028 = vmatprep.subr.bf16.mxu1 %v5302_v52 }
 0x5fd   :  { %5029 = vmatpush3.bf16.msra.mxu1 %v5303_v53 }
 0x5fe   :  { %5030 = vmatprep.subr.bf16.mxu1 %v5304_v15 }
 0x5ff   :  { %v4937_v44 = vpop.f32.mrb[36].mxu1 }
 0x600   :  { %v4938_v46 = vpop.f32.mrb[37].mxu1 }
 0x601   :  { %v4939_v55 = vadd.f32 %v4938_v46, %v4937_v44  ;;  %v4940_v28 = vpop.f32.mrb[38].mxu1  ;;  %5031 = vmatpush3.bf16.msra.mxu1 %v5305_v57 }
 0x602   :  { %v4941_v25 = vpop.f32.mrb[39].mxu1  ;;  %5032 = vmatprep.subr.bf16.mxu1 %v5306_v58 }
 0x603   :  { %v3880_v51 = vadd.f32 %v4939_v55, %v4917_v29  ;;  %v4692_v29 = vld [vmem:[#allocation9] ss:$0 sm:$0xff] }
 0x605   :  { %5033 = vmatpush3.bf16.msra.mxu1 %v5307_v60 }
 0x61f   :  { %v4959_v48 = vpop.f32.mrb[40].mxu1 }
 0x620   :  { %v4960_v5 = vpop.f32.mrb[41].mxu1 }
 0x621   :  { %v4961_v54 = vadd.f32 %v4960_v5, %v4959_v48  ;;  %v4962_v56 = vpop.f32.mrb[42].mxu1 }
 0x622   :  { %v4963_v50 = vpop.f32.mrb[43].mxu1 }
 0x623   :  { %v3920_v62 = vadd.f32 %v4961_v54, %v3880_v51 }
 0x63f   :  { %v3959_v42 = vpop.f32.mrb[44].mxu1 }
 0x640   :  { %v3960_v49 = vadd.f32 %v3959_v42, %v3920_v62  ;;  %v5107_v1 = vpop.f32.mrb[45].mxu1 }
 0x641   :  { %v3962_v2 = vpop.f32.mrb[46].mxu1 }
 0x642   :  { %v4009_v3 = vmul.f32 %v3995_v23, %v3960_v49  ;;  %v5108_v4 = vpop.f32.mrb[47].mxu1 }
 0x644   :  { %vm4016_vm0 = vcmp.ge.f32.partialorder %v4009_v3, 0.0  ;;  %v4023_v59 = vmul.f32 %v4009_v3, %v5655_v63 }
 0x646   :  { %v4030_v6 = vsel %vm4016_vm0, %v4009_v3, %v4023_v59 }
 0x647   :  { %4037 = vst [vmem:[#allocation12 + $0x30] sm:$0xff] %v4030_v6  ;;  %v4044_v7 = vpack.c.bf16 %v4030_v6, %v4030_v6 }
 0x649   :  { %5126 = vmatmul.mubr.bf16.vlgmr.msra.gmra.mrb[36].mxu0 %v4044_v7 }
 0x69b   :  { %v4990_v8 = vpop.f32.mrb[48].mxu1 }
 0x69c   :  { %v4991_v43 = vpop.f32.mrb[49].mxu1 }
 0x69d   :  { %v4992_v24 = vadd.f32 %v4991_v43, %v4990_v8  ;;  %v4993_v45 = vpop.f32.mrb[50].mxu1 }
 0x69e   :  { %v3798_v61 = vpop.f32.mrb[32].mxu0  ;;  %v4994_v26 = vpop.f32.mrb[51].mxu1 }
 0x69f   :  { %v4007_v17 = vmul.f32 %v3987_v9, %v3798_v61  ;;  %v3800_v12 = vpop.f32.mrb[33].mxu0  ;;  %v4535_v20 = vadd.f32 %v4992_v24, %v4692_v29 }
 0x6a0   :  { %v4008_v14 = vmul.f32 %v3991_v30, %v3800_v12  ;;  %v3802_v35 = vpop.f32.mrb[34].mxu0 }
 0x6a1   :  { %vm4014_vm4 = vcmp.ge.f32.partialorder %v4007_v17, 0.0  ;;  %v4021_v16 = vmul.f32 %v4007_v17, %v5655_v63  ;;  %v3803_v18 = vpop.f32.mrb[35].mxu0 }
 0x6a2   :  { %vm4015_vm5 = vcmp.ge.f32.partialorder %v4008_v14, 0.0  ;;  %v4022_v19 = vmul.f32 %v4008_v14, %v5655_v63 }
 0x6a3   :  { %v4028_v34 = vsel %vm4014_vm4, %v4007_v17, %v4021_v16 }
 0x6a4   :  { %4035 = vst [vmem:[#allocation12 + $0x20] sm:$0xff] %v4028_v34  ;;  %v4029_v31 = vsel %vm4015_vm5, %v4008_v14, %v4022_v19  ;;  %v4042_v11 = vpack.c.bf16 %v4028_v34, %v4028_v34 }
 0x6a5   :  { %4036 = vst [vmem:[#allocation12 + $0x28] sm:$0xff] %v4029_v31  ;;  %v4043_v40 = vpack.c.bf16 %v4029_v31, %v4029_v31 }
 0x6a7   :  { %4612 = vmatprep.mubr.bf16.mxu1 %v4043_v40 }
 0x6a8   :  { %4613 = vmatmul.mubr.bf16.vlgmr.msra.gmra.mrb[56].mxu1 %v4042_v11 }
 0x6bb   :  { %v5012_v10 = vpop.f32.mrb[52].mxu1 }
 0x6bc   :  { %v5013_v0 = vpop.f32.mrb[53].mxu1 }
 0x6bd   :  { %v5014_v32 = vadd.f32 %v5013_v0, %v5012_v10  ;;  %v5015_v36 = vpop.f32.mrb[54].mxu1 }
 0x6be   :  { %v5016_v37 = vpop.f32.mrb[55].mxu1 }
 0x6bf   :  { %v4575_v27 = vadd.f32 %v5014_v32, %v4535_v20 }
 0x6c0   :  { %5409 = shalt.err (!%p5406_p8)
}
 0x6c1   :  { %s5410_s24 = scalar_lea.hbm %s5928_s7, 896 }
 0x6c2   :  { %p5411_p9 = scmp.ne.s32.totalorder %s5928_s7, %s5410_s24  ;;  %p5414_p10 = scmp.lt.u32.totalorder %s5410_s24, %s5928_s7 }
 0x6c4   :  { %p5416_p11 = pnand %p5414_p10, %p5411_p9 }
 0x6c6   :  { %5419 = shalt.err (!%p5416_p11)
}
 0x6c7   :  { %4680 = dma.vmem_to_hbm [thread:$0]  %s4678_s20, 896, %s5928_s7, [#allocation13]  }
 0x6c8   :  { %s5466_s29 = smov [#allocation11]  }
 0x6c9   :  { %s4667_s5 = sshll.u32 %s5466_s29, 4  ;;  %s4668_s5 = int_to_ptr.vmem [resolvable:$true] %s4667_s5 }
 0x6ca   :  { %s5420_s30 = scalar_lea.vmem %s4668_s5, 128  ;;  %p5425_p13 = scmp.lt.s32.totalorder %s4668_s5, %s4668_s5 }
 0x6cb   :  { %p5421_p12 = scmp.ne.s32.totalorder %s4668_s5, %s5420_s30  ;;  %p5426_p0 = scmp.lt.s32.totalorder %s5420_s30, %s5420_s30 }
 0x6cd   :  { %p5427_p1 = por %p5426_p0, %p5425_p13 }
 0x6cf   :  { %p5428_p2 = pnand %p5427_p1, %p5421_p12 }
 0x71c   :  { %v4654_v63 = vpop.f32.mrb[36].mxu0 }
 0x71d   :  { %v5127_v22 = vpop.f32.mrb[37].mxu0 }
 0x71e   :  { %v4657_v38 = vpop.f32.mrb[38].mxu0 }
 0x71f   :  { %v5128_v39 = vpop.f32.mrb[39].mxu0 }
 0x77b   :  { %v5034_v13 = vpop.f32.mrb[56].mxu1 }
 0x77c   :  { %v5035_v41 = vpop.f32.mrb[57].mxu1 }
 0x77d   :  { %v5036_v33 = vadd.f32 %v5035_v41, %v5034_v13  ;;  %v5037_v21 = vpop.f32.mrb[58].mxu1 }
 0x77e   :  { %v5038_v47 = vpop.f32.mrb[59].mxu1 }
 0x77f   :  { %v4615_v44 = vadd.f32 %v5036_v33, %v4575_v27 }
 0x781   :  { %v4655_v46 = vadd.f32 %v4654_v63, %v4615_v44 }
 0x783   :  { %4660 = vst [vmem:[#allocation11] sm:$0xff] %v4655_v46 }
 0x784   :  { %5431 = shalt.err (!%p5428_p2)
}
 0x785   :  { %s5432_s9 = scalar_lea.hbm %s5927_s6, 128 }
 0x786   :  { %p5433_p3 = scmp.ne.s32.totalorder %s5927_s6, %s5432_s9  ;;  %p5436_p4 = scmp.lt.u32.totalorder %s5432_s9, %s5927_s6 }
 0x788   :  { %p5438_p5 = pnand %p5436_p4, %p5433_p3 }
 0x78a   :  { %5441 = shalt.err (!%p5438_p5)
}
 0x78b   :  { %4670 = dma.vmem_to_hbm [thread:$0]  %s4668_s5, 128, %s5927_s6, [#allocation5]  }
 0x78c   :  { %5448 = dma.done.wait [#allocation5], 128  }
 0x78d   :  { %5449 = vsyncadd [#allocation5], 4294967168 }
 0x78e   :  { %5450 = dma.done.wait [#allocation13], 896  }
 0x78f   :  { %5451 = vsyncadd [#allocation13], 4294966400 }
 0x790   :  { %4687 = vsyncpa [#allocation4], 1 }
 0x791   :  { %4688 = vsyncpa [#allocation7], 1 }
 0x792   :  { %4689 = vsyncpa [#allocation10], 1 }
 0x793   :  { %4690 = vsyncpa [#allocation5], 1 }
 0x794   :  { %4691 = vsyncpa [#allocation13], 1 }

</bundles_post_ra>
